<compile_context>
chip_gen: v7x
topology: tpu7x:2x2x1
jax: 0.10.0
libtpu: 0.0.40
codegen_flags: <defaults>
</compile_context>

<pallas_src>
import functools

import jax
import jax.numpy as jnp
from jax.experimental import pallas as pl
from jax.experimental.pallas import tpu as pltpu

EPS = 1e-5  # torch.nn.BatchNorm2d default


def _round_up(n, m):
    return ((n + m - 1) // m) * m


# ----------------------------------------------------------------------------
# Fused Pallas kernel: (conv3x3 + BN + LeakyReLU) x 2, one batch element / step
# ----------------------------------------------------------------------------
def double_conv_kernel(x_ref, w1_ref, b1_ref, w2_ref, b2_ref, hmask_ref, o_ref,
                       *, Wp):
    """All spatial handling is done on flattened (row, channel) 2-D arrays.

    x_ref:     (Rx, Cin)   flattened spatially-padded input, extended with
                           (Wp+1) lead zero rows + tail zero rows so every tap
                           is the contiguous row slice [t_off, t_off + rows).
    w1_ref:    (9*Cin, Cp) conv1 taps stacked along K, BN1 scale folded in.
    b1_ref:    (1, Cp) f32 BN1 shift.
    w2_ref:    (9*Cp, Cop) conv2 taps stacked along K, BN2 scale folded in.
    b2_ref:    (1, Cop) f32 BN2 shift.
    hmask_ref: (Rh, 1) f32 1.0 on interior rows of the padded intermediate,
                           0.0 on halo / round-up rows (replaces the old halo
                           scratch zeroing + misaligned scatter).
    o_ref:     (S, Cop)    lane-dense output rows, S = H*Wp (the Wp-W garbage
                           columns and Cop-Cout pad lanes are sliced off in the
                           wrapper).
    """
    Rh = hmask_ref.shape[0]
    S = o_ref.shape[0]
    mxu_dtype = w1_ref.dtype
    offs = [ky * Wp + kx for ky in range(3) for kx in range(3)]

    # ---- conv1 (+ folded BN1 scale): ONE MXU dot over K = 9*Cin -------------
    xv = x_ref[...]                                   # stays in mxu_dtype
    patch1 = jnp.concatenate([xv[o:o + Rh, :] for o in offs], axis=-1)
    h = jnp.dot(patch1, w1_ref[...], preferred_element_type=jnp.float32)
    h = h + b1_ref[...]                               # BN1 shift (scale in w1)
    h = jnp.where(h > 0.0, h, 0.1 * h)                # LeakyReLU(0.1), f32
    # Zero the 1-px halo rows (conv2 'same' padding) and the round-up rows with
    # one broadcast multiply; padded channels [Cmid, Cp) are already exactly 0.
    h = (h * hmask_ref[...]).astype(mxu_dtype)        # (Rh, Cp), mxu dtype

    # ---- conv2 (+ folded BN2 scale): ONE MXU dot over K = 9*Cp --------------
    patch2 = jnp.concatenate([h[o:o + S, :] for o in offs], axis=-1)
    y = jnp.dot(patch2, w2_ref[...], preferred_element_type=jnp.float32)
    y = y + b2_ref[...]
    o_ref[...] = jnp.where(y > 0.0, y, 0.1 * y).astype(o_ref.dtype)


# ----------------------------------------------------------------------------
# Host-side parameter folding (pure layout / math glue)
# ----------------------------------------------------------------------------
def fold_conv_bn(w_oihw, gamma, beta, mean, var, c_in_pad=None, c_out_pad=None):
    """Torch conv weight (Cout, Cin, 3, 3) + eval-mode BN running stats ->
    (9*Cin_p, Cout_p) tap-stacked weight with the BN scale folded in (row index
    = (3*ky + kx)*Cin_p + cin), plus the (1, Cout_p) BN shift (f32)."""
    cout, cin = int(w_oihw.shape[0]), int(w_oihw.shape[1])
    cip = cin if c_in_pad is None else c_in_pad
    cop = cout if c_out_pad is None else c_out_pad
    scale = gamma / jnp.sqrt(var + EPS)
    shift = beta - mean * scale
    w = jnp.transpose(w_oihw, (2, 3, 1, 0)) * scale[None, None, None, :]  # (3,3,Cin,Cout)
    w = jnp.pad(w, ((0, 0), (0, 0), (0, cip - cin), (0, cop - cout)))
    w = w.reshape(9 * cip, cop)
    shift = jnp.pad(shift, (0, cop - cout))[None, :]
    return w, shift


def double_conv_forward(x_nchw, params, mxu_dtype=jnp.bfloat16,
                        out_dtype=jnp.float32):
    """Pallas implementation of DoubleConv.forward.  Input/output are NCHW f32.

    mxu_dtype=bfloat16 (default) halves operand DMA / VMEM residency and uses
    the bf16 MXU path; accumulation and the BN/LeakyReLU epilogues stay f32.
    mxu_dtype=float32 is the exactness test path.
    """
    N, Cin, H, W = x_nchw.shape
    Cmid = int(params["w1"].shape[0])
    Cout = int(params["w2"].shape[0])
    Cp = _round_up(Cmid, 128)     # padded mid channels (weights / VMEM only)
    Cop = _round_up(Cout, 128)    # padded out channels -> lane-dense stores
    Hp, Wp = H + 2, W + 2

    # Flattened-row geometry: every 3x3 tap is a contiguous row-offset slice.
    S = H * Wp                          # output rows (y, x_pad); x_pad >= W cut
    Rh = _round_up(Hp * Wp + 2, 8)      # rows of the padded intermediate
    Rx = _round_up(Rh + 2 * Wp + 2, 8)  # rows of the extended input

    # NHWC + 1-px 'same' pad + flatten + lead/tail zero rows: XLA layout glue.
    x = jnp.transpose(x_nchw, (0, 2, 3, 1)).astype(jnp.float32)
    xp = jnp.pad(x, ((0, 0), (1, 1), (1, 1), (0, 0))).reshape(N, Hp * Wp, Cin)
    lead = Wp + 1
    xf = jnp.pad(xp, ((0, 0), (lead, Rx - Hp * Wp - lead), (0, 0))).astype(mxu_dtype)

    # Interior-row mask of the padded intermediate (halo + round-up rows -> 0).
    q = jnp.arange(Rh)
    py, px = q // Wp, q % Wp
    hmask = (((py >= 1) & (py <= H) & (px >= 1) & (px <= W))
             .astype(jnp.float32)[:, None])                       # (Rh, 1)

    w1, b1 = fold_conv_bn(params["w1"], params["g1"], params["b1"],
                          params["m1"], params["v1"], c_out_pad=Cp)
    w2, b2 = fold_conv_bn(params["w2"], params["g2"], params["b2"],
                          params["m2"], params["v2"], c_in_pad=Cp, c_out_pad=Cop)
    w1 = w1.astype(mxu_dtype)
    w2 = w2.astype(mxu_dtype)
    b1 = b1.astype(jnp.float32)
    b2 = b2.astype(jnp.float32)

    it = jnp.dtype(mxu_dtype).itemsize
    ot = jnp.dtype(out_dtype).itemsize
    cost = pl.CostEstimate(
        flops=2 * N * (Rh * (9 * Cin) * Cp + S * (9 * Cp) * Cop),
        transcendentals=0,
        bytes_accessed=(N * Rx * Cin * it + w1.size * it + w2.size * it
                        + (b1.size + b2.size + Rh) * 4 + N * S * Cop * ot),
    )

    # Block working set (double-buffered I/O blocks + weights + tap patches +
    # f32 intermediates) -> scoped-VMEM limit with 2x headroom, clamped to a
    # value valid on every generation (v7x physical VMEM per TC = 64 MiB).
    block_bytes = (2 * Rx * Cin * it + 2 * S * Cop * ot
                   + 2 * (w1.size + w2.size) * it
                   + 2 * (b1.size + b2.size) * 4 + 2 * Rh * 4
                   + Rh * 9 * Cin * it + S * 9 * Cp * it
                   + 3 * Rh * Cp * 4 + 2 * S * Cop * 4)
    vmem_limit = int(min(64 * 1024 * 1024, max(32 * 1024 * 1024, 2 * block_bytes)))

    out = pl.pallas_call(
        functools.partial(double_conv_kernel, Wp=Wp),
        out_shape=jax.ShapeDtypeStruct((N, S, Cop), out_dtype),
        grid_spec=pltpu.PrefetchScalarGridSpec(
            num_scalar_prefetch=0,
            grid=(N,),
            in_specs=[
                pl.BlockSpec((None, Rx, Cin), lambda n: (n, 0, 0)),
                pl.BlockSpec((9 * Cin, Cp), lambda n: (0, 0)),
                pl.BlockSpec((1, Cp), lambda n: (0, 0)),
                pl.BlockSpec((9 * Cp, Cop), lambda n: (0, 0)),
                pl.BlockSpec((1, Cop), lambda n: (0, 0)),
                pl.BlockSpec((Rh, 1), lambda n: (0, 0)),
            ],
            out_specs=pl.BlockSpec((None, S, Cop), lambda n: (n, 0, 0)),
        ),
        compiler_params=pltpu.CompilerParams(
            dimension_semantics=("parallel",),
            vmem_limit_bytes=vmem_limit,
        ),
        cost_estimate=cost,
    )(xf, w1, b1, w2, b2, hmask)

    # Drop the Wp-W garbage columns and the channel padding; back to NCHW.
    # TODO(synk): when Cout << 128 the lane-dense store writes ~16x the needed
    #             HBM bytes; emit bf16 output (out_dtype=bfloat16) and/or fold
    #             this slice + transpose into the consumer at real model sizes.
    out = out.reshape(N, H, Wp, Cop)[:, :, :W, :Cout].astype(jnp.float32)
    return jnp.transpose(out, (0, 3, 1, 2))          # -> NCHW


# ----------------------------------------------------------------------------
# Pure-JAX references (for verification)
# ----------------------------------------------------------------------------
def reference_forward(x_nchw, params):
    """Torch DoubleConv semantics (eval-mode BN), unfolded, all f32."""
    def bn(y, g, b, m, v):
        g, b, m, v = (t[None, :, None, None] for t in (g, b, m, v))
        return (y - m) / jnp.sqrt(v + EPS) * g + b

    def lrelu(y):
        return jnp.where(y > 0, y, 0.1 * y)

    y = jax.lax.conv_general_dilated(
        x_nchw, params["w1"], (1, 1), "SAME",
        dimension_numbers=("NCHW", "OIHW", "NCHW"))
    y = lrelu(bn(y, params["g1"], params["b1"], params["m1"], params["v1"]))
    y = jax.lax.conv_general_dilated(
        y, params["w2"], (1, 1), "SAME",
        dimension_numbers=("NCHW", "OIHW", "NCHW"))
    y = lrelu(bn(y, params["g2"], params["b2"], params["m2"], params["v2"]))
    return y


def reference_forward_rounded(x_nchw, params, operand_dtype):
    """Mirror of the kernel numerics: BN folded into the conv weights, MXU
    operands (input / folded weights / intermediate) rounded to operand_dtype,
    accumulation and epilogues in f32.  Used for the tight bf16-path check."""
    def lrelu(y):
        return jnp.where(y > 0, y, 0.1 * y)

    def conv(x, w):
        return jax.lax.conv_general_dilated(
            x.astype(operand_dtype), w.astype(operand_dtype), (1, 1), "SAME",
            dimension_numbers=("NCHW", "OIHW", "NCHW"),
            preferred_element_type=jnp.float32)

    s1 = params["g1"] / jnp.sqrt(params["v1"] + EPS)
    s2 = params["g2"] / jnp.sqrt(params["v2"] + EPS)
    w1 = params["w1"] * s1[:, None, None, None]
    w2 = params["w2"] * s2[:, None, None, None]
    b1 = (params["b1"] - params["m1"] * s1)[None, :, None, None]
    b2 = (params["b2"] - params["m2"] * s2)[None, :, None, None]
    h = lrelu(conv(x_nchw, w1) + b1)
    return lrelu(conv(h, w2) + b2)


# ----------------------------------------------------------------------------
# Main
# ----------------------------------------------------------------------------
if __name__ == "__main__":
    N, Cin, H, W = 2, 4, 16, 16
    Cmid = Cout = 8   # mid_channels defaults to out_channels

    key = jax.random.PRNGKey(0)
    ks = jax.random.split(key, 11)

    params = {
        # Conv2d(in, mid, 3, padding='same', bias=False) weight: (Cmid, Cin, 3, 3)
        "w1": jax.random.normal(ks[0], (Cmid, Cin, 3, 3), jnp.float32) * 0.2,
        "g1": jax.random.uniform(ks[1], (Cmid,), jnp.float32, 0.5, 1.5),
        "b1": jax.random.normal(ks[2], (Cmid,), jnp.float32) * 0.1,
        "m1": jax.random.normal(ks[3], (Cmid,), jnp.float32) * 0.1,
        "v1": jax.random.uniform(ks[4], (Cmid,), jnp.float32, 0.5, 1.5),
        # Conv2d(mid, out, 3, padding='same', bias=False) weight: (Cout, Cmid, 3, 3)
        "w2": jax.random.normal(ks[5], (Cout, Cmid, 3, 3), jnp.float32) * 0.2,
        "g2": jax.random.uniform(ks[6], (Cout,), jnp.float32, 0.5, 1.5),
        "b2": jax.random.normal(ks[7], (Cout,), jnp.float32) * 0.1,
        "m2": jax.random.normal(ks[8], (Cout,), jnp.float32) * 0.1,
        "v2": jax.random.uniform(ks[9], (Cout,), jnp.float32, 0.5, 1.5),
    }

    x = jax.random.normal(ks[10], (N, Cin, H, W), jnp.float32)

    fwd = jax.jit(double_conv_forward, static_argnames=("mxu_dtype", "out_dtype"))

    # f32 MXU path: strict check against the unfolded torch-semantics reference.
    ref = jax.block_until_ready(reference_forward(x, params))
    out_f32 = jax.block_until_ready(fwd(x, params, mxu_dtype=jnp.float32))
    assert out_f32.shape == (N, Cout, H, W), out_f32.shape
    err32 = float(jnp.max(jnp.abs(out_f32 - ref)))
    if not jnp.allclose(out_f32, ref, atol=2e-4, rtol=2e-4):
        raise AssertionError(f"f32 mismatch: max abs err = {err32}")

    # bf16 MXU path (production default): check against a reference whose
    # operands are rounded to bf16 the same way, with a tight tolerance.
    ref_bf16 = jax.block_until_ready(
        reference_forward_rounded(x, params, jnp.bfloat16))
    out_bf16 = jax.block_until_ready(fwd(x, params))   # default mxu_dtype=bf16
    assert out_bf16.shape == (N, Cout, H, W), out_bf16.shape
    err16 = float(jnp.max(jnp.abs(out_bf16 - ref_bf16)))
    if not jnp.allclose(out_bf16, ref_bf16, atol=5e-3, rtol=5e-3):
        raise AssertionError(f"bf16 mismatch: max abs err = {err16}")

    print("KERNEL_OK")
</pallas_src>

<mosaic_0001>
module attributes {stable_mosaic.version = 11 : i64} {
  func.func @double_conv_kernel(%arg0: i32, %arg1: memref<1x368x4xf32, #tpu.memory_space<vmem>>, %arg2: memref<36x128xf32, #tpu.memory_space<vmem>>, %arg3: memref<1x128xf32, #tpu.memory_space<vmem>>, %arg4: memref<1152x128xf32, #tpu.memory_space<vmem>>, %arg5: memref<1x128xf32, #tpu.memory_space<vmem>>, %arg6: memref<328x1xf32, #tpu.memory_space<vmem>>, %arg7: memref<1x288x128xf32, #tpu.memory_space<vmem>>) attributes {dimension_semantics = [#tpu.dimension_semantics<parallel>], iteration_bounds = array<i64: 2>, scalar_prefetch = 0 : i64, scratch_operands = 0 : i64, tpu.core_type = #tpu.core_type<tc>, window_params = [{transform_indices = @transform_0, window_bounds = array<i64: 1, 368, 4>}, {pipeline_mode = #tpu.pipeline_mode<synchronous>, transform_indices = @transform_1, window_bounds = array<i64: 36, 128>}, {pipeline_mode = #tpu.pipeline_mode<synchronous>, transform_indices = @transform_2, window_bounds = array<i64: 1, 128>}, {pipeline_mode = #tpu.pipeline_mode<synchronous>, transform_indices = @transform_3, window_bounds = array<i64: 1152, 128>}, {pipeline_mode = #tpu.pipeline_mode<synchronous>, transform_indices = @transform_4, window_bounds = array<i64: 1, 128>}, {pipeline_mode = #tpu.pipeline_mode<synchronous>, transform_indices = @transform_5, window_bounds = array<i64: 328, 1>}, {transform_indices = @transform_6, window_bounds = array<i64: 1, 288, 128>}]} {
    %c0 = arith.constant 0 : index
    %c0_0 = arith.constant 0 : index
    %c0_1 = arith.constant 0 : index
    %0 = vector.load %arg1[%c0, %c0_0, %c0_1] : memref<1x368x4xf32, #tpu.memory_space<vmem>>, vector<1x368x4xf32>
    %1 = vector.shape_cast %0 : vector<1x368x4xf32> to vector<368x4xf32>
    %2 = vector.extract_strided_slice %1 {offsets = [0, 0], sizes = [328, 4], strides = [1, 1]} : vector<368x4xf32> to vector<328x4xf32>
    %3 = vector.extract_strided_slice %1 {offsets = [1, 0], sizes = [328, 4], strides = [1, 1]} : vector<368x4xf32> to vector<328x4xf32>
    %4 = vector.extract_strided_slice %1 {offsets = [2, 0], sizes = [328, 4], strides = [1, 1]} : vector<368x4xf32> to vector<328x4xf32>
    %5 = vector.extract_strided_slice %1 {offsets = [18, 0], sizes = [328, 4], strides = [1, 1]} : vector<368x4xf32> to vector<328x4xf32>
    %6 = vector.extract_strided_slice %1 {offsets = [19, 0], sizes = [328, 4], strides = [1, 1]} : vector<368x4xf32> to vector<328x4xf32>
    %7 = vector.extract_strided_slice %1 {offsets = [20, 0], sizes = [328, 4], strides = [1, 1]} : vector<368x4xf32> to vector<328x4xf32>
    %8 = vector.extract_strided_slice %1 {offsets = [36, 0], sizes = [328, 4], strides = [1, 1]} : vector<368x4xf32> to vector<328x4xf32>
    %9 = vector.extract_strided_slice %1 {offsets = [37, 0], sizes = [328, 4], strides = [1, 1]} : vector<368x4xf32> to vector<328x4xf32>
    %10 = vector.extract_strided_slice %1 {offsets = [38, 0], sizes = [328, 4], strides = [1, 1]} : vector<368x4xf32> to vector<328x4xf32>
    %11 = tpu.concatenate %2, %3, %4, %5, %6, %7, %8, %9, %10 in 1 : vector<328x4xf32>, vector<328x4xf32>, vector<328x4xf32>, vector<328x4xf32>, vector<328x4xf32>, vector<328x4xf32>, vector<328x4xf32>, vector<328x4xf32>, vector<328x4xf32> -> vector<328x36xf32>
    %c0_2 = arith.constant 0 : index
    %c0_3 = arith.constant 0 : index
    %12 = vector.load %arg2[%c0_2, %c0_3] : memref<36x128xf32, #tpu.memory_space<vmem>>, vector<36x128xf32>
    %cst = arith.constant dense<0.000000e+00> : vector<328x128xf32>
    %13 = tpu.matmul %11, %12, %cst {dimension_numbers = #tpu.dot_dimension_numbers<[1], [0], [0], [1], [0, 0, 1, 1], [], []>} : vector<328x36xf32>, vector<36x128xf32>, vector<328x128xf32> -> vector<328x128xf32>
    %c0_4 = arith.constant 0 : index
    %c0_5 = arith.constant 0 : index
    %14 = vector.load %arg3[%c0_4, %c0_5] : memref<1x128xf32, #tpu.memory_space<vmem>>, vector<1x128xf32>
    %15 = vector.broadcast %14 : vector<1x128xf32> to vector<328x128xf32>
    %16 = arith.addf %13, %15 : vector<328x128xf32>
    %cst_6 = arith.constant 0.000000e+00 : f32
    %17 = vector.broadcast %cst_6 : f32 to vector<328x128xf32>
    %18 = arith.cmpf ogt, %16, %17 : vector<328x128xf32>
    %cst_7 = arith.constant 1.000000e-01 : f32
    %19 = vector.broadcast %cst_7 : f32 to vector<328x128xf32>
    %20 = arith.mulf %19, %16 : vector<328x128xf32>
    %21 = arith.select %18, %16, %20 : vector<328x128xi1>, vector<328x128xf32>
    %c0_8 = arith.constant 0 : index
    %c0_9 = arith.constant 0 : index
    %22 = vector.load %arg6[%c0_8, %c0_9] : memref<328x1xf32, #tpu.memory_space<vmem>>, vector<328x1xf32>
    %23 = vector.broadcast %22 : vector<328x1xf32> to vector<328x128xf32>
    %24 = arith.mulf %21, %23 : vector<328x128xf32>
    %25 = vector.extract_strided_slice %24 {offsets = [0, 0], sizes = [288, 128], strides = [1, 1]} : vector<328x128xf32> to vector<288x128xf32>
    %26 = vector.extract_strided_slice %24 {offsets = [1, 0], sizes = [288, 128], strides = [1, 1]} : vector<328x128xf32> to vector<288x128xf32>
    %27 = vector.extract_strided_slice %24 {offsets = [2, 0], sizes = [288, 128], strides = [1, 1]} : vector<328x128xf32> to vector<288x128xf32>
    %28 = vector.extract_strided_slice %24 {offsets = [18, 0], sizes = [288, 128], strides = [1, 1]} : vector<328x128xf32> to vector<288x128xf32>
    %29 = vector.extract_strided_slice %24 {offsets = [19, 0], sizes = [288, 128], strides = [1, 1]} : vector<328x128xf32> to vector<288x128xf32>
    %30 = vector.extract_strided_slice %24 {offsets = [20, 0], sizes = [288, 128], strides = [1, 1]} : vector<328x128xf32> to vector<288x128xf32>
    %31 = vector.extract_strided_slice %24 {offsets = [36, 0], sizes = [288, 128], strides = [1, 1]} : vector<328x128xf32> to vector<288x128xf32>
    %32 = vector.extract_strided_slice %24 {offsets = [37, 0], sizes = [288, 128], strides = [1, 1]} : vector<328x128xf32> to vector<288x128xf32>
    %33 = vector.extract_strided_slice %24 {offsets = [38, 0], sizes = [288, 128], strides = [1, 1]} : vector<328x128xf32> to vector<288x128xf32>
    %34 = tpu.concatenate %25, %26, %27, %28, %29, %30, %31, %32, %33 in 1 : vector<288x128xf32>, vector<288x128xf32>, vector<288x128xf32>, vector<288x128xf32>, vector<288x128xf32>, vector<288x128xf32>, vector<288x128xf32>, vector<288x128xf32>, vector<288x128xf32> -> vector<288x1152xf32>
    %c0_10 = arith.constant 0 : index
    %c0_11 = arith.constant 0 : index
    %35 = vector.load %arg4[%c0_10, %c0_11] : memref<1152x128xf32, #tpu.memory_space<vmem>>, vector<1152x128xf32>
    %cst_12 = arith.constant dense<0.000000e+00> : vector<288x128xf32>
    %36 = tpu.matmul %34, %35, %cst_12 {dimension_numbers = #tpu.dot_dimension_numbers<[1], [0], [0], [1], [0, 0, 1, 1], [], []>} : vector<288x1152xf32>, vector<1152x128xf32>, vector<288x128xf32> -> vector<288x128xf32>
    %c0_13 = arith.constant 0 : index
    %c0_14 = arith.constant 0 : index
    %37 = vector.load %arg5[%c0_13, %c0_14] : memref<1x128xf32, #tpu.memory_space<vmem>>, vector<1x128xf32>
    %38 = vector.broadcast %37 : vector<1x128xf32> to vector<288x128xf32>
    %39 = arith.addf %36, %38 : vector<288x128xf32>
    %cst_15 = arith.constant 0.000000e+00 : f32
    %40 = vector.broadcast %cst_15 : f32 to vector<288x128xf32>
    %41 = arith.cmpf ogt, %39, %40 : vector<288x128xf32>
    %cst_16 = arith.constant 1.000000e-01 : f32
    %42 = vector.broadcast %cst_16 : f32 to vector<288x128xf32>
    %43 = arith.mulf %42, %39 : vector<288x128xf32>
    %44 = arith.select %41, %39, %43 : vector<288x128xi1>, vector<288x128xf32>
    %c0_17 = arith.constant 0 : index
    %c0_18 = arith.constant 0 : index
    %c0_19 = arith.constant 0 : index
    %45 = vector.load %arg7[%c0_17, %c0_18, %c0_19] : memref<1x288x128xf32, #tpu.memory_space<vmem>>, vector<1x288x128xf32>
    %46 = vector.shape_cast %45 : vector<1x288x128xf32> to vector<288x128xf32>
    %47 = vector.shape_cast %44 : vector<288x128xf32> to vector<1x288x128xf32>
    tpu.vector_store %arg7[%c0_17, %c0_18, %c0_19], %47 {strides = array<i32>} : memref<1x288x128xf32, #tpu.memory_space<vmem>>, vector<1x288x128xf32>,
    return
  }
  func.func @transform_0(%arg0: i32) -> (i32, i32, i32) {
    %c0_i32 = arith.constant 0 : i32
    %c0_i32_0 = arith.constant 0 : i32
    %c0_i32_1 = arith.constant 0 : i32
    return %arg0, %c0_i32, %c0_i32_0 : i32, i32, i32
  }
  func.func @transform_1(%arg0: i32) -> (i32, i32) {
    %c0_i32 = arith.constant 0 : i32
    %c0_i32_0 = arith.constant 0 : i32
    %c0_i32_1 = arith.constant 0 : i32
    return %c0_i32, %c0_i32_0 : i32, i32
  }
  func.func @transform_2(%arg0: i32) -> (i32, i32) {
    %c0_i32 = arith.constant 0 : i32
    %c0_i32_0 = arith.constant 0 : i32
    %c0_i32_1 = arith.constant 0 : i32
    return %c0_i32, %c0_i32_0 : i32, i32
  }
  func.func @transform_3(%arg0: i32) -> (i32, i32) {
    %c0_i32 = arith.constant 0 : i32
    %c0_i32_0 = arith.constant 0 : i32
    %c0_i32_1 = arith.constant 0 : i32
    return %c0_i32, %c0_i32_0 : i32, i32
  }
  func.func @transform_4(%arg0: i32) -> (i32, i32) {
    %c0_i32 = arith.constant 0 : i32
    %c0_i32_0 = arith.constant 0 : i32
    %c0_i32_1 = arith.constant 0 : i32
    return %c0_i32, %c0_i32_0 : i32, i32
  }
  func.func @transform_5(%arg0: i32) -> (i32, i32) {
    %c0_i32 = arith.constant 0 : i32
    %c0_i32_0 = arith.constant 0 : i32
    %c0_i32_1 = arith.constant 0 : i32
    return %c0_i32, %c0_i32_0 : i32, i32
  }
  func.func @transform_6(%arg0: i32) -> (i32, i32, i32) {
    %c0_i32 = arith.constant 0 : i32
    %c0_i32_0 = arith.constant 0 : i32
    %c0_i32_1 = arith.constant 0 : i32
    return %arg0, %c0_i32, %c0_i32_0 : i32, i32, i32
  }
}

</mosaic_0001>

<bundles_post_ra>
// kernel: double_conv_forward.1
= control target key start
LH: loop header
LB: loop body
LE: loop exit
PB: predicated region body
PF: predicated region fallthrough
CT: control target
= control target key end

     0   :  { %s6227_s21 = smov 0   ;;  %s10279_s0 = inlined_call_operand.vmem [shape: f32[2,368,4], index: 0, kind: input, shape index: {}]   ;;  %s10280_s1 = inlined_call_operand.vmem [shape: f32[36,128], index: 1, kind: input, shape index: {}]   ;;  %s10281_s2 = inlined_call_operand.vmem [shape: f32[1,128], index: 2, kind: input, shape index: {}]   ;;  %s10282_s3 = inlined_call_operand.vmem [shape: f32[1152,128], index: 3, kind: input, shape index: {}]   ;;  %s10283_s4 = inlined_call_operand.vmem [shape: f32[1,128], index: 4, kind: input, shape index: {}]   ;;  %s10284_s5 = inlined_call_operand.vmem [shape: f32[328,1], index: 5, kind: input, shape index: {}]   ;;  %s10285_s6 = inlined_call_operand.vmem [shape: f32[2,288,128], index: 6, kind: output, shape index: {}]  }
   0x1 LB: > { %s5277_s22 = sadd.s32 4294967295, %s6178_s21   ;;  %p5281_p0 = scmp.ge.s32.totalorder %s6178_s21, 1  ;;  %s6178_s21 = sphi %s6227_s21, %s16_s21  }
   0x2   : > { %p212_p1 = scmp.lt.s32.totalorder %s6178_s21, 3 }
   0x4   : > { %p213_p2 = pnand %p5281_p0, %p212_p1 }
   0x6   : > { %216 = sbr.rel (%p213_p2) target bundleno = 1492 (0x5d4), region = 44 }
   0xd   : > { %p242_p3 = scmp.lt.s32.totalorder %s5277_s22, 1  ;;  %vm547_vm0 = vcmask 1045504   ;;  %vm340_vm1 = vcmask 1046528   ;;  %vm10302_vm2 = vcmask 1044480   ;;  %s6180_s27 = smov 12   ;;  %vm10303_vm3 = vcmask 1043456  }
   0xe   : > { %s6181_s28 = smov 4   ;;  %s6182_s29 = smov 16   ;;  %vm10300_vm4 = vcmask 1042432   ;;  %vm10301_vm5 = vcmask 1041408   ;;  %v2176_v41 = vld [vmem:[%s10280_s1] sm:$0xff]  ;;  %v2177_v42 = vld [vmem:[%s10280_s1 + $0x8] sm:$0xff] }
   0xf   : > { %s10710_s22 = smov (!%p242_p3, %s5277_s22), 1  ;;  %s6183_s30 = smov 8   ;;  %v2178_v44 = vld [vmem:[%s10280_s1 + $0x10] sm:$0xff]  ;;  %v2179_v45 = vld [vmem:[%s10280_s1 + $0x18] sm:$0xff]  ;;  %v10292_v46 = vmov 0.0|0.0   ;;  %v5648_v47 = vpack.c.bf16 %v2177_v42, %v2176_v41  ;;  %vm6189_vm6 = vmmov 0  }
  0x10   : > { %s6125_s23 = smul.u32 368, %s10710_s22  ;;  %s6184_s7 = smov 20   ;;  %5647 = vmatprep.subr.bf16.mxu0 %v10292_v46  ;;  %5877 = vmatprep.subr.bf16.mxu1 %v10292_v46  ;;  %v5651_v51 = vpack.c.bf16 %v2179_v45, %v2178_v44  ;;  %v10294_v52 = vmov 0.0   ;;  %v2180_v57 = vld [vmem:[%s10280_s1 + $0x20] sm:$0xf]  ;;  %vm1840_vm7 = vcmask 31744  }
  0x11   : > { %s6185_s8 = smov 24   ;;  %s6186_s9 = smov 28   ;;  %5649 = vmatpush3.bf16.msra.mxu0 %v5648_v47  ;;  %5438 = vmatprep.mubr.msk.f32.mxu0 %vm6189_vm6, %v10294_v52  ;;  %vm1882_vm8 = vcmask 64512   ;;  %vm1924_vm9 = vcmask 97280   ;;  %vm1966_vm10 = vcmask 130048   ;;  %vm2008_vm11 = vcmask 162816  }
  0x12   : > { %s6241_s26 = scalar_lea.vmem %s10279_s0, %s6125_s23  ;;  %s6187_s10 = smov 32   ;;  %5650 = vmatprep.subr.bf16.mxu0 %v10292_v46  ;;  %vm2050_vm12 = vcmask 195584   ;;  %vm2092_vm13 = vcmask 228352   ;;  %vm2134_vm14 = vcmask 261120   ;;  %vm2188_vm15 = vcmask 293888  }
  0x13   : > { %v6244_v0 = vld [vmem:[%s6241_s26 + $0x10] sm:$0xff]  ;;  %v6247_v1 = vld [vmem:[%s6241_s26 + $0x18] sm:$0xff]  ;;  %v6250_v2 = vld [vmem:[%s6241_s26] sm:$0xff]  ;;  %s6126_s23 = smul.u32 288, %s10710_s22 }
  0x14   : > { %v551_v3 = vrot.slane %v6244_v0, 2  ;;  %v553_v4 = vrot.slane %v6247_v1, 2  ;;  %v6255_v5 = vld [vmem:[%s6241_s26 + $0x8] sm:$0xff]  ;;  %v341_v6 = vrot.slane %v6250_v2, 1  ;;  %v884_v7 = vrot.slane %v6244_v0, 3  ;;  %v6276_v19 = vld [vmem:[%s6241_s26 + $0x20] sm:$0xff] }
  0x15   : > { %v342_v8 = vrot.slane %v6255_v5, 1  ;;  %v885_v9 = vrot.slane %v6247_v1, 3  ;;  %v548_v10 = vrot.slane %v6250_v2, 2  ;;  %v549_v11 = vrot.slane %v6255_v5, 2  ;;  %v6279_v20 = vld [vmem:[%s6241_s26 + $0x28] sm:$0xff]  ;;  %v6310_v38 = vld [vmem:[%s6241_s26 + $0x30] sm:$0xff]  ;;  %5652 = vmatpush3.bf16.msra.mxu0 %v5651_v51 }
  0x16   : > { %v6264_v12 = vsel %vm547_vm0, %v551_v3, %v553_v4  ;;  %v1091_v15 = vrot.slane %v6244_v0, 4  ;;  %v1092_v16 = vrot.slane %v6247_v1, 4  ;;  %v344_v18 = vrot.slane %v6244_v0, 1  ;;  %5436 = vmatprep.subr.mxu0 %v10294_v52  ;;  %v6356_v61 = vld [vmem:[%s6241_s26 + $0x38] sm:$0xff] }
  0x17   : > { %760 = vrot.lane.b32.xlu1 %v6264_v12, %s6180_s27  ;;  %v343_v13 = vsel %vm340_vm1, %v341_v6, %v342_v8  ;;  %v886_v14 = vsel %vm10302_vm2, %v884_v7, %v885_v9  ;;  %v550_v17 = vsel %vm547_vm0, %v548_v10, %v549_v11  ;;  %v1094_v22 = vrot.slane %v6276_v19, 4 }
  0x18   : > { %424 = vrot.lane.b32.xlu0 %v343_v13, %s6181_s28  ;;  %v1093_v21 = vsel %vm10303_vm3, %v1091_v15, %v1092_v16  ;;  %v1096_v23 = vrot.slane %v6279_v20, 4  ;;  %v345_v24 = vsel %vm340_vm1, %v342_v8, %v344_v18  ;;  %v1427_v26 = vrot.slane %v6276_v19, 5 }
  0x19   : > { %v1428_v27 = vrot.slane %v6279_v20, 5  ;;  %v552_v28 = vsel %vm547_vm0, %v549_v11, %v551_v3  ;;  %v555_v29 = vrot.slane %v6276_v19, 2  ;;  %v1634_v31 = vrot.slane %v6276_v19, 6  ;;  %5437 = vmatpush3.msk.msra.mxu0 %vm10303_vm3, %v2180_v57 }
  0x1a   : > { %v6290_v25 = vsel %vm10303_vm3, %v1094_v22, %v1096_v23  ;;  %v1635_v32 = vrot.slane %v6279_v20, 6  ;;  %v887_v34 = vrot.slane %v6276_v19, 3  ;;  %v346_v37 = vrot.slane %v6247_v1, 1  ;;  %5653 = vmatprep.subr.bf16.mxu0 %v10292_v46 }
  0x1b   : > { %967 = vrot.lane.b32.xlu1 %v886_v14, %s6182_s29  ;;  %v1429_v30 = vsel %vm10300_vm4, %v1427_v26, %v1428_v27  ;;  %v556_v33 = vsel %vm547_vm0, %v553_v4, %v555_v29  ;;  %v1095_v39 = vsel %vm10303_vm3, %v1092_v16, %v1094_v22  ;;  %v1098_v40 = vrot.slane %v6310_v38, 4  ;;  %v6382_v14 = vld [vmem:[%s6241_s26 + $0x40] sm:$0xff] }
  0x1c   : > { %631 = vrot.lane.b32.xlu0 %v550_v17, %s6183_s30  ;;  %v1636_v35 = vsel %vm10301_vm5, %v1634_v31, %v1635_v32  ;;  %v888_v36 = vsel %vm10302_vm2, %v885_v9, %v887_v34  ;;  %v347_v43 = vsel %vm340_vm1, %v344_v18, %v346_v37  ;;  %v1430_v49 = vrot.slane %v6310_v38, 5 }
  0x1d   : > { %v1099_v48 = vsel %vm10303_vm3, %v1096_v23, %v1098_v40  ;;  %v557_v50 = vrot.slane %v6279_v20, 2  ;;  %v1637_v54 = vrot.slane %v6310_v38, 6  ;;  %v889_v56 = vrot.slane %v6279_v20, 3 }
  0x1e   : > { %v1431_v53 = vsel %vm10300_vm4, %v1428_v27, %v1430_v49  ;;  %v348_v60 = vrot.slane %v6276_v19, 1  ;;  %v1100_v62 = vrot.slane %v6356_v61, 4  ;;  %v1432_v4 = vrot.slane %v6356_v61, 5 }
  0x1f   : > { %1174 = vrot.lane.b32.xlu1 %v1093_v21, %s6184_s7  ;;  %v558_v55 = vsel %vm547_vm0, %v555_v29, %v557_v50  ;;  %v1638_v58 = vsel %vm10301_vm5, %v1635_v32, %v1637_v54  ;;  %v890_v59 = vsel %vm10302_vm2, %v887_v34, %v889_v56  ;;  %v559_v6 = vrot.slane %v6310_v38, 2  ;;  %v6405_v29 = vld [vmem:[%s6241_s26 + $0x48] sm:$0xff] }
  0x20   : > { %426 = vrot.lane.b32.xlu0 %v345_v24, %s6181_s28  ;;  %v349_v63 = vsel %vm340_vm1, %v346_v37, %v348_v60  ;;  %v1101_v3 = vsel %vm10303_vm3, %v1098_v40, %v1100_v62  ;;  %v1433_v7 = vsel %vm10300_vm4, %v1430_v49, %v1432_v4  ;;  %v1639_v8 = vrot.slane %v6356_v61, 6 }
  0x21   : > { %v560_v9 = vsel %vm547_vm0, %v557_v50, %v559_v6  ;;  %v891_v10 = vrot.slane %v6310_v38, 3  ;;  %v350_v13 = vrot.slane %v6279_v20, 1  ;;  %v1102_v15 = vrot.slane %v6382_v14, 4 }
  0x22   : > { %v1640_v11 = vsel %vm10301_vm5, %v1637_v54, %v1639_v8  ;;  %v1434_v18 = vrot.slane %v6382_v14, 5  ;;  %v561_v21 = vrot.slane %v6356_v61, 2  ;;  %v1641_v23 = vrot.slane %v6382_v14, 6 }
  0x23   : > { %1303 = vrot.lane.b32.xlu1 %v6290_v25, %s6185_s8  ;;  %v351_v16 = vsel %vm340_vm1, %v348_v60, %v350_v13  ;;  %v1103_v17 = vsel %vm10303_vm3, %v1100_v62, %v1102_v15  ;;  %v563_v34 = vrot.slane %v6382_v14, 2  ;;  %v354_v42 = vrot.slane %v6356_v61, 1 }
  0x24   : > { %633 = vrot.lane.b32.xlu0 %v552_v28, %s6183_s30  ;;  %v1435_v22 = vsel %vm10300_vm4, %v1432_v4, %v1434_v18  ;;  %v562_v24 = vsel %vm547_vm0, %v559_v6, %v561_v21  ;;  %v1642_v26 = vsel %vm10301_vm5, %v1639_v8, %v1641_v23  ;;  %v352_v28 = vrot.slane %v6310_v38, 1 }
  0x25   : > { %v564_v37 = vsel %vm547_vm0, %v561_v21, %v563_v34  ;;  %v565_v49 = vrot.slane %v6405_v29, 2  ;;  %v897_v54 = vrot.slane %v6405_v29, 3  ;;  %v356_v57 = vrot.slane %v6382_v14, 1 }
  0x26   : > { %v353_v31 = vsel %vm340_vm1, %v350_v13, %v352_v28  ;;  %v355_v45 = vsel %vm340_vm1, %v352_v28, %v354_v42  ;;  %v6480_v13 = vld [vmem:[%s6241_s26 + $0x60] sm:$0xff] }
  0x27   : > { %1510 = vrot.lane.b32.xlu1 %v1429_v30, %s6186_s9  ;;  %v1104_v30 = vrot.slane %v6405_v29, 4  ;;  %v357_v60 = vsel %vm340_vm1, %v354_v42, %v356_v57  ;;  %v6514_v42 = vld [vmem:[%s6241_s26 + $0x68] sm:$0xff] }
  0x28   : > { %762 = vrot.lane.b32.xlu0 %v556_v33, %s6180_s27 }
  0x29   : > { %v1105_v32 = vsel %vm10303_vm3, %v1102_v15, %v1104_v30 }
  0x2b   : > { %1717 = vrot.lane.b32.xlu1 %v1636_v35, %s6187_s10 }
  0x2c   : > { %969 = vrot.lane.b32.xlu0 %v888_v36, %s6182_s29  ;;  %v1643_v36 = vrot.slane %v6405_v29, 6 }
  0x2e   : > { %v1644_v40 = vsel %vm10301_vm5, %v1641_v23, %v1643_v36  ;;  %v1442_v23 = vrot.slane %v6480_v13, 5 }
  0x2f   : > { %1176 = vrot.lane.b32.xlu1 %v1095_v39, %s6184_s7  ;;  %v895_v39 = vrot.slane %v6382_v14, 3 }
  0x30   : > { %428 = vrot.lane.b32.xlu0 %v347_v43, %s6181_s28  ;;  %v6428_v43 = vld [vmem:[%s6241_s26 + $0x50] sm:$0xff] }
  0x31   : > { %v1106_v44 = vrot.slane %v6428_v43, 4  ;;  %v1645_v51 = vrot.slane %v6428_v43, 6  ;;  %v899_v8 = vrot.slane %v6428_v43, 3 }
  0x33   : > { %1305 = vrot.lane.b32.xlu1 %v1099_v48, %s6185_s8  ;;  %v1107_v47 = vsel %vm10303_vm3, %v1104_v30, %v1106_v44 }
  0x34   : > { %635 = vrot.lane.b32.xlu0 %v6264_v12, %s6183_s30  ;;  %v892_v12 = vsel %vm10302_vm2, %v889_v56, %v891_v10  ;;  %v898_v56 = vsel %vm10302_vm2, %v895_v39, %v897_v54 }
  0x37   : > { %1512 = vrot.lane.b32.xlu1 %v1431_v53, %s6186_s9  ;;  %v566_v53 = vsel %vm547_vm0, %v563_v34, %v565_v49 }
  0x38   : > { %764 = vrot.lane.b32.xlu0 %v558_v55, %s6180_s27 }
  0x3b   : > { %1719 = vrot.lane.b32.xlu1 %v1638_v58, %s6187_s10  ;;  %v6451_v58 = vld [vmem:[%s6241_s26 + $0x58] sm:$0xff] }
  0x3c   : > { %971 = vrot.lane.b32.xlu0 %v890_v59, %s6182_s29  ;;  %v1108_v59 = vrot.slane %v6451_v58, 4  ;;  %v1647_v6 = vrot.slane %v6451_v58, 6  ;;  %v901_v34 = vrot.slane %v6451_v58, 3 }
  0x3e   : > { %v6460_v62 = vsel %vm10303_vm3, %v1106_v44, %v1108_v59 }
  0x3f   : > { %1178 = vrot.lane.b32.xlu1 %v6290_v25, %s6184_s7  ;;  %v893_v25 = vrot.slane %v6356_v61, 3 }
  0x40   : > { %430 = vrot.lane.b32.xlu0 %v349_v63, %s6181_s28  ;;  %v1440_v63 = vrot.slane %v6451_v58, 5 }
  0x41   : > { %v894_v27 = vsel %vm10302_vm2, %v891_v10, %v893_v25  ;;  %v896_v41 = vsel %vm10302_vm2, %v893_v25, %v895_v39 }
  0x42   : > { %v1443_v30 = vsel %vm10300_vm4, %v1440_v63, %v1442_v23 }
  0x43   : > { %1307 = vrot.lane.b32.xlu1 %v1101_v3, %s6185_s8 }
  0x44   : > { %637 = vrot.lane.b32.xlu0 %v556_v33, %s6183_s30  ;;  %v1436_v33 = vrot.slane %v6405_v29, 5 }
  0x46   : > { %v1437_v35 = vsel %vm10300_vm4, %v1434_v18, %v1436_v33 }
  0x47   : > { %1514 = vrot.lane.b32.xlu1 %v1433_v7, %s6186_s9 }
  0x48   : > { %766 = vrot.lane.b32.xlu0 %v560_v9, %s6180_s27 }
  0x4b   : > { %1721 = vrot.lane.b32.xlu1 %v1640_v11, %s6187_s10  ;;  %v900_v11 = vsel %vm10302_vm2, %v897_v54, %v899_v8 }
  0x4c   : > { %973 = vrot.lane.b32.xlu0 %v892_v12, %s6182_s29  ;;  %v358_v12 = vrot.slane %v6405_v29, 1 }
  0x4e   : > { %v359_v18 = vsel %vm340_vm1, %v356_v57, %v358_v12 }
  0x4f   : > { %1180 = vrot.lane.b32.xlu1 %v1099_v48, %s6184_s7  ;;  %v1438_v48 = vrot.slane %v6428_v43, 5 }
  0x50   : > { %432 = vrot.lane.b32.xlu0 %v351_v16, %s6181_s28  ;;  %v1110_v16 = vrot.slane %v6480_v13, 4 }
  0x51   : > { %v1439_v50 = vsel %vm10300_vm4, %v1436_v33, %v1438_v48  ;;  %v1441_v4 = vsel %vm10300_vm4, %v1438_v48, %v1440_v63  ;;  %v1112_v48 = vrot.slane %v6514_v42, 4  ;;  %v1651_v63 = vrot.slane %v6514_v42, 6 }
  0x53   : > { %1309 = vrot.lane.b32.xlu1 %v1103_v17, %s6185_s8 }
  0x54   : > { %639 = vrot.lane.b32.xlu0 %v558_v55, %s6183_s30  ;;  %v1646_v55 = vsel %vm10301_vm5, %v1643_v36, %v1645_v51 }
  0x57   : > { %1516 = vrot.lane.b32.xlu1 %v1435_v22, %s6186_s9  ;;  %v6489_v22 = vsel %vm10303_vm3, %v1108_v59, %v1110_v16  ;;  %v571_v59 = vrot.slane %v6480_v13, 2 }
  0x58   : > { %768 = vrot.lane.b32.xlu0 %v562_v24, %s6180_s27 }
  0x5b   : > { %1723 = vrot.lane.b32.xlu1 %v1642_v26, %s6187_s10  ;;  %v569_v26 = vrot.slane %v6451_v58, 2 }
  0x5c   : > { %975 = vrot.lane.b32.xlu0 %v894_v27, %s6182_s29 }
  0x5f   : > { %1182 = vrot.lane.b32.xlu1 %v1101_v3, %s6184_s7  ;;  %v567_v3 = vrot.slane %v6428_v43, 2 }
  0x60   : > { %434 = vrot.lane.b32.xlu0 %v353_v31, %s6181_s28  ;;  %v1649_v31 = vrot.slane %v6480_v13, 6 }
  0x61   : > { %v6470_v7 = vsel %vm547_vm0, %v565_v49, %v567_v3  ;;  %v6503_v33 = vsel %vm547_vm0, %v567_v3, %v569_v26 }
  0x63   : > { %1311 = vrot.lane.b32.xlu1 %v1105_v32, %s6185_s8 }
  0x64   : > { %641 = vrot.lane.b32.xlu0 %v560_v9, %s6183_s30  ;;  %v1648_v9 = vsel %vm10301_vm5, %v1645_v51, %v1647_v6 }
  0x67   : > { %1518 = vrot.lane.b32.xlu1 %v1437_v35, %s6186_s9 }
  0x68   : > { %770 = vrot.lane.b32.xlu0 %v564_v37, %s6180_s27 }
  0x6b   : > { %1725 = vrot.lane.b32.xlu1 %v1644_v40, %s6187_s10  ;;  %v902_v40 = vsel %vm10302_vm2, %v899_v8, %v901_v34 }
  0x6c   : > { %977 = vrot.lane.b32.xlu0 %v896_v41, %s6182_s29  ;;  %v360_v41 = vrot.slane %v6428_v43, 1 }
  0x6e   : > { %v361_v51 = vsel %vm340_vm1, %v358_v12, %v360_v41 }
  0x6f   : > { %1184 = vrot.lane.b32.xlu1 %v1103_v17, %s6184_s7 }
  0x70   : > { %436 = vrot.lane.b32.xlu0 %v355_v45, %s6181_s28 }
  0x73   : > { %1313 = vrot.lane.b32.xlu1 %v1107_v47, %s6185_s8 }
  0x74   : > { %643 = vrot.lane.b32.xlu0 %v562_v24, %s6183_s30 }
  0x77   : > { %1520 = vrot.lane.b32.xlu1 %v1439_v50, %s6186_s9 }
  0x78   : > { %772 = vrot.lane.b32.xlu0 %v566_v53, %s6180_s27 }
  0x7b   : > { %1727 = vrot.lane.b32.xlu1 %v1646_v55, %s6187_s10  ;;  %v6529_v55 = vsel %vm10303_vm3, %v1110_v16, %v1112_v48  ;;  %v362_v16 = vrot.slane %v6451_v58, 1 }
  0x7c   : > { %979 = vrot.lane.b32.xlu0 %v898_v56, %s6182_s29  ;;  %v1444_v56 = vrot.slane %v6514_v42, 5 }
  0x7f   : > { %1186 = vrot.lane.b32.xlu1 %v1105_v32, %s6184_s7 }
  0x80   : > { %438 = vrot.lane.b32.xlu0 %v357_v60, %s6181_s28 }
  0x83   : > { %1315 = vrot.lane.b32.xlu1 %v6460_v62, %s6185_s8 }
  0x84   : > { %645 = vrot.lane.b32.xlu0 %v564_v37, %s6183_s30  ;;  %v1650_v37 = vsel %vm10301_vm5, %v1647_v6, %v1649_v31  ;;  %v903_v6 = vrot.slane %v6480_v13, 3 }
  0x87   : > { %1522 = vrot.lane.b32.xlu1 %v1441_v4, %s6186_s9  ;;  %v6542_v4 = vsel %vm547_vm0, %v569_v26, %v571_v59 }
  0x88   : > { %774 = vrot.lane.b32.xlu0 %v6470_v7, %s6180_s27 }
  0x89   : > { %v761_v10 = vpop.permute.xlu1 %760 }
  0x8a   : > { %v425_v15 = vpop.permute.xlu0 %424 }
  0x8b   : > { %1729 = vrot.lane.b32.xlu1 %v1648_v9, %s6187_s10  ;;  %v1841_v24 = vsel %vm1840_vm7, %v6250_v2, %v425_v15  ;;  %v904_v15 = vsel %vm10302_vm2, %v901_v34, %v903_v6  ;;  %v573_v34 = vrot.slane %v6514_v42, 2 }
  0x8c   : > { %981 = vrot.lane.b32.xlu0 %v900_v11, %s6182_s29 }
  0x8d   : > { %v968_v17 = vpop.permute.xlu1 %967 }
  0x8e   : > { %v632_v21 = vpop.permute.xlu0 %631 }
  0x8f   : > { %1188 = vrot.lane.b32.xlu1 %v1107_v47, %s6184_s7  ;;  %v1883_v27 = vsel %vm1882_vm8, %v1841_v24, %v632_v21 }
  0x90   : > { %440 = vrot.lane.b32.xlu0 %v359_v18, %s6181_s28  ;;  %v1925_v32 = vsel %vm1924_vm9, %v1883_v27, %v761_v10  ;;  %v363_v27 = vsel %vm340_vm1, %v360_v41, %v362_v16 }
  0x91   : > { %v1175_v25 = vpop.permute.xlu1 %1174  ;;  %v1967_v36 = vsel %vm1966_vm10, %v1925_v32, %v968_v17  ;;  %v6556_v17 = vld [vmem:[%s6241_s26 + $0x70] sm:$0xff] }
  0x92   : > { %v427_v28 = vpop.permute.xlu0 %426  ;;  %v2009_v45 = vsel %vm2008_vm11, %v1967_v36, %v1175_v25  ;;  %v1114_v24 = vrot.slane %v6556_v17, 4  ;;  %v1446_v32 = vrot.slane %v6556_v17, 5  ;;  %v1653_v36 = vrot.slane %v6556_v17, 6 }
  0x93   : > { %1317 = vrot.lane.b32.xlu1 %v6489_v22, %s6185_s8  ;;  %v1842_v9 = vsel %vm1840_vm7, %v6255_v5, %v427_v28 }
  0x94   : > { %647 = vrot.lane.b32.xlu0 %v566_v53, %s6183_s30 }
  0x95   : > { %v1304_v2 = vpop.permute.xlu1 %1303 }
  0x96   : > { %v634_v35 = vpop.permute.xlu0 %633  ;;  %v2051_v47 = vsel %vm2050_vm12, %v2009_v45, %v1304_v2 }
  0x97   : > { %1524 = vrot.lane.b32.xlu1 %v1443_v30, %s6186_s9  ;;  %v1884_v10 = vsel %vm1882_vm8, %v1842_v9, %v634_v35 }
  0x98   : > { %776 = vrot.lane.b32.xlu0 %v6503_v33, %s6180_s27 }
  0x99   : > { %v1511_v39 = vpop.permute.xlu1 %1510 }
  0x9a   : > { %v763_v44 = vpop.permute.xlu0 %762  ;;  %v2093_v49 = vsel %vm2092_vm13, %v2051_v47, %v1511_v39  ;;  %v6585_v39 = vsel %vm547_vm0, %v571_v59, %v573_v34 }
  0x9b   : > { %1731 = vrot.lane.b32.xlu1 %v1650_v37, %s6187_s10  ;;  %v1926_v11 = vsel %vm1924_vm9, %v1884_v10, %v763_v44  ;;  %v575_v10 = vrot.slane %v6556_v17, 2 }
  0x9c   : > { %983 = vrot.lane.b32.xlu0 %v902_v40, %s6182_s29  ;;  %v905_v40 = vrot.slane %v6514_v42, 3 }
  0x9d   : > { %v1718_v50 = vpop.permute.xlu1 %1717 }
  0x9e   : > { %v2135_v53 = vsel %vm2134_vm14, %v2093_v49, %v1718_v50  ;;  %v970_v54 = vpop.permute.xlu0 %969  ;;  %v906_v49 = vsel %vm10302_vm2, %v903_v6, %v905_v40  ;;  %v364_v50 = vrot.slane %v6480_v13, 1 }
  0x9f   : > { %1190 = vrot.lane.b32.xlu1 %v6460_v62, %s6184_s7  ;;  %5439 = vmatmul.mubr.msk.f32.vlgmr.msra.gmra.mrb[0].mxu0 %vm2188_vm15, %v2135_v53  ;;  %v1445_v62 = vsel %vm10300_vm4, %v1442_v23, %v1444_v56  ;;  %v1968_v5 = vsel %vm1966_vm10, %v1926_v11, %v970_v54 }
  0xa0   : > { %442 = vrot.lane.b32.xlu0 %v361_v51, %s6181_s28  ;;  %5441 = vmatprep.mubr.msk.f32.mxu0 %vm6189_vm6, %v10294_v52  ;;  %v6599_v51 = vld [vmem:[%s6241_s26 + $0x78] sm:$0xff] }
  0xa1   : > { %v1177_v57 = vpop.permute.xlu1 %1176  ;;  %v1655_v11 = vrot.slane %v6599_v51, 6 }
  0xa2   : > { %v429_v60 = vpop.permute.xlu0 %428  ;;  %v2010_v21 = vsel %vm2008_vm11, %v1968_v5, %v1177_v57  ;;  %v1116_v57 = vrot.slane %v6599_v51, 4 }
  0xa3   : > { %1319 = vrot.lane.b32.xlu1 %v6529_v55, %s6185_s8  ;;  %v1843_v44 = vsel %vm1840_vm7, %v6244_v0, %v429_v60 }
  0xa4   : > { %649 = vrot.lane.b32.xlu0 %v6470_v7, %s6183_s30  ;;  %v1652_v7 = vsel %vm10301_vm5, %v1649_v31, %v1651_v63  ;;  %v6572_v31 = vsel %vm10303_vm3, %v1112_v48, %v1114_v24  ;;  %v6615_v6 = vsel %vm10303_vm3, %v1114_v24, %v1116_v57 }
  0xa5   : > { %v1306_v3 = vpop.permute.xlu1 %1305 }
  0xa6   : > { %v636_v8 = vpop.permute.xlu0 %635  ;;  %v2052_v23 = vsel %vm2050_vm12, %v2010_v21, %v1306_v3 }
  0xa7   : > { %1526 = vrot.lane.b32.xlu1 %v1445_v62, %s6186_s9  ;;  %v1885_v45 = vsel %vm1882_vm8, %v1843_v44, %v636_v8  ;;  %v365_v62 = vsel %vm340_vm1, %v362_v16, %v364_v50  ;;  %v1448_v8 = vrot.slane %v6599_v51, 5  ;;  %v907_v16 = vrot.slane %v6556_v17, 3 }
  0xa8   : > { %778 = vrot.lane.b32.xlu0 %v6542_v4, %s6180_s27 }
  0xa9   : > { %v1513_v12 = vpop.permute.xlu1 %1512 }
  0xaa   : > { %v765_v18 = vpop.permute.xlu0 %764  ;;  %v2094_v25 = vsel %vm2092_vm13, %v2052_v23, %v1513_v12 }
  0xab   : > { %1733 = vrot.lane.b32.xlu1 %v1652_v7, %s6187_s10  ;;  %v1927_v47 = vsel %vm1924_vm9, %v1885_v45, %v765_v18  ;;  %v577_v45 = vrot.slane %v6599_v51, 2 }
  0xac   : > { %985 = vrot.lane.b32.xlu0 %v904_v15, %s6182_s29  ;;  %v6628_v15 = vsel %vm547_vm0, %v573_v34, %v575_v10 }
  0xad   : > { %v1720_v26 = vpop.permute.xlu1 %1719 }
  0xae   : > { %v2136_v28 = vsel %vm2134_vm14, %v2094_v25, %v1720_v26  ;;  %v972_v30 = vpop.permute.xlu0 %971  ;;  %v908_v25 = vsel %vm10302_vm2, %v905_v40, %v907_v16  ;;  %v366_v26 = vrot.slane %v6514_v42, 1 }
  0xaf   : > { %1192 = vrot.lane.b32.xlu1 %v6489_v22, %s6184_s7  ;;  %5442 = vmatmul.mubr.msk.f32.gmra.mrb[2].mxu0 %vm2188_vm15, %v2136_v28  ;;  %v1447_v22 = vsel %vm10300_vm4, %v1444_v56, %v1446_v32  ;;  %v1969_v0 = vsel %vm1966_vm10, %v1927_v47, %v972_v30 }
  0xb0   : > { %444 = vrot.lane.b32.xlu0 %v363_v27, %s6181_s28  ;;  %5444 = vmatprep.mubr.msk.f32.mxu0 %vm6189_vm6, %v10294_v52  ;;  %v6642_v27 = vld [vmem:[%s6241_s26 + $0x80] sm:$0xff] }
  0xb1   : > { %v1179_v2 = vpop.permute.xlu1 %1178  ;;  %v1657_v47 = vrot.slane %v6642_v27, 6 }
  0xb2   : > { %v431_v35 = vpop.permute.xlu0 %430  ;;  %v2011_v54 = vsel %vm2008_vm11, %v1969_v0, %v1179_v2  ;;  %v1118_v2 = vrot.slane %v6642_v27, 4 }
  0xb3   : > { %1321 = vrot.lane.b32.xlu1 %v6572_v31, %s6185_s8  ;;  %v1844_v18 = vsel %vm1840_vm7, %v6247_v1, %v431_v35 }
  0xb4   : > { %651 = vrot.lane.b32.xlu0 %v6503_v33, %s6183_s30  ;;  %v1654_v33 = vsel %vm10301_vm5, %v1651_v63, %v1653_v36  ;;  %v6658_v40 = vsel %vm10303_vm3, %v1116_v57, %v1118_v2 }
  0xb5   : > { %v1308_v37 = vpop.permute.xlu1 %1307 }
  0xb6   : > { %v638_v41 = vpop.permute.xlu0 %637  ;;  %v2053_v56 = vsel %vm2050_vm12, %v2011_v54, %v1308_v37 }
  0xb7   : > { %1528 = vrot.lane.b32.xlu1 %v1447_v22, %s6186_s9  ;;  %v1886_v21 = vsel %vm1882_vm8, %v1844_v18, %v638_v41  ;;  %v367_v22 = vsel %vm340_vm1, %v364_v50, %v366_v26  ;;  %v1450_v41 = vrot.slane %v6642_v27, 5  ;;  %v909_v50 = vrot.slane %v6599_v51, 3 }
  0xb8   : > { %780 = vrot.lane.b32.xlu0 %v6585_v39, %s6180_s27 }
  0xb9   : > { %v1515_v48 = vpop.permute.xlu1 %1514 }
  0xba   : > { %v767_v53 = vpop.permute.xlu0 %766  ;;  %v2095_v59 = vsel %vm2092_vm13, %v2053_v56, %v1515_v48 }
  0xbb   : > { %1735 = vrot.lane.b32.xlu1 %v1654_v33, %s6187_s10  ;;  %v1928_v23 = vsel %vm1924_vm9, %v1886_v21, %v767_v53  ;;  %v579_v21 = vrot.slane %v6642_v27, 2 }
  0xbc   : > { %987 = vrot.lane.b32.xlu0 %v906_v49, %s6182_s29  ;;  %v6671_v49 = vsel %vm547_vm0, %v575_v10, %v577_v45 }
  0xbd   : > { %v1722_v60 = vpop.permute.xlu1 %1721 }
  0xbe   : > { %v2137_v63 = vsel %vm2134_vm14, %v2095_v59, %v1722_v60  ;;  %v974_v3 = vpop.permute.xlu0 %973  ;;  %v910_v59 = vsel %vm10302_vm2, %v907_v16, %v909_v50  ;;  %v368_v60 = vrot.slane %v6556_v17, 1 }
  0xbf   : > { %1194 = vrot.lane.b32.xlu1 %v6529_v55, %s6184_s7  ;;  %5445 = vmatmul.mubr.msk.f32.gmra.mrb[4].mxu0 %vm2188_vm15, %v2137_v63  ;;  %v1449_v55 = vsel %vm10300_vm4, %v1446_v32, %v1448_v8  ;;  %v1970_v1 = vsel %vm1966_vm10, %v1928_v23, %v974_v3 }
  0xc0   : > { %446 = vrot.lane.b32.xlu0 %v365_v62, %s6181_s28  ;;  %5447 = vmatprep.mubr.msk.f32.mxu0 %vm6189_vm6, %v10294_v52  ;;  %v6685_v62 = vld [vmem:[%s6241_s26 + $0x88] sm:$0xff] }
  0xc1   : > { %v1181_v9 = vpop.permute.xlu1 %1180  ;;  %v1659_v23 = vrot.slane %v6685_v62, 6 }
  0xc2   : > { %v433_v7 = vpop.permute.xlu0 %432  ;;  %v2012_v30 = vsel %vm2008_vm11, %v1970_v1, %v1181_v9  ;;  %v1120_v9 = vrot.slane %v6685_v62, 4 }
  0xc3   : > { %1323 = vrot.lane.b32.xlu1 %v6615_v6, %s6185_s8  ;;  %v1845_v53 = vsel %vm1840_vm7, %v6276_v19, %v433_v7 }
  0xc4   : > { %653 = vrot.lane.b32.xlu0 %v6542_v4, %s6183_s30  ;;  %v1656_v4 = vsel %vm10301_vm5, %v1653_v36, %v1655_v11  ;;  %v6701_v16 = vsel %vm10303_vm3, %v1118_v2, %v1120_v9 }
  0xc5   : > { %v1310_v12 = vpop.permute.xlu1 %1309 }
  0xc6   : > { %v640_v5 = vpop.permute.xlu0 %639  ;;  %v2054_v32 = vsel %vm2050_vm12, %v2012_v30, %v1310_v12 }
  0xc7   : > { %1530 = vrot.lane.b32.xlu1 %v1449_v55, %s6186_s9  ;;  %v1887_v54 = vsel %vm1882_vm8, %v1845_v53, %v640_v5  ;;  %v369_v55 = vsel %vm340_vm1, %v366_v26, %v368_v60  ;;  %v1452_v5 = vrot.slane %v6685_v62, 5  ;;  %v911_v26 = vrot.slane %v6642_v27, 3 }
  0xc8   : > { %782 = vrot.lane.b32.xlu0 %v6628_v15, %s6180_s27 }
  0xc9   : > { %v1517_v24 = vpop.permute.xlu1 %1516 }
  0xca   : > { %v769_v28 = vpop.permute.xlu0 %768  ;;  %v2096_v34 = vsel %vm2092_vm13, %v2054_v32, %v1517_v24 }
  0xcb   : > { %1737 = vrot.lane.b32.xlu1 %v1656_v4, %s6187_s10  ;;  %v1929_v56 = vsel %vm1924_vm9, %v1887_v54, %v769_v28  ;;  %v581_v54 = vrot.slane %v6685_v62, 2 }
  0xcc   : > { %989 = vrot.lane.b32.xlu0 %v908_v25, %s6182_s29  ;;  %v6714_v25 = vsel %vm547_vm0, %v577_v45, %v579_v21 }
  0xcd   : > { %v1724_v35 = vpop.permute.xlu1 %1723 }
  0xce   : > { %v2138_v36 = vsel %vm2134_vm14, %v2096_v34, %v1724_v35  ;;  %v976_v37 = vpop.permute.xlu0 %975  ;;  %v912_v34 = vsel %vm10302_vm2, %v909_v50, %v911_v26  ;;  %v370_v35 = vrot.slane %v6599_v51, 1 }
  0xcf   : > { %1196 = vrot.lane.b32.xlu1 %v6572_v31, %s6184_s7  ;;  %5448 = vmatmul.mubr.msk.f32.gmra.mrb[6].mxu0 %vm2188_vm15, %v2138_v36  ;;  %v1451_v31 = vsel %vm10300_vm4, %v1448_v8, %v1450_v41  ;;  %v1971_v19 = vsel %vm1966_vm10, %v1929_v56, %v976_v37 }
  0xd0   : > { %448 = vrot.lane.b32.xlu0 %v367_v22, %s6181_s28  ;;  %5450 = vmatprep.mubr.msk.f32.mxu0 %vm6189_vm6, %v10294_v52  ;;  %v6728_v22 = vld [vmem:[%s6241_s26 + $0x90] sm:$0xff] }
  0xd1   : > { %v1183_v44 = vpop.permute.xlu1 %1182  ;;  %v1661_v56 = vrot.slane %v6728_v22, 6 }
  0xd2   : > { %v435_v33 = vpop.permute.xlu0 %434  ;;  %v2013_v3 = vsel %vm2008_vm11, %v1971_v19, %v1183_v44  ;;  %v1122_v44 = vrot.slane %v6728_v22, 4 }
  0xd3   : > { %1325 = vrot.lane.b32.xlu1 %v6658_v40, %s6185_s8  ;;  %v1846_v28 = vsel %vm1840_vm7, %v6279_v20, %v435_v33 }
  0xd4   : > { %655 = vrot.lane.b32.xlu0 %v6585_v39, %s6183_s30  ;;  %v1658_v39 = vsel %vm10301_vm5, %v1655_v11, %v1657_v47  ;;  %v6744_v50 = vsel %vm10303_vm3, %v1120_v9, %v1122_v44 }
  0xd5   : > { %v1312_v48 = vpop.permute.xlu1 %1311 }
  0xd6   : > { %v642_v0 = vpop.permute.xlu0 %641  ;;  %v2055_v8 = vsel %vm2050_vm12, %v2013_v3, %v1312_v48 }
  0xd7   : > { %1532 = vrot.lane.b32.xlu1 %v1451_v31, %s6186_s9  ;;  %v1888_v30 = vsel %vm1882_vm8, %v1846_v28, %v642_v0  ;;  %v371_v31 = vsel %vm340_vm1, %v368_v60, %v370_v35  ;;  %v1454_v0 = vrot.slane %v6728_v22, 5  ;;  %v913_v60 = vrot.slane %v6685_v62, 3 }
  0xd8   : > { %784 = vrot.lane.b32.xlu0 %v6671_v49, %s6180_s27 }
  0xd9   : > { %v1519_v57 = vpop.permute.xlu1 %1518 }
  0xda   : > { %v771_v63 = vpop.permute.xlu0 %770  ;;  %v2097_v10 = vsel %vm2092_vm13, %v2055_v8, %v1519_v57 }
  0xdb   : > { %1739 = vrot.lane.b32.xlu1 %v1658_v39, %s6187_s10  ;;  %v1930_v32 = vsel %vm1924_vm9, %v1888_v30, %v771_v63  ;;  %v583_v30 = vrot.slane %v6728_v22, 2 }
  0xdc   : > { %991 = vrot.lane.b32.xlu0 %v910_v59, %s6182_s29  ;;  %v6757_v59 = vsel %vm547_vm0, %v579_v21, %v581_v54 }
  0xdd   : > { %v1726_v7 = vpop.permute.xlu1 %1725 }
  0xde   : > { %v2139_v11 = vsel %vm2134_vm14, %v2097_v10, %v1726_v7  ;;  %v978_v12 = vpop.permute.xlu0 %977  ;;  %v914_v10 = vsel %vm10302_vm2, %v911_v26, %v913_v60  ;;  %v372_v7 = vrot.slane %v6642_v27, 1 }
  0xdf   : > { %1198 = vrot.lane.b32.xlu1 %v6615_v6, %s6184_s7  ;;  %5451 = vmatmul.mubr.msk.f32.gmra.mrb[8].mxu0 %vm2188_vm15, %v2139_v11  ;;  %v1453_v6 = vsel %vm10300_vm4, %v1450_v41, %v1452_v5  ;;  %v1972_v20 = vsel %vm1966_vm10, %v1930_v32, %v978_v12 }
  0xe0   : > { %450 = vrot.lane.b32.xlu0 %v369_v55, %s6181_s28  ;;  %5453 = vmatprep.mubr.msk.f32.mxu0 %vm6189_vm6, %v10294_v52  ;;  %v6771_v55 = vld [vmem:[%s6241_s26 + $0x98] sm:$0xff] }
  0xe1   : > { %v1185_v18 = vpop.permute.xlu1 %1184  ;;  %v1663_v32 = vrot.slane %v6771_v55, 6 }
  0xe2   : > { %v437_v4 = vpop.permute.xlu0 %436  ;;  %v2014_v37 = vsel %vm2008_vm11, %v1972_v20, %v1185_v18  ;;  %v1124_v18 = vrot.slane %v6771_v55, 4 }
  0xe3   : > { %1327 = vrot.lane.b32.xlu1 %v6701_v16, %s6185_s8  ;;  %v1847_v63 = vsel %vm1840_vm7, %v6310_v38, %v437_v4 }
  0xe4   : > { %657 = vrot.lane.b32.xlu0 %v6628_v15, %s6183_s30  ;;  %v1660_v15 = vsel %vm10301_vm5, %v1657_v47, %v1659_v23  ;;  %v6787_v26 = vsel %vm10303_vm3, %v1122_v44, %v1124_v18 }
  0xe5   : > { %v1314_v24 = vpop.permute.xlu1 %1313 }
  0xe6   : > { %v644_v1 = vpop.permute.xlu0 %643  ;;  %v2056_v41 = vsel %vm2050_vm12, %v2014_v37, %v1314_v24 }
  0xe7   : > { %1534 = vrot.lane.b32.xlu1 %v1453_v6, %s6186_s9  ;;  %v1889_v3 = vsel %vm1882_vm8, %v1847_v63, %v644_v1  ;;  %v373_v6 = vsel %vm340_vm1, %v370_v35, %v372_v7  ;;  %v1456_v1 = vrot.slane %v6771_v55, 5  ;;  %v915_v35 = vrot.slane %v6728_v22, 3 }
  0xe8   : > { %786 = vrot.lane.b32.xlu0 %v6714_v25, %s6180_s27 }
  0xe9   : > { %v1521_v2 = vpop.permute.xlu1 %1520 }
  0xea   : > { %v773_v36 = vpop.permute.xlu0 %772  ;;  %v2098_v45 = vsel %vm2092_vm13, %v2056_v41, %v1521_v2 }
  0xeb   : > { %1741 = vrot.lane.b32.xlu1 %v1660_v15, %s6187_s10  ;;  %v1931_v8 = vsel %vm1924_vm9, %v1889_v3, %v773_v36  ;;  %v585_v3 = vrot.slane %v6771_v55, 2 }
  0xec   : > { %993 = vrot.lane.b32.xlu0 %v912_v34, %s6182_s29  ;;  %v6800_v34 = vsel %vm547_vm0, %v581_v54, %v583_v30 }
  0xed   : > { %v1728_v33 = vpop.permute.xlu1 %1727 }
  0xee   : > { %v2140_v47 = vsel %vm2134_vm14, %v2098_v45, %v1728_v33  ;;  %v980_v48 = vpop.permute.xlu0 %979  ;;  %v916_v45 = vsel %vm10302_vm2, %v913_v60, %v915_v35  ;;  %v374_v33 = vrot.slane %v6685_v62, 1 }
  0xef   : > { %1200 = vrot.lane.b32.xlu1 %v6658_v40, %s6184_s7  ;;  %5454 = vmatmul.mubr.msk.f32.gmra.mrb[10].mxu0 %vm2188_vm15, %v2140_v47  ;;  %v1455_v40 = vsel %vm10300_vm4, %v1452_v5, %v1454_v0  ;;  %v1973_v38 = vsel %vm1966_vm10, %v1931_v8, %v980_v48 }
  0xf0   : > { %452 = vrot.lane.b32.xlu0 %v371_v31, %s6181_s28  ;;  %5456 = vmatprep.mubr.msk.f32.mxu0 %vm6189_vm6, %v10294_v52  ;;  %v6814_v31 = vld [vmem:[%s6241_s26 + $0xa0] sm:$0xff] }
  0xf1   : > { %v1187_v53 = vpop.permute.xlu1 %1186  ;;  %v1665_v8 = vrot.slane %v6814_v31, 6 }
  0xf2   : > { %v439_v39 = vpop.permute.xlu0 %438  ;;  %v2015_v12 = vsel %vm2008_vm11, %v1973_v38, %v1187_v53  ;;  %v1126_v53 = vrot.slane %v6814_v31, 4 }
  0xf3   : > { %1329 = vrot.lane.b32.xlu1 %v6744_v50, %s6185_s8  ;;  %v1848_v36 = vsel %vm1840_vm7, %v6356_v61, %v439_v39 }
  0xf4   : > { %659 = vrot.lane.b32.xlu0 %v6671_v49, %s6183_s30  ;;  %v1662_v49 = vsel %vm10301_vm5, %v1659_v23, %v1661_v56  ;;  %v6830_v60 = vsel %vm10303_vm3, %v1124_v18, %v1126_v53 }
  0xf5   : > { %v1316_v57 = vpop.permute.xlu1 %1315 }
  0xf6   : > { %v646_v19 = vpop.permute.xlu0 %645  ;;  %v2057_v5 = vsel %vm2050_vm12, %v2015_v12, %v1316_v57 }
  0xf7   : > { %1536 = vrot.lane.b32.xlu1 %v1455_v40, %s6186_s9  ;;  %v1890_v37 = vsel %vm1882_vm8, %v1848_v36, %v646_v19  ;;  %v375_v40 = vsel %vm340_vm1, %v372_v7, %v374_v33  ;;  %v1458_v19 = vrot.slane %v6814_v31, 5  ;;  %v917_v7 = vrot.slane %v6771_v55, 3 }
  0xf8   : > { %788 = vrot.lane.b32.xlu0 %v6757_v59, %s6180_s27 }
  0xf9   : > { %v1523_v9 = vpop.permute.xlu1 %1522 }
  0xfa   : > { %v775_v11 = vpop.permute.xlu0 %774  ;;  %v2099_v21 = vsel %vm2092_vm13, %v2057_v5, %v1523_v9 }
  0xfb   : > { %1743 = vrot.lane.b32.xlu1 %v1662_v49, %s6187_s10  ;;  %v1932_v41 = vsel %vm1924_vm9, %v1890_v37, %v775_v11  ;;  %v587_v37 = vrot.slane %v6814_v31, 2 }
  0xfc   : > { %995 = vrot.lane.b32.xlu0 %v914_v10, %s6182_s29  ;;  %v6843_v10 = vsel %vm547_vm0, %v583_v30, %v585_v3 }
  0xfd   : > { %v1730_v4 = vpop.permute.xlu1 %1729 }
  0xfe   : > { %v2141_v23 = vsel %vm2134_vm14, %v2099_v21, %v1730_v4  ;;  %v982_v24 = vpop.permute.xlu0 %981  ;;  %v918_v21 = vsel %vm10302_vm2, %v915_v35, %v917_v7  ;;  %v376_v4 = vrot.slane %v6728_v22, 1 }
  0xff   : > { %1202 = vrot.lane.b32.xlu1 %v6701_v16, %s6184_s7  ;;  %5457 = vmatmul.mubr.msk.f32.gmra.mrb[12].mxu0 %vm2188_vm15, %v2141_v23  ;;  %v1457_v16 = vsel %vm10300_vm4, %v1454_v0, %v1456_v1  ;;  %v1974_v61 = vsel %vm1966_vm10, %v1932_v41, %v982_v24 }
 0x100   : > { %454 = vrot.lane.b32.xlu0 %v373_v6, %s6181_s28  ;;  %5459 = vmatprep.mubr.msk.f32.mxu0 %vm6189_vm6, %v10294_v52  ;;  %v6857_v6 = vld [vmem:[%s6241_s26 + $0xa8] sm:$0xff] }
 0x101   : > { %v1189_v28 = vpop.permute.xlu1 %1188  ;;  %v1667_v41 = vrot.slane %v6857_v6, 6 }
 0x102   : > { %v441_v15 = vpop.permute.xlu0 %440  ;;  %v2016_v48 = vsel %vm2008_vm11, %v1974_v61, %v1189_v28  ;;  %v1128_v28 = vrot.slane %v6857_v6, 4 }
 0x103   : > { %1331 = vrot.lane.b32.xlu1 %v6787_v26, %s6185_s8  ;;  %v1849_v11 = vsel %vm1840_vm7, %v6382_v14, %v441_v15 }
 0x104   : > { %661 = vrot.lane.b32.xlu0 %v6714_v25, %s6183_s30  ;;  %v1664_v25 = vsel %vm10301_vm5, %v1661_v56, %v1663_v32  ;;  %v6873_v35 = vsel %vm10303_vm3, %v1126_v53, %v1128_v28 }
 0x105   : > { %v1318_v2 = vpop.permute.xlu1 %1317 }
 0x106   : > { %v648_v20 = vpop.permute.xlu0 %647  ;;  %v2058_v0 = vsel %vm2050_vm12, %v2016_v48, %v1318_v2 }
 0x107   : > { %1538 = vrot.lane.b32.xlu1 %v1457_v16, %s6186_s9  ;;  %v1891_v12 = vsel %vm1882_vm8, %v1849_v11, %v648_v20  ;;  %v377_v16 = vsel %vm340_vm1, %v374_v33, %v376_v4  ;;  %v1460_v20 = vrot.slane %v6857_v6, 5  ;;  %v919_v33 = vrot.slane %v6814_v31, 3 }
 0x108   : > { %790 = vrot.lane.b32.xlu0 %v6800_v34, %s6180_s27 }
 0x109   : > { %v1525_v44 = vpop.permute.xlu1 %1524 }
 0x10a   : > { %v777_v47 = vpop.permute.xlu0 %776  ;;  %v2100_v54 = vsel %vm2092_vm13, %v2058_v0, %v1525_v44 }
 0x10b   : > { %1745 = vrot.lane.b32.xlu1 %v1664_v25, %s6187_s10  ;;  %v1933_v5 = vsel %vm1924_vm9, %v1891_v12, %v777_v47  ;;  %v589_v12 = vrot.slane %v6857_v6, 2 }
 0x10c   : > { %997 = vrot.lane.b32.xlu0 %v916_v45, %s6182_s29  ;;  %v6886_v45 = vsel %vm547_vm0, %v585_v3, %v587_v37 }
 0x10d   : > { %v1732_v39 = vpop.permute.xlu1 %1731 }
 0x10e   : > { %v2142_v56 = vsel %vm2134_vm14, %v2100_v54, %v1732_v39  ;;  %v984_v57 = vpop.permute.xlu0 %983  ;;  %v920_v54 = vsel %vm10302_vm2, %v917_v7, %v919_v33  ;;  %v378_v39 = vrot.slane %v6771_v55, 1 }
 0x10f   : > { %1204 = vrot.lane.b32.xlu1 %v6744_v50, %s6184_s7  ;;  %5460 = vmatmul.mubr.msk.f32.gmra.mrb[14].mxu0 %vm2188_vm15, %v2142_v56  ;;  %v1459_v50 = vsel %vm10300_vm4, %v1456_v1, %v1458_v19  ;;  %v1975_v14 = vsel %vm1966_vm10, %v1933_v5, %v984_v57 }
 0x110   : > { %456 = vrot.lane.b32.xlu0 %v375_v40, %s6181_s28  ;;  %5462 = vmatprep.mubr.msk.f32.mxu0 %vm6189_vm6, %v10294_v52  ;;  %v6900_v40 = vld [vmem:[%s6241_s26 + $0xb0] sm:$0xff] }
 0x111   : > { %v1191_v63 = vpop.permute.xlu1 %1190  ;;  %v1669_v5 = vrot.slane %v6900_v40, 6 }
 0x112   : > { %v443_v49 = vpop.permute.xlu0 %442  ;;  %v2017_v24 = vsel %vm2008_vm11, %v1975_v14, %v1191_v63  ;;  %v1130_v63 = vrot.slane %v6900_v40, 4 }
 0x113   : > { %1333 = vrot.lane.b32.xlu1 %v6830_v60, %s6185_s8  ;;  %v1850_v47 = vsel %vm1840_vm7, %v6405_v29, %v443_v49 }
 0x114   : > { %663 = vrot.lane.b32.xlu0 %v6757_v59, %s6183_s30  ;;  %v1666_v59 = vsel %vm10301_vm5, %v1663_v32, %v1665_v8  ;;  %v6916_v7 = vsel %vm10303_vm3, %v1128_v28, %v1130_v63 }
 0x115   : > { %v1320_v9 = vpop.permute.xlu1 %1319 }
 0x116   : > { %v650_v38 = vpop.permute.xlu0 %649  ;;  %v2059_v1 = vsel %vm2050_vm12, %v2017_v24, %v1320_v9 }
 0x117   : > { %1540 = vrot.lane.b32.xlu1 %v1459_v50, %s6186_s9  ;;  %v1892_v48 = vsel %vm1882_vm8, %v1850_v47, %v650_v38  ;;  %v379_v50 = vsel %vm340_vm1, %v376_v4, %v378_v39  ;;  %v1462_v38 = vrot.slane %v6900_v40, 5  ;;  %v921_v4 = vrot.slane %v6857_v6, 3 }
 0x118   : > { %792 = vrot.lane.b32.xlu0 %v6843_v10, %s6180_s27  ;;  %v591_v47 = vrot.slane %v6900_v40, 2 }
 0x119   : > { %v1527_v18 = vpop.permute.xlu1 %1526 }
 0x11a   : > { %v779_v23 = vpop.permute.xlu0 %778  ;;  %v2101_v30 = vsel %vm2092_vm13, %v2059_v1, %v1527_v18 }
 0x11b   : > { %1747 = vrot.lane.b32.xlu1 %v1666_v59, %s6187_s10  ;;  %v1934_v0 = vsel %vm1924_vm9, %v1892_v48, %v779_v23 }
 0x11c   : > { %999 = vrot.lane.b32.xlu0 %v918_v21, %s6182_s29  ;;  %v6929_v21 = vsel %vm547_vm0, %v587_v37, %v589_v12 }
 0x11d   : > { %v1734_v15 = vpop.permute.xlu1 %1733 }
 0x11e   : > { %v2143_v32 = vsel %vm2134_vm14, %v2101_v30, %v1734_v15  ;;  %v986_v2 = vpop.permute.xlu0 %985  ;;  %v922_v30 = vsel %vm10302_vm2, %v919_v33, %v921_v4  ;;  %v380_v15 = vrot.slane %v6814_v31, 1 }
 0x11f   : > { %1206 = vrot.lane.b32.xlu1 %v6787_v26, %s6184_s7  ;;  %5463 = vmatmul.mubr.msk.f32.gmra.mrb[16].mxu0 %vm2188_vm15, %v2143_v32  ;;  %v1461_v26 = vsel %vm10300_vm4, %v1458_v19, %v1460_v20  ;;  %v1976_v29 = vsel %vm1966_vm10, %v1934_v0, %v986_v2 }
 0x120   : > { %458 = vrot.lane.b32.xlu0 %v377_v16, %s6181_s28  ;;  %5465 = vmatprep.mubr.msk.f32.mxu0 %vm6189_vm6, %v10294_v52  ;;  %v6943_v16 = vld [vmem:[%s6241_s26 + $0xb8] sm:$0xff]  ;;  %v381_v31 = vsel %vm340_vm1, %v378_v39, %v380_v15 }
 0x121   : > { %v1193_v36 = vpop.permute.xlu1 %1192  ;;  %v1464_v33 = vrot.slane %v6943_v16, 5 }
 0x122   : > { %v445_v25 = vpop.permute.xlu0 %444  ;;  %v2018_v57 = vsel %vm2008_vm11, %v1976_v29, %v1193_v36  ;;  %v1132_v36 = vrot.slane %v6943_v16, 4 }
 0x123   : > { %1335 = vrot.lane.b32.xlu1 %v6873_v35, %s6185_s8  ;;  %v1851_v23 = vsel %vm1840_vm7, %v6428_v43, %v445_v25 }
 0x124   : > { %665 = vrot.lane.b32.xlu0 %v6800_v34, %s6183_s30  ;;  %v1668_v34 = vsel %vm10301_vm5, %v1665_v8, %v1667_v41 }
 0x125   : > { %v1322_v44 = vpop.permute.xlu1 %1321 }
 0x126   : > { %v652_v61 = vpop.permute.xlu0 %651  ;;  %v2060_v19 = vsel %vm2050_vm12, %v2018_v57, %v1322_v44  ;;  %v6959_v44 = vsel %vm10303_vm3, %v1130_v63, %v1132_v36 }
 0x127   : > { %1542 = vrot.lane.b32.xlu1 %v1461_v26, %s6186_s9  ;;  %v1893_v24 = vsel %vm1882_vm8, %v1851_v23, %v652_v61 }
 0x128   : > { %794 = vrot.lane.b32.xlu0 %v6886_v45, %s6180_s27 }
 0x129   : > { %v1529_v53 = vpop.permute.xlu1 %1528 }
 0x12a   : > { %v781_v56 = vpop.permute.xlu0 %780  ;;  %v2102_v3 = vsel %vm2092_vm13, %v2060_v19, %v1529_v53  ;;  %v6972_v53 = vsel %vm547_vm0, %v589_v12, %v591_v47 }
 0x12b   : > { %1749 = vrot.lane.b32.xlu1 %v1668_v34, %s6187_s10  ;;  %v1935_v1 = vsel %vm1924_vm9, %v1893_v24, %v781_v56  ;;  %v1671_v34 = vrot.slane %v6943_v16, 6 }
 0x12c   : > { %1001 = vrot.lane.b32.xlu0 %v920_v54, %s6182_s29  ;;  %v923_v54 = vrot.slane %v6900_v40, 3 }
 0x12d   : > { %v1736_v49 = vpop.permute.xlu1 %1735 }
 0x12e   : > { %v2144_v8 = vsel %vm2134_vm14, %v2102_v3, %v1736_v49  ;;  %v988_v9 = vpop.permute.xlu0 %987  ;;  %v924_v63 = vsel %vm10302_vm2, %v921_v4, %v923_v54  ;;  %v382_v3 = vrot.slane %v6857_v6, 1  ;;  %v6986_v49 = vld [vmem:[%s6241_s26 + $0xc0] sm:$0xff] }
 0x12f   : > { %1208 = vrot.lane.b32.xlu1 %v6830_v60, %s6184_s7  ;;  %5466 = vmatmul.mubr.msk.f32.gmra.mrb[18].mxu0 %vm2188_vm15, %v2144_v8  ;;  %v1463_v60 = vsel %vm10300_vm4, %v1460_v20, %v1462_v38  ;;  %v1977_v43 = vsel %vm1966_vm10, %v1935_v1, %v988_v9  ;;  %v1673_v24 = vrot.slane %v6986_v49, 6 }
 0x130   : > { %460 = vrot.lane.b32.xlu0 %v379_v50, %s6181_s28  ;;  %5468 = vmatprep.mubr.msk.f32.mxu0 %vm6189_vm6, %v10294_v52  ;;  %v383_v6 = vsel %vm340_vm1, %v380_v15, %v382_v3 }
 0x131   : > { %v1195_v11 = vpop.permute.xlu1 %1194 }
 0x132   : > { %v447_v59 = vpop.permute.xlu0 %446  ;;  %v2019_v2 = vsel %vm2008_vm11, %v1977_v43, %v1195_v11 }
 0x133   : > { %1337 = vrot.lane.b32.xlu1 %v6916_v7, %s6185_s8  ;;  %v1852_v29 = vsel %vm1840_vm7, %v6451_v58, %v447_v59 }
 0x134   : > { %667 = vrot.lane.b32.xlu0 %v6843_v10, %s6183_s30  ;;  %v1670_v10 = vsel %vm10301_vm5, %v1667_v41, %v1669_v5 }
 0x135   : > { %v1324_v18 = vpop.permute.xlu1 %1323 }
 0x136   : > { %v654_v14 = vpop.permute.xlu0 %653  ;;  %v2061_v20 = vsel %vm2050_vm12, %v2019_v2, %v1324_v18  ;;  %v1466_v18 = vrot.slane %v6986_v49, 5 }
 0x137   : > { %1544 = vrot.lane.b32.xlu1 %v1463_v60, %s6186_s9  ;;  %v1894_v56 = vsel %vm1882_vm8, %v1852_v29, %v654_v14  ;;  %v593_v14 = vrot.slane %v6943_v16, 2 }
 0x138   : > { %796 = vrot.lane.b32.xlu0 %v6929_v21, %s6180_s27 }
 0x139   : > { %v1531_v28 = vpop.permute.xlu1 %1530  ;;  %v7015_v1 = vsel %vm547_vm0, %v591_v47, %v593_v14 }
 0x13a   : > { %v783_v32 = vpop.permute.xlu0 %782  ;;  %v2103_v37 = vsel %vm2092_vm13, %v2061_v20, %v1531_v28  ;;  %v925_v28 = vrot.slane %v6943_v16, 3 }
 0x13b   : > { %1751 = vrot.lane.b32.xlu1 %v1670_v10, %s6187_s10  ;;  %v1936_v57 = vsel %vm1924_vm9, %v1894_v56, %v783_v32 }
 0x13c   : > { %1003 = vrot.lane.b32.xlu0 %v922_v30, %s6182_s29  ;;  %v926_v20 = vsel %vm10302_vm2, %v923_v54, %v925_v28  ;;  %v595_v54 = vrot.slane %v6986_v49, 2 }
 0x13d   : > { %v1738_v25 = vpop.permute.xlu1 %1737 }
 0x13e   : > { %v2145_v26 = vsel %vm2134_vm14, %v2103_v37, %v1738_v25  ;;  %v990_v41 = vpop.permute.xlu0 %989  ;;  %v7029_v37 = vld [vmem:[%s6241_s26 + $0xc8] sm:$0xff] }
 0x13f   : > { %1210 = vrot.lane.b32.xlu1 %v6873_v35, %s6184_s7  ;;  %5469 = vmatmul.mubr.msk.f32.gmra.mrb[20].mxu0 %vm2188_vm15, %v2145_v26  ;;  %v1465_v35 = vsel %vm10300_vm4, %v1462_v38, %v1464_v33  ;;  %v1978_v58 = vsel %vm1966_vm10, %v1936_v57, %v990_v41  ;;  %v1134_v38 = vrot.slane %v6986_v49, 4  ;;  %v1136_v41 = vrot.slane %v7029_v37, 4 }
 0x140   : > { %462 = vrot.lane.b32.xlu0 %v381_v31, %s6181_s28  ;;  %5471 = vmatprep.mubr.msk.f32.mxu0 %vm6189_vm6, %v10294_v52  ;;  %v1675_v29 = vrot.slane %v7029_v37, 6  ;;  %v927_v57 = vrot.slane %v6986_v49, 3 }
 0x141   : > { %v1197_v61 = vpop.permute.xlu1 %1196 }
 0x142   : > { %v449_v48 = vpop.permute.xlu0 %448  ;;  %v2020_v8 = vsel %vm2008_vm11, %v1978_v58, %v1197_v61 }
 0x143   : > { %1339 = vrot.lane.b32.xlu1 %v6959_v44, %s6185_s8  ;;  %v1853_v15 = vsel %vm1840_vm7, %v6480_v13, %v449_v48 }
 0x144   : > { %669 = vrot.lane.b32.xlu0 %v6886_v45, %s6183_s30  ;;  %v1672_v45 = vsel %vm10301_vm5, %v1669_v5, %v1671_v34  ;;  %v7002_v5 = vsel %vm10303_vm3, %v1132_v36, %v1134_v38  ;;  %v384_v36 = vrot.slane %v6900_v40, 1 }
 0x145   : > { %v1326_v0 = vpop.permute.xlu1 %1325 }
 0x146   : > { %v656_v39 = vpop.permute.xlu0 %655  ;;  %v2062_v9 = vsel %vm2050_vm12, %v2020_v8, %v1326_v0  ;;  %v385_v40 = vsel %vm340_vm1, %v382_v3, %v384_v36  ;;  %v928_v8 = vsel %vm10302_vm2, %v925_v28, %v927_v57 }
 0x147   : > { %1546 = vrot.lane.b32.xlu1 %v1465_v35, %s6186_s9  ;;  %v1895_v43 = vsel %vm1882_vm8, %v1853_v15, %v656_v39  ;;  %v7045_v35 = vsel %vm10303_vm3, %v1134_v38, %v1136_v41  ;;  %v7072_v38 = vld [vmem:[%s6241_s26 + $0xd0] sm:$0xff] }
 0x148   : > { %798 = vrot.lane.b32.xlu0 %v6972_v53, %s6180_s27 }
 0x149   : > { %v1533_v19 = vpop.permute.xlu1 %1532 }
 0x14a   : > { %v785_v50 = vpop.permute.xlu0 %784  ;;  %v2104_v11 = vsel %vm2092_vm13, %v2062_v9, %v1533_v19  ;;  %v386_v9 = vrot.slane %v6943_v16, 1 }
 0x14b   : > { %1753 = vrot.lane.b32.xlu1 %v1672_v45, %s6187_s10  ;;  %v1937_v32 = vsel %vm1924_vm9, %v1895_v43, %v785_v50  ;;  %v7058_v45 = vsel %vm547_vm0, %v593_v14, %v595_v54  ;;  %v1677_v43 = vrot.slane %v7072_v38, 6 }
 0x14c   : > { %1005 = vrot.lane.b32.xlu0 %v924_v63, %s6182_s29  ;;  %v387_v16 = vsel %vm340_vm1, %v384_v36, %v386_v9 }
 0x14d   : > { %v1740_v12 = vpop.permute.xlu1 %1739 }
 0x14e   : > { %v2146_v59 = vsel %vm2134_vm14, %v2104_v11, %v1740_v12  ;;  %v992_v60 = vpop.permute.xlu0 %991 }
 0x14f   : > { %1212 = vrot.lane.b32.xlu1 %v6916_v7, %s6184_s7  ;;  %5472 = vmatmul.mubr.msk.f32.gmra.mrb[22].mxu0 %vm2188_vm15, %v2146_v59  ;;  %v1467_v7 = vsel %vm10300_vm4, %v1464_v33, %v1466_v18  ;;  %v1979_v13 = vsel %vm1966_vm10, %v1937_v32, %v992_v60  ;;  %v1138_v59 = vrot.slane %v7072_v38, 4 }
 0x150   : > { %464 = vrot.lane.b32.xlu0 %v383_v6, %s6181_s28  ;;  %5474 = vmatprep.mubr.msk.f32.mxu0 %vm6189_vm6, %v10294_v52 }
 0x151   : > { %v1199_v4 = vpop.permute.xlu1 %1198 }
 0x152   : > { %v451_v23 = vpop.permute.xlu0 %450  ;;  %v2021_v31 = vsel %vm2008_vm11, %v1979_v13, %v1199_v4 }
 0x153   : > { %1341 = vrot.lane.b32.xlu1 %v7002_v5, %s6185_s8  ;;  %v1854_v63 = vsel %vm1840_vm7, %v6514_v42, %v451_v23  ;;  %v7088_v23 = vsel %vm10303_vm3, %v1136_v41, %v1138_v59  ;;  %v388_v41 = vrot.slane %v6986_v49, 1 }
 0x154   : > { %671 = vrot.lane.b32.xlu0 %v6929_v21, %s6183_s30  ;;  %v1674_v21 = vsel %vm10301_vm5, %v1671_v34, %v1673_v24  ;;  %v1468_v34 = vrot.slane %v7029_v37, 5 }
 0x155   : > { %v1328_v10 = vpop.permute.xlu1 %1327  ;;  %v389_v49 = vsel %vm340_vm1, %v386_v9, %v388_v41 }
 0x156   : > { %v658_v30 = vpop.permute.xlu0 %657  ;;  %v2063_v26 = vsel %vm2050_vm12, %v2021_v31, %v1328_v10  ;;  %v597_v10 = vrot.slane %v7029_v37, 2 }
 0x157   : > { %1548 = vrot.lane.b32.xlu1 %v1467_v7, %s6186_s9  ;;  %v1896_v3 = vsel %vm1882_vm8, %v1854_v63, %v658_v30  ;;  %v1470_v7 = vrot.slane %v7072_v38, 5 }
 0x158   : > { %800 = vrot.lane.b32.xlu0 %v7015_v1, %s6180_s27  ;;  %v7103_v32 = vsel %vm547_vm0, %v595_v54, %v597_v10 }
 0x159   : > { %v1535_v2 = vpop.permute.xlu1 %1534  ;;  %v1471_v15 = vsel %vm10300_vm4, %v1468_v34, %v1470_v7 }
 0x15a   : > { %v787_v25 = vpop.permute.xlu0 %786  ;;  %v2105_v33 = vsel %vm2092_vm13, %v2063_v26, %v1535_v2  ;;  %v929_v2 = vrot.slane %v7029_v37, 3 }
 0x15b   : > { %1755 = vrot.lane.b32.xlu1 %v1674_v21, %s6187_s10  ;;  %v1938_v58 = vsel %vm1924_vm9, %v1896_v3, %v787_v25 }
 0x15c   : > { %1007 = vrot.lane.b32.xlu0 %v926_v20, %s6182_s29  ;;  %v930_v26 = vsel %vm10302_vm2, %v927_v57, %v929_v2  ;;  %v599_v57 = vrot.slane %v7072_v38, 2 }
 0x15d   : > { %v1742_v61 = vpop.permute.xlu1 %1741 }
 0x15e   : > { %v2147_v47 = vsel %vm2134_vm14, %v2105_v33, %v1742_v61  ;;  %v994_v48 = vpop.permute.xlu0 %993  ;;  %v7117_v33 = vld [vmem:[%s6241_s26 + $0xd8] sm:$0xff] }
 0x15f   : > { %1214 = vrot.lane.b32.xlu1 %v6959_v44, %s6184_s7  ;;  %5475 = vmatmul.mubr.msk.f32.gmra.mrb[24].mxu0 %vm2188_vm15, %v2147_v47  ;;  %v1469_v44 = vsel %vm10300_vm4, %v1466_v18, %v1468_v34  ;;  %v1980_v42 = vsel %vm1966_vm10, %v1938_v58, %v994_v48  ;;  %v1140_v48 = vrot.slane %v7117_v33, 4 }
 0x160   : > { %466 = vrot.lane.b32.xlu0 %v385_v40, %s6181_s28  ;;  %5477 = vmatprep.mubr.msk.f32.mxu0 %vm6189_vm6, %v10294_v52 }
 0x161   : > { %v1201_v0 = vpop.permute.xlu1 %1200 }
 0x162   : > { %v453_v39 = vpop.permute.xlu0 %452  ;;  %v2022_v12 = vsel %vm2008_vm11, %v1980_v42, %v1201_v0 }
 0x163   : > { %1343 = vrot.lane.b32.xlu1 %v7045_v35, %s6185_s8  ;;  %v1855_v36 = vsel %vm1840_vm7, %v6556_v17, %v453_v39 }
 0x164   : > { %673 = vrot.lane.b32.xlu0 %v6972_v53, %s6183_s30  ;;  %v1676_v53 = vsel %vm10301_vm5, %v1673_v24, %v1675_v29 }
 0x165   : > { %v1330_v56 = vpop.permute.xlu1 %1329 }
 0x166   : > { %v660_v19 = vpop.permute.xlu0 %659  ;;  %v2064_v6 = vsel %vm2050_vm12, %v2022_v12, %v1330_v56 }
 0x167   : > { %1550 = vrot.lane.b32.xlu1 %v1469_v44, %s6186_s9  ;;  %v1897_v13 = vsel %vm1882_vm8, %v1855_v36, %v660_v19  ;;  %v7133_v44 = vsel %vm10303_vm3, %v1138_v59, %v1140_v48 }
 0x168   : > { %802 = vrot.lane.b32.xlu0 %v7058_v45, %s6180_s27 }
 0x169   : > { %v1537_v50 = vpop.permute.xlu1 %1536 }
 0x16a   : > { %v789_v11 = vpop.permute.xlu0 %788  ;;  %v2106_v60 = vsel %vm2092_vm13, %v2064_v6, %v1537_v50  ;;  %v7148_v50 = vsel %vm547_vm0, %v597_v10, %v599_v57 }
 0x16b   : > { %1757 = vrot.lane.b32.xlu1 %v1676_v53, %s6187_s10  ;;  %v1939_v25 = vsel %vm1924_vm9, %v1897_v13, %v789_v11  ;;  %v1679_v53 = vrot.slane %v7117_v33, 6 }
 0x16c   : > { %1009 = vrot.lane.b32.xlu0 %v928_v8, %s6182_s29  ;;  %v931_v8 = vrot.slane %v7072_v38, 3 }
 0x16d   : > { %v1744_v18 = vpop.permute.xlu1 %1743 }
 0x16e   : > { %v2148_v4 = vsel %vm2134_vm14, %v2106_v60, %v1744_v18  ;;  %v996_v14 = vpop.permute.xlu0 %995  ;;  %v932_v59 = vsel %vm10302_vm2, %v929_v2, %v931_v8  ;;  %v390_v60 = vrot.slane %v7029_v37, 1  ;;  %v7162_v18 = vld [vmem:[%s6241_s26 + $0xe0] sm:$0xff]  ;;  %v601_v2 = vrot.slane %v7117_v33, 2 }
 0x16f   : > { %1216 = vrot.lane.b32.xlu1 %v7002_v5, %s6184_s7  ;;  %5478 = vmatmul.mubr.msk.f32.gmra.mrb[26].mxu0 %vm2188_vm15, %v2148_v4  ;;  %v1981_v17 = vsel %vm1966_vm10, %v1939_v25, %v996_v14 }
 0x170   : > { %468 = vrot.lane.b32.xlu0 %v387_v16, %s6181_s28  ;;  %5480 = vmatprep.mubr.msk.f32.mxu0 %vm6189_vm6, %v10294_v52  ;;  %v391_v37 = vsel %vm340_vm1, %v388_v41, %v390_v60 }
 0x171   : > { %v1203_v24 = vpop.permute.xlu1 %1202 }
 0x172   : > { %v455_v28 = vpop.permute.xlu0 %454  ;;  %v7094_v30 = vpop.f32.mrb[0].mxu0  ;;  %v2023_v40 = vsel %vm2008_vm11, %v1981_v17, %v1203_v24 }
 0x173   : > { %1345 = vrot.lane.b32.xlu1 %v7088_v23, %s6185_s8  ;;  %v5440_v5 = vpop.f32.mrb[1].mxu0  ;;  %v1856_v42 = vsel %vm1840_vm7, %v6599_v51, %v455_v28 }
 0x174   : > { %675 = vrot.lane.b32.xlu0 %v7015_v1, %s6183_s30  ;;  %v1678_v1 = vsel %vm10301_vm5, %v1675_v29, %v1677_v43  ;;  %v1472_v29 = vrot.slane %v7117_v33, 5 }
 0x175   : > { %v1332_v21 = vpop.permute.xlu1 %1331 }
 0x176   : > { %v662_v20 = vpop.permute.xlu0 %661  ;;  %v2065_v47 = vsel %vm2050_vm12, %v2023_v40, %v1332_v21  ;;  %v1473_v3 = vsel %vm10300_vm4, %v1470_v7, %v1472_v29  ;;  %v1142_v7 = vrot.slane %v7162_v18, 4 }
 0x177   : > { %1552 = vrot.lane.b32.xlu1 %v1471_v15, %s6186_s9  ;;  %v1898_v11 = vsel %vm1882_vm8, %v1856_v42, %v662_v20 }
 0x178   : > { %804 = vrot.lane.b32.xlu0 %v7103_v32, %s6180_s27  ;;  %v7178_v15 = vsel %vm10303_vm3, %v1140_v48, %v1142_v7 }
 0x179   : > { %v1539_v31 = vpop.permute.xlu1 %1538 }
 0x17a   : > { %v791_v61 = vpop.permute.xlu0 %790  ;;  %v2107_v34 = vsel %vm2092_vm13, %v2065_v47, %v1539_v31  ;;  %v7193_v31 = vsel %vm547_vm0, %v599_v57, %v601_v2 }
 0x17b   : > { %1759 = vrot.lane.b32.xlu1 %v1678_v1, %s6187_s10  ;;  %v1940_v12 = vsel %vm1924_vm9, %v1898_v11, %v791_v61  ;;  %v1681_v1 = vrot.slane %v7162_v18, 6 }
 0x17c   : > { %1011 = vrot.lane.b32.xlu0 %v930_v26, %s6182_s29  ;;  %v933_v26 = vrot.slane %v7117_v33, 3 }
 0x17d   : > { %v1746_v0 = vpop.permute.xlu1 %1745 }
 0x17e   : > { %v2149_v54 = vsel %vm2134_vm14, %v2107_v34, %v1746_v0  ;;  %v998_v39 = vpop.permute.xlu0 %997  ;;  %v934_v48 = vsel %vm10302_vm2, %v931_v8, %v933_v26  ;;  %v392_v34 = vrot.slane %v7072_v38, 1  ;;  %v7207_v0 = vld [vmem:[%s6241_s26 + $0xe8] sm:$0xff]  ;;  %v603_v8 = vrot.slane %v7162_v18, 2 }
 0x17f   : > { %1218 = vrot.lane.b32.xlu1 %v7045_v35, %s6184_s7  ;;  %5481 = vmatmul.mubr.msk.f32.gmra.mrb[28].mxu0 %vm2188_vm15, %v2149_v54  ;;  %v1982_v51 = vsel %vm1966_vm10, %v1940_v12, %v998_v39 }
 0x180   : > { %470 = vrot.lane.b32.xlu0 %v389_v49, %s6181_s28  ;;  %5483 = vmatprep.mubr.msk.f32.mxu0 %vm6189_vm6, %v10294_v52  ;;  %v393_v38 = vsel %vm340_vm1, %v390_v60, %v392_v34 }
 0x181   : > { %v1205_v56 = vpop.permute.xlu1 %1204 }
 0x182   : > { %v457_v19 = vpop.permute.xlu0 %456  ;;  %v7139_v63 = vpop.f32.mrb[2].mxu0  ;;  %v2024_v4 = vsel %vm2008_vm11, %v1982_v51, %v1205_v56 }
 0x183   : > { %1347 = vrot.lane.b32.xlu1 %v7133_v44, %s6185_s8  ;;  %v5443_v35 = vpop.f32.mrb[3].mxu0  ;;  %v1857_v17 = vsel %vm1840_vm7, %v6642_v27, %v457_v19 }
 0x184   : > { %677 = vrot.lane.b32.xlu0 %v7058_v45, %s6183_s30  ;;  %v1680_v45 = vsel %vm10301_vm5, %v1677_v43, %v1679_v53  ;;  %v1474_v43 = vrot.slane %v7162_v18, 5 }
 0x185   : > { %v1334_v58 = vpop.permute.xlu1 %1333 }
 0x186   : > { %v664_v9 = vpop.permute.xlu0 %663  ;;  %v2066_v14 = vsel %vm2050_vm12, %v2024_v4, %v1334_v58  ;;  %v1475_v13 = vsel %vm10300_vm4, %v1472_v29, %v1474_v43  ;;  %v1144_v29 = vrot.slane %v7207_v0, 4 }
 0x187   : > { %1554 = vrot.lane.b32.xlu1 %v1473_v3, %s6186_s9  ;;  %v1899_v61 = vsel %vm1882_vm8, %v1857_v17, %v664_v9 }
 0x188   : > { %806 = vrot.lane.b32.xlu0 %v7148_v50, %s6180_s27  ;;  %v7223_v3 = vsel %vm10303_vm3, %v1142_v7, %v1144_v29 }
 0x189   : > { %v1541_v6 = vpop.permute.xlu1 %1540 }
 0x18a   : > { %v793_v16 = vpop.permute.xlu0 %792  ;;  %v2108_v24 = vsel %vm2092_vm13, %v2066_v14, %v1541_v6  ;;  %v7238_v6 = vsel %vm547_vm0, %v601_v2, %v603_v8 }
 0x18b   : > { %1761 = vrot.lane.b32.xlu1 %v1680_v45, %s6187_s10  ;;  %v1941_v40 = vsel %vm1924_vm9, %v1899_v61, %v793_v16  ;;  %v1683_v45 = vrot.slane %v7207_v0, 6 }
 0x18c   : > { %1013 = vrot.lane.b32.xlu0 %v932_v59, %s6182_s29  ;;  %v935_v59 = vrot.slane %v7162_v18, 3 }
 0x18d   : > { %v1748_v10 = vpop.permute.xlu1 %1747 }
 0x18e   : > { %v2150_v28 = vsel %vm2134_vm14, %v2108_v24, %v1748_v10  ;;  %v1000_v5 = vpop.permute.xlu0 %999  ;;  %v936_v7 = vsel %vm10302_vm2, %v933_v26, %v935_v59  ;;  %v394_v24 = vrot.slane %v7117_v33, 1  ;;  %v7252_v10 = vld [vmem:[%s6241_s26 + $0xf0] sm:$0xff]  ;;  %v605_v26 = vrot.slane %v7207_v0, 2 }
 0x18f   : > { %1220 = vrot.lane.b32.xlu1 %v7088_v23, %s6184_s7  ;;  %5484 = vmatmul.mubr.msk.f32.gmra.mrb[30].mxu0 %vm2188_vm15, %v2150_v28  ;;  %v1983_v27 = vsel %vm1966_vm10, %v1941_v40, %v1000_v5 }
 0x190   : > { %472 = vrot.lane.b32.xlu0 %v391_v37, %s6181_s28  ;;  %5486 = vmatprep.mubr.msk.f32.mxu0 %vm6189_vm6, %v10294_v52  ;;  %v395_v33 = vsel %vm340_vm1, %v392_v34, %v394_v24 }
 0x191   : > { %v1207_v21 = vpop.permute.xlu1 %1206 }
 0x192   : > { %v459_v20 = vpop.permute.xlu0 %458  ;;  %v7184_v36 = vpop.f32.mrb[4].mxu0  ;;  %v2025_v54 = vsel %vm2008_vm11, %v1983_v27, %v1207_v21 }
 0x193   : > { %1349 = vrot.lane.b32.xlu1 %v7178_v15, %s6185_s8  ;;  %v5446_v23 = vpop.f32.mrb[5].mxu0  ;;  %v1858_v51 = vsel %vm1840_vm7, %v6685_v62, %v459_v20 }
 0x194   : > { %679 = vrot.lane.b32.xlu0 %v7103_v32, %s6183_s30  ;;  %v1682_v32 = vsel %vm10301_vm5, %v1679_v53, %v1681_v1  ;;  %v1476_v53 = vrot.slane %v7207_v0, 5 }
 0x195   : > { %v1336_v25 = vpop.permute.xlu1 %1335 }
 0x196   : > { %v666_v41 = vpop.permute.xlu0 %665  ;;  %v2067_v39 = vsel %vm2050_vm12, %v2025_v54, %v1336_v25  ;;  %v1477_v11 = vsel %vm10300_vm4, %v1474_v43, %v1476_v53  ;;  %v1146_v43 = vrot.slane %v7252_v10, 4 }
 0x197   : > { %1556 = vrot.lane.b32.xlu1 %v1475_v13, %s6186_s9  ;;  %v1900_v16 = vsel %vm1882_vm8, %v1858_v51, %v666_v41 }
 0x198   : > { %808 = vrot.lane.b32.xlu0 %v7193_v31, %s6180_s27  ;;  %v7268_v13 = vsel %vm10303_vm3, %v1144_v29, %v1146_v43 }
 0x199   : > { %v1543_v47 = vpop.permute.xlu1 %1542 }
 0x19a   : > { %v795_v49 = vpop.permute.xlu0 %794  ;;  %v2109_v56 = vsel %vm2092_vm13, %v2067_v39, %v1543_v47  ;;  %v7283_v47 = vsel %vm547_vm0, %v603_v8, %v605_v26 }
 0x19b   : > { %1763 = vrot.lane.b32.xlu1 %v1682_v32, %s6187_s10  ;;  %v1942_v4 = vsel %vm1924_vm9, %v1900_v16, %v795_v49  ;;  %v1685_v32 = vrot.slane %v7252_v10, 6 }
 0x19c   : > { %1015 = vrot.lane.b32.xlu0 %v934_v48, %s6182_s29  ;;  %v937_v48 = vrot.slane %v7207_v0, 3 }
 0x19d   : > { %v1750_v57 = vpop.permute.xlu1 %1749 }
 0x19e   : > { %v2151_v19 = vsel %vm2134_vm14, %v2109_v56, %v1750_v57  ;;  %v1002_v35 = vpop.permute.xlu0 %1001  ;;  %v938_v29 = vsel %vm10302_vm2, %v935_v59, %v937_v48  ;;  %v396_v56 = vrot.slane %v7162_v18, 1  ;;  %v7297_v57 = vld [vmem:[%s6241_s26 + $0xf8] sm:$0xff]  ;;  %v607_v59 = vrot.slane %v7252_v10, 2 }
 0x19f   : > { %1222 = vrot.lane.b32.xlu1 %v7133_v44, %s6184_s7  ;;  %5487 = vmatmul.mubr.msk.f32.gmra.mrb[32].mxu0 %vm2188_vm15, %v2151_v19  ;;  %v1984_v62 = vsel %vm1966_vm10, %v1942_v4, %v1002_v35 }
 0x1a0   : > { %474 = vrot.lane.b32.xlu0 %v393_v38, %s6181_s28  ;;  %5489 = vmatprep.mubr.msk.f32.mxu0 %vm6189_vm6, %v10294_v52  ;;  %v397_v18 = vsel %vm340_vm1, %v394_v24, %v396_v56 }
 0x1a1   : > { %v1209_v58 = vpop.permute.xlu1 %1208 }
 0x1a2   : > { %v461_v9 = vpop.permute.xlu0 %460  ;;  %v7229_v42 = vpop.f32.mrb[6].mxu0  ;;  %v2026_v28 = vsel %vm2008_vm11, %v1984_v62, %v1209_v58 }
 0x1a3   : > { %1351 = vrot.lane.b32.xlu1 %v7223_v3, %s6185_s8  ;;  %v5449_v44 = vpop.f32.mrb[7].mxu0  ;;  %v1859_v27 = vsel %vm1840_vm7, %v6728_v22, %v461_v9 }
 0x1a4   : > { %681 = vrot.lane.b32.xlu0 %v7148_v50, %s6183_s30  ;;  %v1684_v50 = vsel %vm10301_vm5, %v1681_v1, %v1683_v45  ;;  %v1478_v1 = vrot.slane %v7252_v10, 5 }
 0x1a5   : > { %v1338_v12 = vpop.permute.xlu1 %1337 }
 0x1a6   : > { %v668_v60 = vpop.permute.xlu0 %667  ;;  %v2068_v5 = vsel %vm2050_vm12, %v2026_v28, %v1338_v12  ;;  %v1479_v61 = vsel %vm10300_vm4, %v1476_v53, %v1478_v1  ;;  %v1148_v53 = vrot.slane %v7297_v57, 4 }
 0x1a7   : > { %1558 = vrot.lane.b32.xlu1 %v1477_v11, %s6186_s9  ;;  %v1901_v49 = vsel %vm1882_vm8, %v1859_v27, %v668_v60 }
 0x1a8   : > { %810 = vrot.lane.b32.xlu0 %v7238_v6, %s6180_s27  ;;  %v7313_v11 = vsel %vm10303_vm3, %v1146_v43, %v1148_v53 }
 0x1a9   : > { %v1545_v14 = vpop.permute.xlu1 %1544 }
 0x1aa   : > { %v797_v37 = vpop.permute.xlu0 %796  ;;  %v2110_v21 = vsel %vm2092_vm13, %v2068_v5, %v1545_v14  ;;  %v7328_v14 = vsel %vm547_vm0, %v605_v26, %v607_v59 }
 0x1ab   : > { %1765 = vrot.lane.b32.xlu1 %v1684_v50, %s6187_s10  ;;  %v1943_v54 = vsel %vm1924_vm9, %v1901_v49, %v797_v37  ;;  %v1687_v50 = vrot.slane %v7297_v57, 6 }
 0x1ac   : > { %1017 = vrot.lane.b32.xlu0 %v936_v7, %s6182_s29  ;;  %v939_v7 = vrot.slane %v7252_v10, 3 }
 0x1ad   : > { %v1752_v2 = vpop.permute.xlu1 %1751 }
 0x1ae   : > { %v2152_v20 = vsel %vm2134_vm14, %v2110_v21, %v1752_v2  ;;  %v1004_v23 = vpop.permute.xlu0 %1003  ;;  %v940_v43 = vsel %vm10302_vm2, %v937_v48, %v939_v7  ;;  %v398_v21 = vrot.slane %v7207_v0, 1  ;;  %v7342_v2 = vld [vmem:[%s6241_s26 + $0x100] sm:$0xff]  ;;  %v609_v48 = vrot.slane %v7297_v57, 2 }
 0x1af   : > { %1224 = vrot.lane.b32.xlu1 %v7178_v15, %s6184_s7  ;;  %5490 = vmatmul.mubr.msk.f32.gmra.mrb[34].mxu0 %vm2188_vm15, %v2152_v20  ;;  %v1985_v22 = vsel %vm1966_vm10, %v1943_v54, %v1004_v23 }
 0x1b0   : > { %476 = vrot.lane.b32.xlu0 %v395_v33, %s6181_s28  ;;  %5492 = vmatprep.mubr.msk.f32.mxu0 %vm6189_vm6, %v10294_v52  ;;  %v399_v0 = vsel %vm340_vm1, %v396_v56, %v398_v21 }
 0x1b1   : > { %v1211_v25 = vpop.permute.xlu1 %1210 }
 0x1b2   : > { %v463_v41 = vpop.permute.xlu0 %462  ;;  %v7274_v17 = vpop.f32.mrb[8].mxu0  ;;  %v2027_v19 = vsel %vm2008_vm11, %v1985_v22, %v1211_v25  ;;  %v6149_v22 = vld [vmem:[%s6241_s26 + $0xa0] sm:$0xff] }
 0x1b3   : > { %1353 = vrot.lane.b32.xlu1 %v7268_v13, %s6185_s8  ;;  %v5452_v15 = vpop.f32.mrb[9].mxu0  ;;  %v1860_v62 = vsel %vm1840_vm7, %v6771_v55, %v463_v41 }
 0x1b4   : > { %683 = vrot.lane.b32.xlu0 %v7193_v31, %s6183_s30  ;;  %v1686_v31 = vsel %vm10301_vm5, %v1683_v45, %v1685_v32  ;;  %v1480_v45 = vrot.slane %v7297_v57, 5 }
 0x1b5   : > { %v1340_v40 = vpop.permute.xlu1 %1339 }
 0x1b6   : > { %v670_v34 = vpop.permute.xlu0 %669  ;;  %v2069_v35 = vsel %vm2050_vm12, %v2027_v19, %v1340_v40  ;;  %v1481_v16 = vsel %vm10300_vm4, %v1478_v1, %v1480_v45  ;;  %v1150_v1 = vrot.slane %v7342_v2, 4 }
 0x1b7   : > { %1560 = vrot.lane.b32.xlu1 %v1479_v61, %s6186_s9  ;;  %v1902_v37 = vsel %vm1882_vm8, %v1860_v62, %v670_v34  ;;  %v611_v62 = vrot.slane %v7342_v2, 2 }
 0x1b8   : > { %812 = vrot.lane.b32.xlu0 %v7283_v47, %s6180_s27  ;;  %v7358_v61 = vsel %vm10303_vm3, %v1148_v53, %v1150_v1 }
 0x1b9   : > { %v1547_v39 = vpop.permute.xlu1 %1546 }
 0x1ba   : > { %v799_v38 = vpop.permute.xlu0 %798  ;;  %v2111_v58 = vsel %vm2092_vm13, %v2069_v35, %v1547_v39  ;;  %v7373_v39 = vsel %vm547_vm0, %v607_v59, %v609_v48 }
 0x1bb   : > { %1767 = vrot.lane.b32.xlu1 %v1686_v31, %s6187_s10  ;;  %v1944_v28 = vsel %vm1924_vm9, %v1902_v37, %v799_v38  ;;  %v1689_v31 = vrot.slane %v7342_v2, 6 }
 0x1bc   : > { %1019 = vrot.lane.b32.xlu0 %v938_v29, %s6182_s29  ;;  %v941_v29 = vrot.slane %v7297_v57, 3 }
 0x1bd   : > { %v1754_v8 = vpop.permute.xlu1 %1753 }
 0x1be   : > { %v2153_v9 = vsel %vm2134_vm14, %v2111_v58, %v1754_v8  ;;  %v1006_v44 = vpop.permute.xlu0 %1005  ;;  %v942_v58 = vsel %vm10302_vm2, %v939_v7, %v941_v29  ;;  %v400_v8 = vrot.slane %v7252_v10, 1 }
 0x1bf   : > { %1226 = vrot.lane.b32.xlu1 %v7223_v3, %s6184_s7  ;;  %5493 = vmatmul.mubr.msk.f32.gmra.mrb[36].mxu0 %vm2188_vm15, %v2153_v9  ;;  %v1986_v55 = vsel %vm1966_vm10, %v1944_v28, %v1006_v44 }
 0x1c0   : > { %478 = vrot.lane.b32.xlu0 %v397_v18, %s6181_s28  ;;  %5495 = vmatprep.mubr.msk.f32.mxu0 %vm6189_vm6, %v10294_v52  ;;  %v7387_v18 = vld [vmem:[%s6241_s26 + $0x108] sm:$0xff]  ;;  %v401_v10 = vsel %vm340_vm1, %v398_v21, %v400_v8  ;;  %v7418_v21 = vsel %vm547_vm0, %v609_v48, %v611_v62 }
 0x1c1   : > { %v1213_v12 = vpop.permute.xlu1 %1212  ;;  %v1152_v59 = vrot.slane %v7387_v18, 4  ;;  %v1484_v7 = vrot.slane %v7387_v18, 5 }
 0x1c2   : > { %v465_v60 = vpop.permute.xlu0 %464  ;;  %v7319_v51 = vpop.f32.mrb[10].mxu0  ;;  %v2028_v20 = vsel %vm2008_vm11, %v1986_v55, %v1213_v12  ;;  %v943_v55 = vrot.slane %v7342_v2, 3 }
 0x1c3   : > { %1355 = vrot.lane.b32.xlu1 %v7313_v11, %s6185_s8  ;;  %v5455_v3 = vpop.f32.mrb[11].mxu0  ;;  %v1861_v38 = vsel %vm1840_vm7, %v6149_v22, %v465_v60 }
 0x1c4   : > { %685 = vrot.lane.b32.xlu0 %v7238_v6, %s6183_s30  ;;  %v1688_v6 = vsel %vm10301_vm5, %v1685_v32, %v1687_v50  ;;  %v1482_v32 = vrot.slane %v7342_v2, 5 }
 0x1c5   : > { %v1342_v4 = vpop.permute.xlu1 %1341 }
 0x1c6   : > { %v672_v24 = vpop.permute.xlu0 %671  ;;  %v2070_v23 = vsel %vm2050_vm12, %v2028_v20, %v1342_v4  ;;  %v1483_v49 = vsel %vm10300_vm4, %v1480_v45, %v1482_v32  ;;  %v7403_v4 = vsel %vm10303_vm3, %v1150_v1, %v1152_v59  ;;  %v1485_v28 = vsel %vm10300_vm4, %v1482_v32, %v1484_v7  ;;  %v6150_v20 = vld [vmem:[%s6241_s26 + $0xa8] sm:$0xff] }
 0x1c7   : > { %1562 = vrot.lane.b32.xlu1 %v1481_v16, %s6186_s9  ;;  %v1903_v19 = vsel %vm1882_vm8, %v1861_v38, %v672_v24 }
 0x1c8   : > { %814 = vrot.lane.b32.xlu0 %v7328_v14, %s6180_s27 }
 0x1c9   : > { %v1549_v5 = vpop.permute.xlu1 %1548 }
 0x1ca   : > { %v801_v33 = vpop.permute.xlu0 %800  ;;  %v2112_v25 = vsel %vm2092_vm13, %v2070_v23, %v1549_v5  ;;  %v1691_v5 = vrot.slane %v7387_v18, 6 }
 0x1cb   : > { %1769 = vrot.lane.b32.xlu1 %v1688_v6, %s6187_s10  ;;  %v1945_v35 = vsel %vm1924_vm9, %v1903_v19, %v801_v33  ;;  %v613_v19 = vrot.slane %v7387_v18, 2 }
 0x1cc   : > { %1021 = vrot.lane.b32.xlu0 %v940_v43, %s6182_s29 }
 0x1cd   : > { %v1756_v26 = vpop.permute.xlu1 %1755 }
 0x1ce   : > { %v2154_v41 = vsel %vm2134_vm14, %v2112_v25, %v1756_v26  ;;  %v1008_v15 = vpop.permute.xlu0 %1007 }
 0x1cf   : > { %1228 = vrot.lane.b32.xlu1 %v7268_v13, %s6184_s7  ;;  %5496 = vmatmul.mubr.msk.f32.gmra.mrb[38].mxu0 %vm2188_vm15, %v2154_v41  ;;  %v1987_v9 = vsel %vm1966_vm10, %v1945_v35, %v1008_v15  ;;  %v402_v41 = vrot.slane %v7297_v57, 1  ;;  %v7432_v15 = vld [vmem:[%s6241_s26 + $0x110] sm:$0xff] }
 0x1d0   : > { %480 = vrot.lane.b32.xlu0 %v399_v0, %s6181_s28  ;;  %5498 = vmatprep.mubr.msk.f32.mxu0 %vm6189_vm6, %v10294_v52  ;;  %v944_v0 = vsel %vm10302_vm2, %v941_v29, %v943_v55  ;;  %v1486_v22 = vrot.slane %v7432_v15, 5 }
 0x1d1   : > { %v1215_v40 = vpop.permute.xlu1 %1214  ;;  %v403_v57 = vsel %vm340_vm1, %v400_v8, %v402_v41 }
 0x1d2   : > { %v467_v34 = vpop.permute.xlu0 %466  ;;  %v7364_v27 = vpop.f32.mrb[12].mxu0  ;;  %v2029_v45 = vsel %vm2008_vm11, %v1987_v9, %v1215_v40  ;;  %v7463_v9 = vsel %vm547_vm0, %v611_v62, %v613_v19 }
 0x1d3   : > { %1357 = vrot.lane.b32.xlu1 %v7358_v61, %s6185_s8  ;;  %v5458_v13 = vpop.f32.mrb[13].mxu0  ;;  %v1862_v23 = vsel %vm1840_vm7, %v6150_v20, %v467_v34 }
 0x1d4   : > { %687 = vrot.lane.b32.xlu0 %v7283_v47, %s6183_s30  ;;  %v1690_v47 = vsel %vm10301_vm5, %v1687_v50, %v1689_v31  ;;  %v1154_v13 = vrot.slane %v7432_v15, 4 }
 0x1d5   : > { %v1344_v54 = vpop.permute.xlu1 %1343 }
 0x1d6   : > { %v674_v56 = vpop.permute.xlu0 %673  ;;  %v2071_v12 = vsel %vm2050_vm12, %v2029_v45, %v1344_v54 }
 0x1d7   : > { %1564 = vrot.lane.b32.xlu1 %v1483_v49, %s6186_s9  ;;  %v1904_v1 = vsel %vm1882_vm8, %v1862_v23, %v674_v56  ;;  %v7448_v56 = vsel %vm10303_vm3, %v1152_v59, %v1154_v13 }
 0x1d8   : > { %816 = vrot.lane.b32.xlu0 %v7373_v39, %s6180_s27 }
 0x1d9   : > { %v1551_v53 = vpop.permute.xlu1 %1550 }
 0x1da   : > { %v803_v44 = vpop.permute.xlu0 %802  ;;  %v2113_v60 = vsel %vm2092_vm13, %v2071_v12, %v1551_v53  ;;  %v1487_v53 = vsel %vm10300_vm4, %v1484_v7, %v1486_v22  ;;  %v6151_v12 = vld [vmem:[%s6241_s26 + $0xb0] sm:$0xff]  ;;  %v7477_v7 = vld [vmem:[%s6241_s26 + $0x118] sm:$0xff] }
 0x1db   : > { %1771 = vrot.lane.b32.xlu1 %v1690_v47, %s6187_s10  ;;  %v1946_v25 = vsel %vm1924_vm9, %v1904_v1, %v803_v44  ;;  %v945_v44 = vrot.slane %v7387_v18, 3  ;;  %v1488_v23 = vrot.slane %v7477_v7, 5 }
 0x1dc   : > { %1023 = vrot.lane.b32.xlu0 %v942_v58, %s6182_s29  ;;  %v1693_v58 = vrot.slane %v7432_v15, 6 }
 0x1dd   : > { %v1758_v3 = vpop.permute.xlu1 %1757 }
 0x1de   : > { %v2155_v16 = vsel %vm2134_vm14, %v2113_v60, %v1758_v3  ;;  %v1010_v50 = vpop.permute.xlu0 %1009 }
 0x1df   : > { %1230 = vrot.lane.b32.xlu1 %v7313_v11, %s6184_s7  ;;  %5499 = vmatmul.mubr.msk.f32.gmra.mrb[40].mxu0 %vm2188_vm15, %v2155_v16  ;;  %v1988_v32 = vsel %vm1966_vm10, %v1946_v25, %v1010_v50  ;;  %v946_v16 = vsel %vm10302_vm2, %v943_v55, %v945_v44  ;;  %v404_v50 = vrot.slane %v7342_v2, 1 }
 0x1e0   : > { %482 = vrot.lane.b32.xlu0 %v401_v10, %s6181_s28  ;;  %5501 = vmatprep.mubr.msk.f32.mxu0 %vm6189_vm6, %v10294_v52 }
 0x1e1   : > { %v1217_v24 = vpop.permute.xlu1 %1216  ;;  %v405_v2 = vsel %vm340_vm1, %v402_v41, %v404_v50  ;;  %v1695_v41 = vrot.slane %v7477_v7, 6 }
 0x1e2   : > { %v469_v37 = vpop.permute.xlu0 %468  ;;  %v7409_v6 = vpop.f32.mrb[14].mxu0  ;;  %v2030_v48 = vsel %vm2008_vm11, %v1988_v32, %v1217_v24 }
 0x1e3   : > { %1359 = vrot.lane.b32.xlu1 %v7403_v4, %s6185_s8  ;;  %v5461_v11 = vpop.f32.mrb[15].mxu0  ;;  %v1863_v59 = vsel %vm1840_vm7, %v6151_v12, %v469_v37 }
 0x1e4   : > { %689 = vrot.lane.b32.xlu0 %v7328_v14, %s6183_s30  ;;  %v1692_v14 = vsel %vm10301_vm5, %v1689_v31, %v1691_v5 }
 0x1e5   : > { %v1346_v43 = vpop.permute.xlu1 %1345 }
 0x1e6   : > { %v676_v33 = vpop.permute.xlu0 %675  ;;  %v2072_v34 = vsel %vm2050_vm12, %v2030_v48, %v1346_v43  ;;  %v947_v48 = vrot.slane %v7432_v15, 3 }
 0x1e7   : > { %1566 = vrot.lane.b32.xlu1 %v1485_v28, %s6186_s9  ;;  %v1905_v60 = vsel %vm1882_vm8, %v1863_v59, %v676_v33  ;;  %v1156_v28 = vrot.slane %v7477_v7, 4 }
 0x1e8   : > { %818 = vrot.lane.b32.xlu0 %v7418_v21, %s6180_s27 }
 0x1e9   : > { %v1553_v26 = vpop.permute.xlu1 %1552  ;;  %v7493_v20 = vsel %vm10303_vm3, %v1154_v13, %v1156_v28  ;;  %v6152_v13 = vld [vmem:[%s6241_s26 + $0xb8] sm:$0xff] }
 0x1ea   : > { %v805_v40 = vpop.permute.xlu0 %804  ;;  %v2114_v49 = vsel %vm2092_vm13, %v2072_v34, %v1553_v26 }
 0x1eb   : > { %1773 = vrot.lane.b32.xlu1 %v1692_v14, %s6187_s10  ;;  %v1947_v3 = vsel %vm1924_vm9, %v1905_v60, %v805_v40  ;;  %v615_v14 = vrot.slane %v7432_v15, 2 }
 0x1ec   : > { %1025 = vrot.lane.b32.xlu0 %v944_v0, %s6182_s29  ;;  %v1489_v0 = vsel %vm10300_vm4, %v1486_v22, %v1488_v23  ;;  %v948_v22 = vsel %vm10302_vm2, %v945_v44, %v947_v48 }
 0x1ed   : > { %v1760_v31 = vpop.permute.xlu1 %1759  ;;  %v7508_v40 = vsel %vm547_vm0, %v613_v19, %v615_v14  ;;  %v7522_v19 = vld [vmem:[%s6241_s26 + $0x120] sm:$0xff] }
 0x1ee   : > { %v2156_v54 = vsel %vm2134_vm14, %v2114_v49, %v1760_v31  ;;  %v1012_v29 = vpop.permute.xlu0 %1011  ;;  %v6191_v31 = vmov 0  }
 0x1ef   : > { %1232 = vrot.lane.b32.xlu1 %v7358_v61, %s6184_s7  ;;  %5502 = vmatmul.mubr.msk.f32.gmra.mrb[42].mxu0 %vm2188_vm15, %v2156_v54  ;;  %v1989_v24 = vsel %vm1966_vm10, %v1947_v3, %v1012_v29 }
 0x1f0   : > { %484 = vrot.lane.b32.xlu0 %v403_v57, %s6181_s28  ;;  %5504 = vmatprep.mubr.msk.f32.mxu0 %vm6189_vm6, %v10294_v52  ;;  %v1696_v57 = vsel %vm10301_vm5, %v1693_v58, %v1695_v41 }
 0x1f1   : > { %v1219_v38 = vpop.permute.xlu1 %1218  ;;  %6147 = vset.pattern.permute.xlu0 %v6191_v31  ;;  %6148 = vset.pattern.permute.xlu1 %v6191_v31 }
 0x1f2   : > { %v471_v47 = vpop.permute.xlu0 %470  ;;  %v7454_v35 = vpop.f32.mrb[16].mxu0  ;;  %v2031_v37 = vsel %vm2008_vm11, %v1989_v24, %v1219_v38  ;;  %v406_v38 = vrot.slane %v7387_v18, 1 }
 0x1f3   : > { %1361 = vrot.lane.b32.xlu1 %v7448_v56, %s6185_s8  ;;  %v5464_v61 = vpop.f32.mrb[17].mxu0  ;;  %v1864_v49 = vsel %vm1840_vm7, %v6152_v13, %v471_v47 }
 0x1f4   : > { %691 = vrot.lane.b32.xlu0 %v7373_v39, %s6183_s30  ;;  %v1694_v39 = vsel %vm10301_vm5, %v1691_v5, %v1693_v58  ;;  %v1158_v58 = vrot.slane %v7522_v19, 4  ;;  %v407_v18 = vsel %vm340_vm1, %v404_v50, %v406_v38 }
 0x1f5   : > { %v1348_v8 = vpop.permute.xlu1 %1347 }
 0x1f6   : > { %v678_v45 = vpop.permute.xlu0 %677  ;;  %v2073_v11 = vsel %vm2050_vm12, %v2031_v37, %v1348_v8  ;;  %v7538_v60 = vsel %vm10303_vm3, %v1156_v28, %v1158_v58  ;;  %v949_v28 = vrot.slane %v7477_v7, 3 }
 0x1f7   : > { %1568 = vrot.lane.b32.xlu1 %v1487_v53, %s6186_s9 }
 0x1f8   : > { %820 = vrot.lane.b32.xlu0 %v7463_v9, %s6180_s27 }
 0x1f9   : > { %v1555_v10 = vpop.permute.xlu1 %1554 }
 0x1fa   : > { %v807_v62 = vpop.permute.xlu0 %806  ;;  %v2115_v5 = vsel %vm2092_vm13, %v2073_v11, %v1555_v10  ;;  %v617_v10 = vrot.slane %v7477_v7, 2 }
 0x1fb   : > { %1775 = vrot.lane.b32.xlu1 %v1694_v39, %s6187_s10  ;;  %v1490_v39 = vrot.slane %v7522_v19, 5 }
 0x1fc   : > { %1027 = vrot.lane.b32.xlu0 %v946_v16, %s6182_s29  ;;  %v7553_v11 = vsel %vm547_vm0, %v615_v14, %v617_v10  ;;  %v408_v14 = vrot.slane %v7432_v15, 1 }
 0x1fd   : > { %v1762_v43 = vpop.permute.xlu1 %1761  ;;  %v1491_v24 = vsel %vm10300_vm4, %v1488_v23, %v1490_v39 }
 0x1fe   : > { %v2157_v55 = vsel %vm2134_vm14, %v2115_v5, %v1762_v43  ;;  %v1014_v33 = vpop.permute.xlu0 %1013  ;;  %v6153_v43 = vld [vmem:[%s6241_s26 + $0xc0] sm:$0xff]  ;;  %v409_v15 = vsel %vm340_vm1, %v406_v38, %v408_v14 }
 0x1ff   : > { %1234 = vrot.lane.b32.xlu1 %v7403_v4, %s6184_s7  ;;  %5505 = vmatmul.mubr.msk.f32.gmra.mrb[44].mxu0 %vm2188_vm15, %v2157_v55 }
 0x200   : > { %486 = vrot.lane.b32.xlu0 %v405_v2, %s6181_s28  ;;  %5507 = vmatprep.mubr.msk.f32.mxu0 %vm6189_vm6, %v10294_v52 }
 0x201   : > { %v1221_v1 = vpop.permute.xlu1 %1220 }
 0x202   : > { %v473_v25 = vpop.permute.xlu0 %472  ;;  %v7499_v26 = vpop.f32.mrb[18].mxu0 }
 0x203   : > { %1363 = vrot.lane.b32.xlu1 %v7493_v20, %s6185_s8  ;;  %v5467_v4 = vpop.f32.mrb[19].mxu0  ;;  %v1865_v2 = vsel %vm1840_vm7, %v6153_v43, %v473_v25 }
 0x204   : > { %693 = vrot.lane.b32.xlu0 %v7418_v21, %s6183_s30  ;;  %v1906_v21 = vsel %vm1882_vm8, %v1864_v49, %v678_v45  ;;  %v7567_v4 = vld [vmem:[%s6241_s26 + $0x128] sm:$0xff] }
 0x205   : > { %v1350_v32 = vpop.permute.xlu1 %1349  ;;  %v1948_v54 = vsel %vm1924_vm9, %v1906_v21, %v807_v62  ;;  %v1697_v62 = vrot.slane %v7522_v19, 6 }
 0x206   : > { %v680_v34 = vpop.permute.xlu0 %679  ;;  %v1990_v47 = vsel %vm1966_vm10, %v1948_v54, %v1014_v33 }
 0x207   : > { %1570 = vrot.lane.b32.xlu1 %v1489_v0, %s6186_s9  ;;  %v2032_v53 = vsel %vm2008_vm11, %v1990_v47, %v1221_v1  ;;  %v1907_v55 = vsel %vm1882_vm8, %v1865_v2, %v680_v34  ;;  %v950_v1 = vsel %vm10302_vm2, %v947_v48, %v949_v28 }
 0x208   : > { %822 = vrot.lane.b32.xlu0 %v7508_v40, %s6180_s27  ;;  %v2074_v8 = vsel %vm2050_vm12, %v2032_v53, %v1350_v32 }
 0x209   : > { %v1557_v29 = vpop.permute.xlu1 %1556 }
 0x20a   : > { %v809_v61 = vpop.permute.xlu0 %808  ;;  %v2116_v45 = vsel %vm2092_vm13, %v2074_v8, %v1557_v29  ;;  %v619_v29 = vrot.slane %v7522_v19, 2 }
 0x20b   : > { %1777 = vrot.lane.b32.xlu1 %v1696_v57, %s6187_s10  ;;  %v1949_v33 = vsel %vm1924_vm9, %v1907_v55, %v809_v61  ;;  %v1492_v57 = vrot.slane %v7567_v4, 5  ;;  %v1699_v61 = vrot.slane %v7567_v4, 6 }
 0x20c   : > { %1029 = vrot.lane.b32.xlu0 %v948_v22, %s6182_s29  ;;  %v7598_v8 = vsel %vm547_vm0, %v617_v10, %v619_v29  ;;  %v410_v10 = vrot.slane %v7477_v7, 1 }
 0x20d   : > { %v1764_v44 = vpop.permute.xlu1 %1763  ;;  %v1493_v47 = vsel %vm10300_vm4, %v1490_v39, %v1492_v57 }
 0x20e   : > { %v2158_v12 = vsel %vm2134_vm14, %v2116_v45, %v1764_v44  ;;  %v1016_v59 = vpop.permute.xlu0 %1015  ;;  %v6154_v44 = vld [vmem:[%s6241_s26 + $0xc8] sm:$0xff]  ;;  %v411_v7 = vsel %vm340_vm1, %v408_v14, %v410_v10 }
 0x20f   : > { %1236 = vrot.lane.b32.xlu1 %v7448_v56, %s6184_s7  ;;  %5508 = vmatmul.mubr.msk.f32.gmra.mrb[46].mxu0 %vm2188_vm15, %v2158_v12  ;;  %v1991_v25 = vsel %vm1966_vm10, %v1949_v33, %v1016_v59 }
 0x210   : > { %488 = vrot.lane.b32.xlu0 %v407_v18, %s6181_s28  ;;  %5510 = vmatprep.mubr.msk.f32.mxu0 %vm6189_vm6, %v10294_v52 }
 0x211   : > { %v1223_v3 = vpop.permute.xlu1 %1222 }
 0x212   : > { %v475_v16 = vpop.permute.xlu0 %474  ;;  %v7544_v50 = vpop.f32.mrb[20].mxu0  ;;  %v2033_v32 = vsel %vm2008_vm11, %v1991_v25, %v1223_v3 }
 0x213   : > { %1365 = vrot.lane.b32.xlu1 %v7538_v60, %s6185_s8  ;;  %v5470_v56 = vpop.f32.mrb[21].mxu0  ;;  %v1866_v18 = vsel %vm1840_vm7, %v6154_v44, %v475_v16 }
 0x214   : > { %695 = vrot.lane.b32.xlu0 %v7463_v9, %s6183_s30  ;;  %v1698_v9 = vsel %vm10301_vm5, %v1695_v41, %v1697_v62  ;;  %v1160_v41 = vrot.slane %v7567_v4, 4  ;;  %v7612_v56 = vld [vmem:[%s6241_s26 + $0x130] sm:$0xff] }
 0x215   : > { %v1352_v37 = vpop.permute.xlu1 %1351  ;;  %v1494_v33 = vrot.slane %v7612_v56, 5 }
 0x216   : > { %v682_v5 = vpop.permute.xlu0 %681  ;;  %v2075_v34 = vsel %vm2050_vm12, %v2033_v32, %v1352_v37  ;;  %v7583_v21 = vsel %vm10303_vm3, %v1158_v58, %v1160_v41  ;;  %v951_v58 = vrot.slane %v7522_v19, 3  ;;  %v1701_v32 = vrot.slane %v7612_v56, 6 }
 0x217   : > { %1572 = vrot.lane.b32.xlu1 %v1491_v24, %s6186_s9  ;;  %v1908_v12 = vsel %vm1882_vm8, %v1866_v18, %v682_v5 }
 0x218   : > { %824 = vrot.lane.b32.xlu0 %v7553_v11, %s6180_s27  ;;  %v952_v3 = vsel %vm10302_vm2, %v949_v28, %v951_v58 }
 0x219   : > { %v1559_v23 = vpop.permute.xlu1 %1558 }
 0x21a   : > { %v811_v0 = vpop.permute.xlu0 %810  ;;  %v2117_v13 = vsel %vm2092_vm13, %v2075_v34, %v1559_v23 }
 0x21b   : > { %1779 = vrot.lane.b32.xlu1 %v1698_v9, %s6187_s10  ;;  %v1950_v59 = vsel %vm1924_vm9, %v1908_v12, %v811_v0  ;;  %v1495_v0 = vsel %vm10300_vm4, %v1492_v57, %v1494_v33 }
 0x21c   : > { %1031 = vrot.lane.b32.xlu0 %v950_v1, %s6182_s29  ;;  %v621_v1 = vrot.slane %v7567_v4, 2 }
 0x21d   : > { %v1766_v48 = vpop.permute.xlu1 %1765 }
 0x21e   : > { %v2159_v49 = vsel %vm2134_vm14, %v2117_v13, %v1766_v48  ;;  %v1018_v31 = vpop.permute.xlu0 %1017  ;;  %v953_v13 = vrot.slane %v7567_v4, 3 }
 0x21f   : > { %1238 = vrot.lane.b32.xlu1 %v7493_v20, %s6184_s7  ;;  %5511 = vmatmul.mubr.msk.f32.gmra.mrb[48].mxu0 %vm2188_vm15, %v2159_v49  ;;  %v1992_v16 = vsel %vm1966_vm10, %v1950_v59, %v1018_v31 }
 0x220   : > { %490 = vrot.lane.b32.xlu0 %v409_v15, %s6181_s28  ;;  %5513 = vmatprep.mubr.msk.f32.mxu0 %vm6189_vm6, %v10294_v52  ;;  %v6155_v15 = vld [vmem:[%s6241_s26 + $0xd0] sm:$0xff] }
 0x221   : > { %v1225_v54 = vpop.permute.xlu1 %1224 }
 0x222   : > { %v477_v22 = vpop.permute.xlu0 %476  ;;  %v7589_v38 = vpop.f32.mrb[22].mxu0  ;;  %v2034_v37 = vsel %vm2008_vm11, %v1992_v16, %v1225_v54 }
 0x223   : > { %1367 = vrot.lane.b32.xlu1 %v7583_v21, %s6185_s8  ;;  %v5473_v20 = vpop.f32.mrb[23].mxu0  ;;  %v1867_v49 = vsel %vm1840_vm7, %v6155_v15, %v477_v22 }
 0x224   : > { %697 = vrot.lane.b32.xlu0 %v7508_v40, %s6183_s30  ;;  %v1700_v40 = vsel %vm10301_vm5, %v1697_v62, %v1699_v61  ;;  %v1162_v62 = vrot.slane %v7612_v56, 4  ;;  %v412_v20 = vrot.slane %v7522_v19, 1 }
 0x225   : > { %v1354_v53 = vpop.permute.xlu1 %1353 }
 0x226   : > { %v684_v45 = vpop.permute.xlu0 %683  ;;  %v2076_v5 = vsel %vm2050_vm12, %v2034_v37, %v1354_v53  ;;  %v7628_v9 = vsel %vm10303_vm3, %v1160_v41, %v1162_v62  ;;  %v7643_v41 = vsel %vm547_vm0, %v619_v29, %v621_v1  ;;  %v954_v29 = vsel %vm10302_vm2, %v951_v58, %v953_v13 }
 0x227   : > { %1574 = vrot.lane.b32.xlu1 %v1493_v47, %s6186_s9  ;;  %v1909_v31 = vsel %vm1882_vm8, %v1867_v49, %v684_v45  ;;  %v7657_v47 = vld [vmem:[%s6241_s26 + $0x138] sm:$0xff]  ;;  %v413_v19 = vsel %vm340_vm1, %v410_v10, %v412_v20  ;;  %v623_v10 = vrot.slane %v7612_v56, 2 }
 0x228   : > { %826 = vrot.lane.b32.xlu0 %v7598_v8, %s6180_s27 }
 0x229   : > { %v1561_v39 = vpop.permute.xlu1 %1560 }
 0x22a   : > { %v813_v24 = vpop.permute.xlu0 %812  ;;  %v2118_v43 = vsel %vm2092_vm13, %v2076_v5, %v1561_v39  ;;  %v1496_v39 = vrot.slane %v7657_v47, 5  ;;  %v1703_v5 = vrot.slane %v7657_v47, 6 }
 0x22b   : > { %1781 = vrot.lane.b32.xlu1 %v1700_v40, %s6187_s10  ;;  %v1951_v57 = vsel %vm1924_vm9, %v1909_v31, %v813_v24 }
 0x22c   : > { %1033 = vrot.lane.b32.xlu0 %v952_v3, %s6182_s29  ;;  %v1497_v37 = vsel %vm10300_vm4, %v1494_v33, %v1496_v39 }
 0x22d   : > { %v1768_v28 = vpop.permute.xlu1 %1767 }
 0x22e   : > { %v2160_v2 = vsel %vm2134_vm14, %v2118_v43, %v1768_v28  ;;  %v1020_v55 = vpop.permute.xlu0 %1019  ;;  %v7690_v43 = vsel %vm547_vm0, %v621_v1, %v623_v10  ;;  %v955_v28 = vrot.slane %v7612_v56, 3 }
 0x22f   : > { %1240 = vrot.lane.b32.xlu1 %v7538_v60, %s6184_s7  ;;  %5514 = vmatmul.mubr.msk.f32.gmra.mrb[50].mxu0 %vm2188_vm15, %v2160_v2  ;;  %v1993_v22 = vsel %vm1966_vm10, %v1951_v57, %v1020_v55  ;;  %v6156_v2 = vld [vmem:[%s6241_s26 + $0xd8] sm:$0xff] }
 0x230   : > { %492 = vrot.lane.b32.xlu0 %v411_v7, %s6181_s28  ;;  %5516 = vmatprep.mubr.msk.f32.mxu0 %vm6189_vm6, %v10294_v52 }
 0x231   : > { %v1227_v23 = vpop.permute.xlu1 %1226 }
 0x232   : > { %v479_v14 = vpop.permute.xlu0 %478  ;;  %v7634_v25 = vpop.f32.mrb[24].mxu0  ;;  %v2035_v44 = vsel %vm2008_vm11, %v1993_v22, %v1227_v23  ;;  %v3735_v22 = vld [vmem:[%s10282_s3 + $0x108] sm:$0xff] }
 0x233   : > { %1369 = vrot.lane.b32.xlu1 %v7628_v9, %s6185_s8  ;;  %v5476_v60 = vpop.f32.mrb[25].mxu0  ;;  %v1868_v55 = vsel %vm1840_vm7, %v6156_v2, %v479_v14  ;;  %v414_v14 = vrot.slane %v7567_v4, 1  ;;  %v957_v2 = vrot.slane %v7657_v47, 3  ;;  %v3743_v4 = vld [vmem:[%s10282_s3 + $0x148] sm:$0xff] }
 0x234   : > { %699 = vrot.lane.b32.xlu0 %v7553_v11, %s6183_s30  ;;  %v1702_v11 = vsel %vm10301_vm5, %v1699_v61, %v1701_v32  ;;  %v1164_v61 = vrot.slane %v7657_v47, 4  ;;  %v956_v60 = vsel %vm10302_vm2, %v953_v13, %v955_v28 }
 0x235   : > { %v1356_v34 = vpop.permute.xlu1 %1355 }
 0x236   : > { %v686_v48 = vpop.permute.xlu0 %685  ;;  %v2077_v45 = vsel %vm2050_vm12, %v2035_v44, %v1356_v34  ;;  %v7673_v59 = vsel %vm10303_vm3, %v1162_v62, %v1164_v61 }
 0x237   : > { %1576 = vrot.lane.b32.xlu1 %v1495_v0, %s6186_s9  ;;  %v1910_v23 = vsel %vm1882_vm8, %v1868_v55, %v686_v48  ;;  %v7708_v0 = vld [vmem:[%s6241_s26 + $0x140] sm:$0xff] }
 0x238   : > { %828 = vrot.lane.b32.xlu0 %v7643_v41, %s6180_s27  ;;  %v1166_v49 = vrot.slane %v7708_v0, 4 }
 0x239   : > { %v1563_v54 = vpop.permute.xlu1 %1562 }
 0x23a   : > { %v815_v53 = vpop.permute.xlu0 %814  ;;  %v2119_v18 = vsel %vm2092_vm13, %v2077_v45, %v1563_v54  ;;  %v625_v45 = vrot.slane %v7657_v47, 2 }
 0x23b   : > { %1783 = vrot.lane.b32.xlu1 %v1702_v11, %s6187_s10  ;;  %v1952_v33 = vsel %vm1924_vm9, %v1910_v23, %v815_v53  ;;  %v415_v11 = vsel %vm340_vm1, %v412_v20, %v414_v14  ;;  %v7734_v20 = vsel %vm10303_vm3, %v1164_v61, %v1166_v49  ;;  %v1498_v53 = vrot.slane %v7708_v0, 5  ;;  %v3739_v23 = vld [vmem:[%s10282_s3 + $0x128] sm:$0xff] }
 0x23c   : > { %1035 = vrot.lane.b32.xlu0 %v954_v29, %s6182_s29  ;;  %v3734_v29 = vld [vmem:[%s10282_s3 + $0x100] sm:$0xff] }
 0x23d   : > { %v1770_v58 = vpop.permute.xlu1 %1769 }
 0x23e   : > { %v2161_v12 = vsel %vm2134_vm14, %v2119_v18, %v1770_v58  ;;  %v1022_v40 = vpop.permute.xlu0 %1021 }
 0x23f   : > { %1242 = vrot.lane.b32.xlu1 %v7583_v21, %s6184_s7  ;;  %5517 = vmatmul.mubr.msk.f32.gmra.mrb[52].mxu0 %vm2188_vm15, %v2161_v12  ;;  %v1994_v34 = vsel %vm1966_vm10, %v1952_v33, %v1022_v40  ;;  %v3737_v12 = vld [vmem:[%s10282_s3 + $0x118] sm:$0xff]  ;;  %v1499_v40 = vsel %vm10300_vm4, %v1496_v39, %v1498_v53 }
 0x240   : > { %494 = vrot.lane.b32.xlu0 %v413_v19, %s6181_s28  ;;  %5519 = vmatprep.mubr.msk.f32.mxu0 %vm6189_vm6, %v10294_v52  ;;  %v3736_v19 = vld [vmem:[%s10282_s3 + $0x110] sm:$0xff] }
 0x241   : > { %v1229_v3 = vpop.permute.xlu1 %1228 }
 0x242   : > { %v7679_v16 = vpop.permute.xlu0 %480  ;;  %v7681_v24 = vpop.f32.mrb[26].mxu0  ;;  %v2036_v15 = vsel %vm2008_vm11, %v1994_v34, %v1229_v3  ;;  %v1705_v3 = vrot.slane %v7708_v0, 6  ;;  %v416_v34 = vrot.slane %v7612_v56, 1  ;;  %v3751_v56 = vld [vmem:[%s10282_s3 + $0x188] sm:$0xff] }
 0x243   : > { %1371 = vrot.lane.b32.xlu1 %v7673_v59, %s6185_s8  ;;  %v5479_v21 = vpop.f32.mrb[27].mxu0 }
 0x244   : > { %701 = vrot.lane.b32.xlu0 %v7598_v8, %s6183_s30  ;;  %v1704_v8 = vsel %vm10301_vm5, %v1701_v32, %v1703_v5  ;;  %v7762_v21 = vpack.c.bf16 %v3737_v12, %v3736_v19  ;;  %v3742_v19 = vld [vmem:[%s10282_s3 + $0x140] sm:$0xff] }
 0x245   : > { %v1358_v62 = vpop.permute.xlu1 %1357  ;;  %v7848_v12 = vpack.c.bf16 %v3743_v4, %v3742_v19 }
 0x246   : > { %v688_v7 = vpop.permute.xlu0 %687  ;;  %v2078_v32 = vsel %vm2050_vm12, %v2036_v15, %v1358_v62  ;;  %v7767_v62 = vsel %vm547_vm0, %v623_v10, %v625_v45  ;;  %v3738_v10 = vld [vmem:[%s10282_s3 + $0x120] sm:$0xff]  ;;  %v7802_v15 = vld [vmem:[%s6241_s26 + $0x148] sm:$0xff] }
 0x247   : > { %1578 = vrot.lane.b32.xlu1 %v1497_v37, %s6186_s9  ;;  %v7792_v33 = vpack.c.bf16 %v3739_v23, %v3738_v10  ;;  %v3744_v10 = vld [vmem:[%s10282_s3 + $0x150] sm:$0xff]  ;;  %v3745_v23 = vld [vmem:[%s10282_s3 + $0x158] sm:$0xff] }
 0x248   : > { %830 = vrot.lane.b32.xlu0 %v7690_v43, %s6180_s27 }
 0x249   : > { %v1565_v1 = vpop.permute.xlu1 %1564 }
 0x24a   : > { %v817_v48 = vpop.permute.xlu0 %816  ;;  %v2120_v31 = vsel %vm2092_vm13, %v2078_v32, %v1565_v1 }
 0x24b   : > { %1785 = vrot.lane.b32.xlu1 %v1704_v8, %s6187_s10 }
 0x24c   : > { %1037 = vrot.lane.b32.xlu0 %v956_v60, %s6182_s29 }
 0x24d   : > { %v1772_v13 = vpop.permute.xlu1 %1771 }
 0x24e   : > { %v2162_v57 = vsel %vm2134_vm14, %v2120_v31, %v1772_v13  ;;  %v1024_v54 = vpop.permute.xlu0 %1023 }
 0x24f   : > { %1244 = vrot.lane.b32.xlu1 %v7628_v9, %s6184_s7  ;;  %5520 = vmatmul.mubr.msk.f32.gmra.mrb[54].mxu0 %vm2188_vm15, %v2162_v57  ;;  %v7739_v9 = vpack.c.bf16 %v3735_v22, %v3734_v29  ;;  %v417_v22 = vsel %vm340_vm1, %v414_v14, %v416_v34 }
 0x250   : > { %496 = vrot.lane.b32.xlu0 %v415_v11, %s6181_s28  ;;  %5522 = vmatprep.mubr.msk.f32.mxu0 %vm6189_vm6, %v10294_v52  ;;  %v1168_v11 = vrot.slane %v7802_v15, 4 }
 0x251   : > { %v1231_v44 = vpop.permute.xlu1 %1230  ;;  %5893 = vmatpush1.bf16.msra.mxu1 %v7739_v9 }
 0x252   : > { %v7742_v18 = vpop.permute.xlu0 %482  ;;  %v7744_v58 = vpop.f32.mrb[28].mxu0  ;;  %5878 = vmatprep.subr.bf16.mxu1 %v10292_v46  ;;  %v7843_v14 = vsel %vm10303_vm3, %v1166_v49, %v1168_v11 }
 0x253   : > { %1373 = vrot.lane.b32.xlu1 %v7734_v20, %s6185_s8  ;;  %v5482_v61 = vpop.f32.mrb[29].mxu0 }
 0x254   : > { %703 = vrot.lane.b32.xlu0 %v7643_v41, %s6183_s30  ;;  %v6157_v41 = vld [vmem:[%s6241_s26 + $0xe0] sm:$0xff] }
 0x255   : > { %v1360_v37 = vpop.permute.xlu1 %1359  ;;  %5894 = vmatpush1.bf16.msra.mxu1 %v7762_v21  ;;  %v1869_v39 = vsel %vm1840_vm7, %v6157_v41, %v7679_v16  ;;  %v1706_v16 = vsel %vm10301_vm5, %v1703_v5, %v1705_v3 }
 0x256   : > { %v7770_v55 = vpop.permute.xlu0 %689  ;;  %5879 = vmatprep.subr.bf16.mxu1 %v10292_v46  ;;  %v1911_v8 = vsel %vm1882_vm8, %v1869_v39, %v688_v7  ;;  %v958_v7 = vsel %vm10302_vm2, %v955_v28, %v957_v2  ;;  %v3741_v28 = vld [vmem:[%s10282_s3 + $0x138] sm:$0xff] }
 0x257   : > { %1580 = vrot.lane.b32.xlu1 %v1499_v40, %s6186_s9  ;;  %v1953_v1 = vsel %vm1924_vm9, %v1911_v8, %v817_v48  ;;  %v3740_v48 = vld [vmem:[%s10282_s3 + $0x130] sm:$0xff] }
 0x258   : > { %832 = vrot.lane.b32.xlu0 %v7767_v62, %s6180_s27  ;;  %v1995_v32 = vsel %vm1966_vm10, %v1953_v1, %v1024_v54  ;;  %v7818_v57 = vpack.c.bf16 %v3741_v28, %v3740_v48  ;;  %v7874_v1 = vpack.c.bf16 %v3745_v23, %v3744_v10  ;;  %v3747_v48 = vld [vmem:[%s10282_s3 + $0x168] sm:$0xff] }
 0x259   : > { %v1567_v60 = vpop.permute.xlu1 %1566  ;;  %5895 = vmatpush1.bf16.msra.mxu1 %v7792_v33  ;;  %v2037_v5 = vsel %vm2008_vm11, %v1995_v32, %v1231_v44 }
 0x25a   : > { %v819_v31 = vpop.permute.xlu0 %818  ;;  %5880 = vmatprep.subr.bf16.mxu1 %v10292_v46  ;;  %v2079_v13 = vsel %vm2050_vm12, %v2037_v5, %v1360_v37  ;;  %v627_v37 = vrot.slane %v7708_v0, 2 }
 0x25b   : > { %1787 = vrot.lane.b32.xlu1 %v1706_v16, %s6187_s10  ;;  %v2121_v54 = vsel %vm2092_vm13, %v2079_v13, %v1567_v60  ;;  %v1707_v16 = vrot.slane %v7802_v15, 6 }
 0x25c   : > { %1039 = vrot.lane.b32.xlu0 %v958_v7, %s6182_s29  ;;  %v7881_v7 = vsel %vm547_vm0, %v625_v45, %v627_v37  ;;  %v3746_v45 = vld [vmem:[%s10282_s3 + $0x160] sm:$0xff] }
 0x25d   : > { %v1774_v29 = vpop.permute.xlu1 %1773  ;;  %5896 = vmatpush1.bf16.msra.mxu1 %v7818_v57  ;;  %v7907_v13 = vpack.c.bf16 %v3747_v48, %v3746_v45 }
 0x25e   : > { %v2163_v44 = vsel %vm2134_vm14, %v2121_v54, %v1774_v29  ;;  %v1026_v61 = vpop.permute.xlu0 %1025  ;;  %5881 = vmatprep.subr.bf16.mxu1 %v10292_v46 }
 0x25f   : > { %1246 = vrot.lane.b32.xlu1 %v7673_v59, %s6184_s7  ;;  %5523 = vmatmul.mubr.msk.f32.gmra.mrb[56].mxu0 %vm2188_vm15, %v2163_v44  ;;  %v1500_v59 = vrot.slane %v7802_v15, 5  ;;  %v7917_v44 = vld [vmem:[%s6241_s26 + $0x150] sm:$0xff] }
 0x260   : > { %498 = vrot.lane.b32.xlu0 %v417_v22, %s6181_s28  ;;  %5525 = vmatprep.mubr.msk.f32.mxu0 %vm6189_vm6, %v10294_v52  ;;  %v10291_v22 = vrot.slane %v7657_v47, 1 }
 0x261   : > { %v1233_v40 = vpop.permute.xlu1 %1232  ;;  %5897 = vmatpush1.bf16.msra.mxu1 %v7848_v12  ;;  %v1501_v8 = vsel %vm10300_vm4, %v1498_v53, %v1500_v59  ;;  %v6158_v53 = vld [vmem:[%s6241_s26 + $0xe8] sm:$0xff] }
 0x262   : > { %v7852_v41 = vpop.permute.xlu0 %484  ;;  %v7854_v39 = vpop.f32.mrb[30].mxu0  ;;  %5882 = vmatprep.subr.bf16.mxu1 %v10292_v46  ;;  %v1870_v5 = vsel %vm1840_vm7, %v6158_v53, %v7742_v18  ;;  %v1708_v18 = vsel %vm10301_vm5, %v1705_v3, %v1707_v16 }
 0x263   : > { %1375 = vrot.lane.b32.xlu1 %v7843_v14, %s6185_s8  ;;  %v5485_v49 = vpop.f32.mrb[31].mxu0  ;;  %v1912_v28 = vsel %vm1882_vm8, %v1870_v5, %v7770_v55 }
 0x264   : > { %705 = vrot.lane.b32.xlu0 %v7690_v43, %s6183_s30  ;;  %v959_v43 = vrot.slane %v7708_v0, 3  ;;  %v1954_v54 = vsel %vm1924_vm9, %v1912_v28, %v819_v31  ;;  %v3748_v31 = vld [vmem:[%s10282_s3 + $0x170] sm:$0xff]  ;;  %v10290_v28 = vrot.slane %v7802_v15, 2 }
 0x265   : > { %v1362_v60 = vpop.permute.xlu1 %1361  ;;  %5898 = vmatpush1.bf16.msra.mxu1 %v7874_v1  ;;  %v1996_v19 = vsel %vm1966_vm10, %v1954_v54, %v1026_v61  ;;  %v1170_v61 = vrot.slane %v7917_v44, 4 }
 0x266   : > { %v7884_v32 = vpop.permute.xlu0 %691  ;;  %5883 = vmatprep.subr.bf16.mxu1 %v10292_v46  ;;  %v960_v55 = vsel %vm10302_vm2, %v957_v2, %v959_v43  ;;  %v2038_v3 = vsel %vm2008_vm11, %v1996_v19, %v1233_v40  ;;  %v3749_v2 = vld [vmem:[%s10282_s3 + $0x178] sm:$0xff] }
 0x267   : > { %1582 = vrot.lane.b32.xlu1 %v1501_v8, %s6186_s9  ;;  %v2080_v49 = vsel %vm2050_vm12, %v2038_v3, %v1362_v60  ;;  %v7933_v10 = vpack.c.bf16 %v3749_v2, %v3748_v31  ;;  %v419_v8 = vsel %vm340_vm1, %v416_v34, %v10291_v22  ;;  %v3750_v60 = vld [vmem:[%s10282_s3 + $0x180] sm:$0xff]  ;;  %v7958_v34 = vsel %vm10303_vm3, %v1168_v11, %v1170_v61 }
 0x268   : > { %834 = vrot.lane.b32.xlu0 %v7881_v7, %s6180_s27  ;;  %v7963_v45 = vpack.c.bf16 %v3751_v56, %v3750_v60  ;;  %v1709_v3 = vrot.slane %v7917_v44, 6 }
 0x269   : > { %v1569_v29 = vpop.permute.xlu1 %1568  ;;  %5899 = vmatpush1.bf16.msra.mxu1 %v7907_v13 }
 0x26a   : > { %v821_v4 = vpop.permute.xlu0 %820  ;;  %5884 = vmatprep.subr.bf16.mxu1 %v10292_v46  ;;  %v2122_v40 = vsel %vm2092_vm13, %v2080_v49, %v1569_v29  ;;  %v3752_v29 = vld [vmem:[%s10282_s3 + $0x190] sm:$0xff]  ;;  %v7996_v49 = vsel %vm547_vm0, %v627_v37, %v10290_v28  ;;  %v3754_v37 = vld [vmem:[%s10282_s3 + $0x1a0] sm:$0xff] }
 0x26b   : > { %1789 = vrot.lane.b32.xlu1 %v1708_v18, %s6187_s10  ;;  %v2732_v28 = vld [vmem:[%s10284_s5 + $0xc0] sm:$0xff] }
 0x26c   : > { %1041 = vrot.lane.b32.xlu0 %v960_v55, %s6182_s29  ;;  %v3753_v55 = vld [vmem:[%s10282_s3 + $0x198] sm:$0xff] }
 0x26d   : > { %v1776_v23 = vpop.permute.xlu1 %1775  ;;  %5900 = vmatpush1.bf16.msra.mxu1 %v7933_v10  ;;  %v7989_v31 = vpack.c.bf16 %v3753_v55, %v3752_v29 }
 0x26e   : > { %v2164_v53 = vsel %vm2134_vm14, %v2122_v40, %v1776_v23  ;;  %v1028_v5 = vpop.permute.xlu0 %1027  ;;  %5885 = vmatprep.subr.bf16.mxu1 %v10292_v46  ;;  %v8000_v40 = vld [vmem:[%s6241_s26 + $0x158] sm:$0xff] }
 0x26f   : > { %1248 = vrot.lane.b32.xlu1 %v7734_v20, %s6184_s7  ;;  %5526 = vmatmul.mubr.msk.f32.gmra.mrb[58].mxu0 %vm2188_vm15, %v2164_v53  ;;  %v1502_v20 = vrot.slane %v7917_v44, 5  ;;  %v3755_v53 = vld [vmem:[%s10282_s3 + $0x1a8] sm:$0xff]  ;;  %v10288_v56 = vrot.slane %v8000_v40, 4 }
 0x270   : > { %500 = vrot.lane.b32.xlu0 %v419_v8, %s6181_s28  ;;  %5528 = vmatprep.mubr.msk.f32.mxu0 %vm6189_vm6, %v10294_v52 }
 0x271   : > { %v1235_v48 = vpop.permute.xlu1 %1234  ;;  %5901 = vmatpush1.bf16.msra.mxu1 %v7963_v45  ;;  %v1503_v19 = vsel %vm10300_vm4, %v1500_v59, %v1502_v20  ;;  %v6159_v59 = vld [vmem:[%s6241_s26 + $0xf0] sm:$0xff] }
 0x272   : > { %v7967_v18 = vpop.permute.xlu0 %486  ;;  %v7969_v54 = vpop.f32.mrb[32].mxu0  ;;  %5886 = vmatprep.subr.bf16.mxu1 %v10292_v46  ;;  %v1871_v8 = vsel %vm1840_vm7, %v6159_v59, %v7852_v41  ;;  %v1710_v41 = vsel %vm10301_vm5, %v1707_v16, %v1709_v3  ;;  %v3757_v16 = vld [vmem:[%s10282_s3 + $0x1b8] sm:$0xff] }
 0x273   : > { %1377 = vrot.lane.b32.xlu1 %v7958_v34, %s6185_s8  ;;  %v5488_v11 = vpop.f32.mrb[33].mxu0  ;;  %v1913_v60 = vsel %vm1882_vm8, %v1871_v8, %v7884_v32 }
 0x274   : > { %707 = vrot.lane.b32.xlu0 %v7767_v62, %s6183_s30  ;;  %v10289_v62 = vrot.slane %v7802_v15, 3  ;;  %v8024_v11 = vpack.c.bf16 %v3755_v53, %v3754_v37  ;;  %v1955_v29 = vsel %vm1924_vm9, %v1913_v60, %v821_v4  ;;  %v3759_v53 = vld [vmem:[%s10282_s3 + $0x1c8] sm:$0xff]  ;;  %v10286_v60 = vrot.slane %v8000_v40, 6 }
 0x275   : > { %v1364_v2 = vpop.permute.xlu1 %1363  ;;  %5902 = vmatpush1.bf16.msra.mxu1 %v7989_v31  ;;  %v1997_v59 = vsel %vm1966_vm10, %v1955_v29, %v1028_v5 }
 0x276   : > { %v8002_v23 = vpop.permute.xlu0 %693  ;;  %5887 = vmatprep.subr.bf16.mxu1 %v10292_v46  ;;  %v962_v32 = vsel %vm10302_vm2, %v959_v43, %v10289_v62  ;;  %v2039_v37 = vsel %vm2008_vm11, %v1997_v59, %v1235_v48  ;;  %v3758_v43 = vld [vmem:[%s10282_s3 + $0x1c0] sm:$0xff]  ;;  %v8058_v48 = vsel %vm10303_vm3, %v1170_v61, %v10288_v56  ;;  %v1712_v61 = vsel %vm10301_vm5, %v1709_v3, %v10286_v60  ;;  %v2721_v60 = vld [vmem:[%s10284_s5 + $0x68] sm:$0xff] }
 0x277   : > { %1584 = vrot.lane.b32.xlu1 %v1503_v19, %s6186_s9  ;;  %v3756_v19 = vld [vmem:[%s10282_s3 + $0x1b0] sm:$0xff]  ;;  %v2081_v5 = vsel %vm2050_vm12, %v2039_v37, %v1364_v2  ;;  %v8065_v2 = vpack.c.bf16 %v3759_v53, %v3758_v43  ;;  %v2724_v53 = vld [vmem:[%s10284_s5 + $0x80] sm:$0xff] }
 0x278   : > { %836 = vrot.lane.b32.xlu0 %v7996_v49, %s6180_s27  ;;  %v8040_v4 = vpack.c.bf16 %v3757_v16, %v3756_v19  ;;  %v10287_v19 = vrot.slane %v8000_v40, 5  ;;  %v3760_v43 = vld [vmem:[%s10282_s3 + $0x1d0] sm:$0xff] }
 0x279   : > { %v1571_v55 = vpop.permute.xlu1 %1570  ;;  %5903 = vmatpush1.bf16.msra.mxu1 %v8024_v11  ;;  %10379 = vst [vmem:[#allocation2_spill] sm:$0xff] %v8065_v2 }
 0x27a   : > { %v823_v8 = vpop.permute.xlu0 %822  ;;  %5888 = vmatprep.subr.bf16.mxu1 %v10292_v46 }
 0x27b   : > { %1791 = vrot.lane.b32.xlu1 %v1710_v41, %s6187_s10  ;;  %v2123_v41 = vsel %vm2092_vm13, %v2081_v5, %v1571_v55 }
 0x27c   : > { %1043 = vrot.lane.b32.xlu0 %v962_v32, %s6182_s29  ;;  %v1505_v32 = vsel %vm10300_vm4, %v1502_v20, %v10287_v19  ;;  %v3761_v20 = vld [vmem:[%s10282_s3 + $0x1d8] sm:$0xff]  ;;  %v2722_v19 = vld [vmem:[%s10284_s5 + $0x70] sm:$0xff] }
 0x27d   : > { %v1778_v29 = vpop.permute.xlu1 %1777  ;;  %5904 = vmatpush1.bf16.msra.mxu1 %v8040_v4  ;;  %v8100_v5 = vpack.c.bf16 %v3761_v20, %v3760_v43  ;;  %v3763_v43 = vld [vmem:[%s10282_s3 + $0x1e8] sm:$0xff] }
 0x27e   : > { %v2165_v16 = vsel %vm2134_vm14, %v2123_v41, %v1778_v29  ;;  %v1030_v59 = vpop.permute.xlu0 %1029  ;;  %5889 = vmatprep.subr.bf16.mxu1 %v10292_v46  ;;  %v2723_v29 = vld [vmem:[%s10284_s5 + $0x78] sm:$0xff] }
 0x27f   : > { %1379 = vrot.lane.b32.xlu1 %v8058_v48, %s6185_s8  ;;  %5529 = vmatmul.mubr.msk.f32.gmra.mrb[60].mxu0 %vm2188_vm15, %v2165_v16  ;;  %10380 = vst [vmem:[#allocation3_spill] sm:$0xff] %v8100_v5 }
 0x280   : > { %1250 = vrot.lane.b32.xlu0 %v7843_v14, %s6184_s7  ;;  %5531 = vmatprep.mubr.msk.f32.mxu0 %vm6189_vm6, %v10294_v52 }
 0x281   : > { %v1237_v55 = vpop.permute.xlu1 %1236  ;;  %5905 = vmatpush1.bf16.msra.mxu1 %v8065_v2 }
 0x282   : > { %v8083_v37 = vpop.permute.xlu0 %488  ;;  %v8085_v14 = vpop.f32.mrb[34].mxu0  ;;  %5890 = vmatprep.subr.bf16.mxu1 %v10292_v46 }
 0x283   : > { %1793 = vrot.lane.b32.xlu1 %v1712_v61, %s6187_s10  ;;  %v5491_v3 = vpop.f32.mrb[35].mxu0  ;;  %v6160_v61 = vld [vmem:[%s6241_s26 + $0xf8] sm:$0xff] }
 0x284   : > { %1586 = vrot.lane.b32.xlu0 %v1505_v32, %s6186_s9  ;;  %v1872_v3 = vsel %vm1840_vm7, %v6160_v61, %v7967_v18  ;;  %v3762_v32 = vld [vmem:[%s10282_s3 + $0x1e0] sm:$0xff] }
 0x285   : > { %v1366_v41 = vpop.permute.xlu1 %1365  ;;  %5906 = vmatpush1.bf16.msra.mxu1 %v8100_v5  ;;  %v1914_v20 = vsel %vm1882_vm8, %v1872_v3, %v8002_v23  ;;  %v8121_v18 = vpack.c.bf16 %v3763_v43, %v3762_v32 }
 0x286   : > { %v696_v16 = vpop.permute.xlu0 %695  ;;  %5891 = vmatprep.subr.bf16.mxu1 %v10292_v46 }
 0x287   : > { %2831 = vperm.xlu1 %6148, %v2724_v53   ;;  %10381 = vst [vmem:[#allocation4_spill] sm:$0xff] %v8121_v18  ;;  %v1956_v53 = vsel %vm1924_vm9, %v1914_v20, %v823_v8  ;;  %v3765_v8 = vld [vmem:[%s10282_s3 + $0x1f8] sm:$0xff] }
 0x288   : > { %2826 = vperm.xlu0 %6147, %v2723_v29   ;;  %v1998_v56 = vsel %vm1966_vm10, %v1956_v53, %v1030_v59  ;;  %v3764_v29 = vld [vmem:[%s10282_s3 + $0x1f0] sm:$0xff]  ;;  %v2725_v59 = vld [vmem:[%s10284_s5 + $0x88] sm:$0xff]  ;;  %v2728_v53 = vld [vmem:[%s10284_s5 + $0xa0] sm:$0xff] }
 0x289   : > { %v1573_v61 = vpop.permute.xlu1 %1572  ;;  %5907 = vmatpush1.bf16.msra.mxu1 %v8121_v18  ;;  %v2040_v23 = vsel %vm2008_vm11, %v1998_v56, %v1237_v55  ;;  %v8141_v32 = vpack.c.bf16 %v3765_v8, %v3764_v29  ;;  %v2726_v55 = vld [vmem:[%s10284_s5 + $0x90] sm:$0xff]  ;;  %v2729_v8 = vld [vmem:[%s10284_s5 + $0xa8] sm:$0xff] }
 0x28a   : > { %v825_v62 = vpop.permute.xlu0 %824  ;;  %5892 = vmatprep.subr.bf16.mxu1 %v10292_v46  ;;  %v2082_v3 = vsel %vm2050_vm12, %v2040_v23, %v1366_v41 }
 0x28b   : > { %2816 = vperm.xlu1 %6148, %v2721_v60   ;;  %10382 = vst [vmem:[#allocation5_spill] sm:$0xff] %v8141_v32  ;;  %v2124_v56 = vsel %vm2092_vm13, %v2082_v3, %v1573_v61 }
 0x28c   : > { %2821 = vperm.xlu0 %6147, %v2722_v19   ;;  %v2727_v19 = vld [vmem:[%s10284_s5 + $0x98] sm:$0xff] }
 0x28d   : > { %v1780_v60 = vpop.permute.xlu1 %1779  ;;  %5908 = vmatpush1.bf16.msra.mxu1 %v8141_v32 }
 0x28e   : > { %v2166_v43 = vsel %vm2134_vm14, %v2124_v56, %v1780_v60  ;;  %v1032_v20 = vpop.permute.xlu0 %1031  ;;  %5749 = vmatprep.subr.bf16.mxu1 %v10292_v46  ;;  %v6161_v60 = vld [vmem:[%s6241_s26 + $0x100] sm:$0xff] }
 0x28f   : > { %2836 = vperm.xlu1 %6148, %v2725_v59   ;;  %5532 = vmatmul.mubr.msk.f32.gmra.mrb[62].mxu0 %vm2188_vm15, %v2166_v43  ;;  %v2730_v59 = vld [vmem:[%s10284_s5 + $0xb0] sm:$0xff] }
 0x290   : > { %2841 = vperm.xlu0 %6147, %v2726_v55   ;;  %5534 = vmatprep.mubr.msk.f32.mxu0 %vm6189_vm6, %v10294_v52  ;;  %v1873_v55 = vsel %vm1840_vm7, %v6161_v60, %v8083_v37  ;;  %v2734_v60 = vld [vmem:[%s10284_s5 + $0xd0] sm:$0xff] }
 0x291   : > { %v1239_v41 = vpop.permute.xlu1 %1238  ;;  %v1915_v43 = vsel %vm1882_vm8, %v1873_v55, %v696_v16 }
 0x292   : > { %v491_v61 = vpop.permute.xlu0 %490  ;;  %v8159_v23 = vpop.f32.mrb[36].mxu0 }
 0x293   : > { %2846 = vperm.xlu1 %6148, %v2727_v19   ;;  %v5494_v29 = vpop.f32.mrb[37].mxu0  ;;  %v2731_v19 = vld [vmem:[%s10284_s5 + $0xb8] sm:$0xff] }
 0x294   : > { %2851 = vperm.xlu0 %6147, %v2728_v53   ;;  %v1957_v53 = vsel %vm1924_vm9, %v1915_v43, %v825_v62 }
 0x295   : > { %v1368_v3 = vpop.permute.xlu1 %1367  ;;  %v1999_v22 = vsel %vm1966_vm10, %v1957_v53, %v1032_v20  ;;  %v2737_v53 = vld [vmem:[%s10284_s5 + $0xe8] sm:$0xff] }
 0x296   : > { %v698_v56 = vpop.permute.xlu0 %697  ;;  %v2041_v37 = vsel %vm2008_vm11, %v1999_v22, %v1239_v41  ;;  %v2735_v22 = vld [vmem:[%s10284_s5 + $0xd8] sm:$0xff]  ;;  %v2736_v41 = vld [vmem:[%s10284_s5 + $0xe0] sm:$0xff] }
 0x297   : > { %2856 = vperm.xlu1 %6148, %v2729_v8   ;;  %v2083_v16 = vsel %vm2050_vm12, %v2041_v37, %v1368_v3  ;;  %v2733_v8 = vld [vmem:[%s10284_s5 + $0xc8] sm:$0xff]  ;;  %v2738_v37 = vld [vmem:[%s10284_s5 + $0xf0] sm:$0xff] }
 0x298   : > { %2861 = vperm.xlu0 %6147, %v2730_v59  }
 0x299   : > { %v1575_v29 = vpop.permute.xlu1 %1574 }
 0x29a   : > { %v827_v46 = vpop.permute.xlu0 %826  ;;  %v2125_v62 = vsel %vm2092_vm13, %v2083_v16, %v1575_v29 }
 0x29b   : > { %2866 = vperm.xlu1 %6148, %v2731_v19  }
 0x29c   : > { %2871 = vperm.xlu0 %6147, %v2732_v28  }
 0x29d   : > { %v1782_v59 = vpop.permute.xlu1 %1781 }
 0x29e   : > { %v2167_v20 = vsel %vm2134_vm14, %v2125_v62, %v1782_v59  ;;  %v1034_v55 = vpop.permute.xlu0 %1033 }
 0x29f   : > { %2876 = vperm.xlu1 %6148, %v2733_v8   ;;  %5535 = vmatmul.mubr.msk.f32.gmra.mrb[64].mxu0 %vm2188_vm15, %v2167_v20  ;;  %v6162_v8 = vld [vmem:[%s6241_s26 + $0x108] sm:$0xff] }
 0x2a0   : > { %2881 = vperm.xlu0 %6147, %v2734_v60   ;;  %5537 = vmatprep.mubr.msk.f32.mxu0 %vm6189_vm6, %v10294_v52  ;;  %v1874_v62 = vsel %vm1840_vm7, %v6162_v8, %v491_v61  ;;  %v2739_v60 = vld [vmem:[%s10284_s5 + $0xf8] sm:$0xff]  ;;  %v2742_v8 = vld [vmem:[%s10284_s5 + $0x110] sm:$0xff] }
 0x2a1   : > { %v1241_v28 = vpop.permute.xlu1 %1240  ;;  %v1916_v59 = vsel %vm1882_vm8, %v1874_v62, %v698_v56 }
 0x2a2   : > { %v493_v3 = vpop.permute.xlu0 %492  ;;  %v8198_v43 = vpop.f32.mrb[38].mxu0  ;;  %v1958_v20 = vsel %vm1924_vm9, %v1916_v59, %v827_v46 }
 0x2a3   : > { %2886 = vperm.xlu1 %6148, %v2735_v22   ;;  %v5497_v19 = vpop.f32.mrb[39].mxu0 }
 0x2a4   : > { %2891 = vperm.xlu0 %6147, %v2736_v41   ;;  %v2740_v41 = vld [vmem:[%s10284_s5 + $0x100] sm:$0xff]  ;;  %v2000_v19 = vsel %vm1966_vm10, %v1958_v20, %v1034_v55 }
 0x2a5   : > { %v1370_v29 = vpop.permute.xlu1 %1369  ;;  %v2042_v61 = vsel %vm2008_vm11, %v2000_v19, %v1241_v28  ;;  %v2743_v28 = vld [vmem:[%s10284_s5 + $0x118] sm:$0xff]  ;;  %v3702_v19 = vld [vmem:[%s10282_s3] sm:$0xff] }
 0x2a6   : > { %v700_v16 = vpop.permute.xlu0 %699  ;;  %v2084_v56 = vsel %vm2050_vm12, %v2042_v61, %v1370_v29  ;;  %v10383_v29 = vmov 0.0   ;;  %v3703_v61 = vld [vmem:[%s10282_s3 + $0x8] sm:$0xff] }
 0x2a7   : > { %2896 = vperm.xlu1 %6148, %v2737_v53   ;;  %v2741_v53 = vld [vmem:[%s10284_s5 + $0x108] sm:$0xff] }
 0x2a8   : > { %2901 = vperm.xlu0 %6147, %v2738_v37  }
 0x2a9   : > { %v1577_v22 = vpop.permute.xlu1 %1576 }
 0x2aa   : > { %v829_v52 = vpop.permute.xlu0 %828  ;;  %v2126_v46 = vsel %vm2092_vm13, %v2084_v56, %v1577_v22  ;;  %v2745_v56 = vld [vmem:[%s10284_s5 + $0x128] sm:$0xff] }
 0x2ab   : > { %2906 = vperm.xlu1 %6148, %v2739_v60   ;;  %v2744_v60 = vld [vmem:[%s10284_s5 + $0x120] sm:$0xff] }
 0x2ac   : > { %2911 = vperm.xlu0 %6147, %v2740_v41  }
 0x2ad   : > { %v1784_v37 = vpop.permute.xlu1 %1783 }
 0x2ae   : > { %v2168_v55 = vsel %vm2134_vm14, %v2126_v46, %v1784_v37  ;;  %v1036_v62 = vpop.permute.xlu0 %1035  ;;  %v2746_v37 = vld [vmem:[%s10284_s5 + $0x130] sm:$0xff] }
 0x2af   : > { %2916 = vperm.xlu1 %6148, %v2741_v53   ;;  %5538 = vmatmul.mubr.msk.f32.gmra.mrb[66].mxu0 %vm2188_vm15, %v2168_v55  ;;  %v5654_v53 = vpack.c.bf16 %v3703_v61, %v3702_v19  ;;  %v6163_v55 = vld [vmem:[%s6241_s26 + $0x110] sm:$0xff]  ;;  %v3705_v19 = vld [vmem:[%s10282_s3 + $0x18] sm:$0xff] }
 0x2b0   : > { %2921 = vperm.xlu0 %6147, %v2742_v8   ;;  %5540 = vmatprep.mubr.msk.f32.mxu0 %vm6189_vm6, %v10383_v29 }
 0x2b1   : > { %v1243_v59 = vpop.permute.xlu1 %1242  ;;  %5655 = vmatpush1.bf16.msra.mxu0 %v5654_v53  ;;  %v2710_v53 = vld [vmem:[%s10284_s5 + $0x10] sm:$0xff] }
 0x2b2   : > { %v8236_v20 = vpop.permute.xlu0 %494  ;;  %v8238_v22 = vpop.f32.mrb[40].mxu0 }
 0x2b3   : > { %2926 = vperm.xlu1 %6148, %v2743_v28   ;;  %v5500_v41 = vpop.f32.mrb[41].mxu0  ;;  %v1875_v28 = vsel %vm1840_vm7, %v6163_v55, %v493_v3  ;;  %v2711_v55 = vld [vmem:[%s10284_s5 + $0x18] sm:$0xff] }
 0x2b4   : > { %2931 = vperm.xlu0 %6147, %v2744_v60   ;;  %v10384_v41 = vmov 0.0|0.0   ;;  %v3704_v60 = vld [vmem:[%s10282_s3 + $0x10] sm:$0xff]  ;;  %v1917_v61 = vsel %vm1882_vm8, %v1875_v28, %v700_v16  ;;  %v3706_v16 = vld [vmem:[%s10282_s3 + $0x20] sm:$0xff]  ;;  %v2713_v28 = vld [vmem:[%s10284_s5 + $0x28] sm:$0xff] }
 0x2b5   : > { %v1372_v46 = vpop.permute.xlu1 %1371  ;;  %5656 = vmatprep.subr.bf16.mxu0 %v10384_v41  ;;  %v5657_v32 = vpack.c.bf16 %v3705_v19, %v3704_v60  ;;  %v1959_v3 = vsel %vm1924_vm9, %v1917_v61, %v829_v52  ;;  %v3707_v52 = vld [vmem:[%s10282_s3 + $0x28] sm:$0xff]  ;;  %v2714_v61 = vld [vmem:[%s10284_s5 + $0x30] sm:$0xff] }
 0x2b6   : > { %v8252_v8 = vpop.permute.xlu0 %701  ;;  %v2001_v18 = vsel %vm1966_vm10, %v1959_v3, %v1036_v62  ;;  %v5660_v62 = vpack.c.bf16 %v3707_v52, %v3706_v16 }
 0x2b7   : > { %2936 = vperm.xlu1 %6148, %v2745_v56   ;;  %5658 = vmatpush1.bf16.msra.mxu0 %v5657_v32  ;;  %v2043_v2 = vsel %vm2008_vm11, %v2001_v18, %v1243_v59  ;;  %v2712_v32 = vld [vmem:[%s10284_s5 + $0x20] sm:$0xff] }
 0x2b8   : > { %2941 = vperm.xlu0 %6147, %v2746_v37   ;;  %5659 = vmatprep.subr.bf16.mxu0 %v10384_v41  ;;  %v2085_v37 = vsel %vm2050_vm12, %v2043_v2, %v1372_v46  ;;  %v3708_v2 = vld [vmem:[%s10282_s3 + $0x30] sm:$0xff]  ;;  %v3709_v46 = vld [vmem:[%s10282_s3 + $0x38] sm:$0xff] }
 0x2b9   : > { %v1579_v56 = vpop.permute.xlu1 %1578  ;;  %v5663_v3 = vpack.c.bf16 %v3709_v46, %v3708_v2 }
 0x2ba   : > { %v831_v5 = vpop.permute.xlu0 %830  ;;  %v2127_v18 = vsel %vm2092_vm13, %v2085_v37, %v1579_v56 }
 0x2bb   : > { %2761 = vperm.xlu1 %6148, %v2710_v53   ;;  %5661 = vmatpush1.bf16.msra.mxu0 %v5660_v62  ;;  %v420_v53 = vrot.slane %v7708_v0, 1  ;;  %v3711_v62 = vld [vmem:[%s10282_s3 + $0x48] sm:$0xff]  ;;  %v3718_v0 = vld [vmem:[%s10282_s3 + $0x80] sm:$0xff] }
 0x2bc   : > { %2766 = vperm.xlu0 %6147, %v2711_v55   ;;  %v2715_v55 = vld [vmem:[%s10284_s5 + $0x38] sm:$0xff]  ;;  %5662 = vmatprep.subr.bf16.mxu0 %v10384_v41 }
 0x2bd   : > { %v1786_v59 = vpop.permute.xlu1 %1785 }
 0x2be   : > { %v2169_v60 = vsel %vm2134_vm14, %v2127_v18, %v1786_v59  ;;  %v1038_v19 = vpop.permute.xlu0 %1037  ;;  %v10385_v18 = vrot.slane %v7657_v47, 1  ;;  %v3712_v47 = vld [vmem:[%s10282_s3 + $0x50] sm:$0xff] }
 0x2bf   : > { %2771 = vperm.xlu1 %6148, %v2712_v32   ;;  %5541 = vmatmul.mubr.msk.f32.gmra.mrb[68].mxu0 %vm2188_vm15, %v2169_v60  ;;  %v3710_v32 = vld [vmem:[%s10282_s3 + $0x40] sm:$0xff] }
 0x2c0   : > { %2776 = vperm.xlu0 %6147, %v2713_v28   ;;  %5543 = vmatprep.mubr.msk.f32.mxu0 %vm6189_vm6, %v10383_v29  ;;  %v421_v59 = vsel %vm340_vm1, %v10385_v18, %v420_v53  ;;  %v756_v28 = vrot.slane %v7917_v44, 2  ;;  %v5666_v60 = vpack.c.bf16 %v3711_v62, %v3710_v32  ;;  %v963_v62 = vrot.slane %v7917_v44, 3 }
 0x2c1   : > { %v1245_v56 = vpop.permute.xlu1 %1244  ;;  %5664 = vmatpush1.bf16.msra.mxu0 %v5663_v3 }
 0x2c2   : > { %v8306_v16 = vpop.permute.xlu0 %496  ;;  %v8308_v52 = vpop.f32.mrb[42].mxu0  ;;  %5665 = vmatprep.subr.bf16.mxu0 %v10384_v41 }
 0x2c3   : > { %2781 = vperm.xlu1 %6148, %v2714_v61   ;;  %v5503_v37 = vpop.f32.mrb[43].mxu0  ;;  %v6164_v61 = vld [vmem:[%s6241_s26 + $0x118] sm:$0xff] }
 0x2c4   : > { %2786 = vperm.xlu0 %6147, %v2715_v55   ;;  %v1876_v3 = vsel %vm1840_vm7, %v6164_v61, %v8236_v20  ;;  %v3713_v55 = vld [vmem:[%s10282_s3 + $0x58] sm:$0xff]  ;;  %v10386_v20 = vrot.slane %v7802_v15, 2  ;;  %v2716_v61 = vld [vmem:[%s10284_s5 + $0x40] sm:$0xff] }
 0x2c5   : > { %v1374_v2 = vpop.permute.xlu1 %1373  ;;  %5667 = vmatpush1.bf16.msra.mxu0 %v5666_v60  ;;  %v1918_v37 = vsel %vm1882_vm8, %v1876_v3, %v8252_v8  ;;  %v5669_v18 = vpack.c.bf16 %v3713_v55, %v3712_v47  ;;  %v3714_v47 = vld [vmem:[%s10282_s3 + $0x60] sm:$0xff] }
 0x2c6   : > { %v8323_v46 = vpop.permute.xlu0 %703  ;;  %5668 = vmatprep.subr.bf16.mxu0 %v10384_v41  ;;  %v757_v32 = vsel %vm547_vm0, %v10386_v20, %v756_v28 }
 0x2c7   : > { %502 = vrot.lane.b32.xlu1 %v421_v59, %s6181_s28  ;;  %v1960_v59 = vsel %vm1924_vm9, %v1918_v37, %v831_v5  ;;  %v3715_v5 = vld [vmem:[%s10282_s3 + $0x68] sm:$0xff] }
 0x2c8   : > { %709 = vrot.lane.b32.xlu0 %v7881_v7, %s6183_s30  ;;  %v2002_v8 = vsel %vm1966_vm10, %v1960_v59, %v1038_v19  ;;  %v10387_v19 = vrot.slane %v7802_v15, 3  ;;  %v5672_v37 = vpack.c.bf16 %v3715_v5, %v3714_v47  ;;  %v422_v59 = vrot.slane %v7802_v15, 1  ;;  %v2709_v15 = vld [vmem:[%s10284_s5 + $0x8] sm:$0xff] }
 0x2c9   : > { %v1581_v60 = vpop.permute.xlu1 %1580  ;;  %5670 = vmatpush1.bf16.msra.mxu0 %v5669_v18  ;;  %v2044_v7 = vsel %vm2008_vm11, %v2002_v8, %v1245_v56  ;;  %v2708_v18 = vld [vmem:[%s10284_s5] sm:$0xff]  ;;  %v3717_v8 = vld [vmem:[%s10282_s3 + $0x78] sm:$0xff] }
 0x2ca   : > { %v833_v3 = vpop.permute.xlu0 %832  ;;  %5671 = vmatprep.subr.bf16.mxu0 %v10384_v41  ;;  %v2086_v55 = vsel %vm2050_vm12, %v2044_v7, %v1374_v2  ;;  %v964_v56 = vsel %vm10302_vm2, %v10387_v19, %v963_v62  ;;  %v423_v5 = vsel %vm340_vm1, %v420_v53, %v422_v59  ;;  %v3719_v53 = vld [vmem:[%s10282_s3 + $0x88] sm:$0xff]  ;;  %v758_v59 = vrot.slane %v8000_v40, 2 }
 0x2cb   : > { %838 = vrot.lane.b32.xlu1 %v757_v32, %s6180_s27  ;;  %v2128_v20 = vsel %vm2092_vm13, %v2086_v55, %v1581_v60  ;;  %v3716_v60 = vld [vmem:[%s10282_s3 + $0x70] sm:$0xff]  ;;  %v8389_v55 = vld [vmem:[%s6241_s26 + $0x160] sm:$0xff] }
 0x2cc   : > { %2791 = vperm.xlu0 %6147, %v2716_v61   ;;  %v5675_v7 = vpack.c.bf16 %v3717_v8, %v3716_v60  ;;  %v6165_v60 = vld [vmem:[%s6241_s26 + $0x120] sm:$0xff] }
 0x2cd   : > { %v1788_v32 = vpop.permute.xlu1 %1787  ;;  %5673 = vmatpush1.bf16.msra.mxu0 %v5672_v37  ;;  %v1877_v8 = vsel %vm1840_vm7, %v6165_v60, %v8306_v16  ;;  %v759_v60 = vsel %vm547_vm0, %v756_v28, %v758_v59  ;;  %v965_v59 = vrot.slane %v8000_v40, 3 }
 0x2ce   : > { %v2170_v2 = vsel %vm2134_vm14, %v2128_v20, %v1788_v32  ;;  %v1040_v61 = vpop.permute.xlu0 %1039  ;;  %5674 = vmatprep.subr.bf16.mxu0 %v10384_v41  ;;  %v1299_v20 = vrot.slane %v8389_v55, 4  ;;  %v5678_v32 = vpack.c.bf16 %v3719_v53, %v3718_v0 }
 0x2cf   : > { %1045 = vrot.lane.b32.xlu1 %v964_v56, %s6182_s29  ;;  %5544 = vmatmul.mubr.msk.f32.gmra.mrb[70].mxu0 %vm2188_vm15, %v2170_v2 }
 0x2d0   : > { %2751 = vperm.xlu0 %6147, %v2708_v18   ;;  %5546 = vmatprep.mubr.msk.f32.mxu0 %vm6189_vm6, %v10383_v29 }
 0x2d1   : > { %v1247_v47 = vpop.permute.xlu1 %1246  ;;  %5676 = vmatpush1.bf16.msra.mxu0 %v5675_v7  ;;  %v3721_v7 = vld [vmem:[%s10282_s3 + $0x98] sm:$0xff] }
 0x2d2   : > { %v8392_v19 = vpop.permute.xlu0 %498  ;;  %v8394_v56 = vpop.f32.mrb[44].mxu0  ;;  %5677 = vmatprep.subr.bf16.mxu0 %v10384_v41 }
 0x2d3   : > { %2756 = vperm.xlu1 %6148, %v2709_v15   ;;  %v5506_v37 = vpop.f32.mrb[45].mxu0  ;;  %v3720_v15 = vld [vmem:[%s10282_s3 + $0x90] sm:$0xff] }
 0x2d4   : > { %504 = vrot.lane.b32.xlu0 %v423_v5, %s6181_s28  ;;  %v1919_v5 = vsel %vm1882_vm8, %v1877_v8, %v8323_v46  ;;  %v1506_v37 = vrot.slane %v8389_v55, 5  ;;  %v5681_v0 = vpack.c.bf16 %v3721_v7, %v3720_v15  ;;  %v3723_v15 = vld [vmem:[%s10282_s3 + $0xa8] sm:$0xff]  ;;  %s10123_s28 = scalar_lea.vmem %s10285_s6, %s6126_s23 }
 0x2d5   : > { %v1376_v18 = vpop.permute.xlu1 %1375  ;;  %5679 = vmatpush1.bf16.msra.mxu0 %v5678_v32  ;;  %v1961_v53 = vsel %vm1924_vm9, %v1919_v5, %v833_v3  ;;  %v3722_v3 = vld [vmem:[%s10282_s3 + $0xa0] sm:$0xff] }
 0x2d6   : > { %v8406_v2 = vpop.permute.xlu0 %705  ;;  %5680 = vmatprep.subr.bf16.mxu0 %v10384_v41  ;;  %v2003_v46 = vsel %vm1966_vm10, %v1961_v53, %v1040_v61  ;;  %v10389_v61 = vrot.slane %v8000_v40, 5  ;;  %v5684_v7 = vpack.c.bf16 %v3723_v15, %v3722_v3 }
 0x2d7   : > { %1252 = vrot.lane.b32.xlu1 %v7958_v34, %s6184_s7  ;;  %v10388_v34 = vrot.slane %v8000_v40, 4 }
 0x2d8   : > { %711 = vrot.lane.b32.xlu0 %v7996_v49, %s6183_s30  ;;  %v2045_v49 = vsel %vm2008_vm11, %v2003_v46, %v1247_v47  ;;  %v1507_v47 = vsel %vm10300_vm4, %v10389_v61, %v1506_v37  ;;  %v3725_v46 = vld [vmem:[%s10282_s3 + $0xb8] sm:$0xff] }
 0x2d9   : > { %v1300_v16 = vsel %vm10303_vm3, %v10388_v34, %v1299_v20  ;;  %v1583_v32 = vpop.permute.xlu1 %1582  ;;  %5682 = vmatpush1.bf16.msra.mxu0 %v5681_v0  ;;  %v2087_v28 = vsel %vm2050_vm12, %v2045_v49, %v1376_v18  ;;  %v1713_v0 = vrot.slane %v8389_v55, 6  ;;  %v966_v49 = vsel %vm10302_vm2, %v963_v62, %v965_v59  ;;  %v3726_v62 = vld [vmem:[%s10282_s3 + $0xc0] sm:$0xff]  ;;  %v3729_v55 = vld [vmem:[%s10282_s3 + $0xd8] sm:$0xff] }
 0x2da   : > { %v835_v8 = vpop.permute.xlu0 %834  ;;  %5683 = vmatprep.subr.bf16.mxu0 %v10384_v41  ;;  %v2129_v5 = vsel %vm2092_vm13, %v2087_v28, %v1583_v32  ;;  %v3724_v32 = vld [vmem:[%s10282_s3 + $0xb0] sm:$0xff]  ;;  %v10390_v28 = vrot.slane %v8000_v40, 6  ;;  %v3727_v40 = vld [vmem:[%s10282_s3 + $0xc8] sm:$0xff] }
 0x2db   : > { %1381 = vrot.lane.b32.xlu1 %v1300_v16, %s6185_s8  ;;  %v2717_v16 = vld [vmem:[%s10284_s5 + $0x48] sm:$0xff]  ;;  %v5687_v3 = vpack.c.bf16 %v3725_v46, %v3724_v32 }
 0x2dc   : > { %840 = vrot.lane.b32.xlu0 %v759_v60, %s6180_s27  ;;  %v297_v60 = vld [vmem:[%s6241_s26 + $0x168] sm:$0xff]  ;;  %v1714_v61 = vsel %vm10301_vm5, %v10390_v28, %v1713_v0 }
 0x2dd   : > { %v1790_v34 = vpop.permute.xlu1 %1789  ;;  %5685 = vmatpush1.bf16.msra.mxu0 %v5684_v7  ;;  %v1508_v59 = vrot.slane %v297_v60, 5  ;;  %v6166_v46 = vld [vmem:[%s6241_s26 + $0x128] sm:$0xff]  ;;  %v1715_v28 = vrot.slane %v297_v60, 6 }
 0x2de   : > { %v2171_v18 = vsel %vm2134_vm14, %v2129_v5, %v1790_v34  ;;  %v1042_v53 = vpop.permute.xlu0 %1041  ;;  %5686 = vmatprep.subr.bf16.mxu0 %v10384_v41  ;;  %v5690_v34 = vpack.c.bf16 %v3727_v40, %v3726_v62 }
 0x2df   : > { %1588 = vrot.lane.b32.xlu1 %v1507_v47, %s6186_s9  ;;  %5547 = vmatmul.mubr.msk.f32.gmra.mrb[72].mxu0 %vm2188_vm15, %v2171_v18  ;;  %v1301_v47 = vrot.slane %v297_v60, 4 }
 0x2e0   : > { %2796 = vperm.xlu0 %6147, %v2717_v16   ;;  %5549 = vmatprep.mubr.msk.f32.mxu0 %vm6189_vm6, %v10383_v29 }
 0x2e1   : > { %v1249_v15 = vpop.permute.xlu1 %1248  ;;  %5688 = vmatpush1.bf16.msra.mxu0 %v5687_v3  ;;  %v1302_v18 = vsel %vm10303_vm3, %v1299_v20, %v1301_v47  ;;  %v3728_v3 = vld [vmem:[%s10282_s3 + $0xd0] sm:$0xff] }
 0x2e2   : > { %v501_v7 = vpop.permute.xlu0 %500  ;;  %v8474_v5 = vpop.f32.mrb[46].mxu0  ;;  %5689 = vmatprep.subr.bf16.mxu0 %v10384_v41 }
 0x2e3   : > { %1047 = vrot.lane.b32.xlu1 %v966_v49, %s6182_s29  ;;  %v5509_v44 = vpop.f32.mrb[47].mxu0  ;;  %v1878_v49 = vsel %vm1840_vm7, %v6166_v46, %v8392_v19  ;;  %v1509_v19 = vsel %vm10300_vm4, %v1506_v37, %v1508_v59  ;;  %v3730_v37 = vld [vmem:[%s10282_s3 + $0xe0] sm:$0xff] }
 0x2e4   : > { %1795 = vrot.lane.b32.xlu0 %v1714_v61, %s6187_s10  ;;  %v1920_v20 = vsel %vm1882_vm8, %v1878_v49, %v8406_v2  ;;  %v5693_v61 = vpack.c.bf16 %v3729_v55, %v3728_v3  ;;  %v2718_v44 = vld [vmem:[%s10284_s5 + $0x50] sm:$0xff] }
 0x2e5   : > { %v1378_v16 = vpop.permute.xlu1 %1377  ;;  %5691 = vmatpush1.bf16.msra.mxu0 %v5690_v34  ;;  %v6167_v3 = vld [vmem:[%s6241_s26 + $0x130] sm:$0xff] }
 0x2e6   : > { %v708_v32 = vpop.permute.xlu0 %707  ;;  %5692 = vmatprep.subr.bf16.mxu0 %v10384_v41  ;;  %v1879_v55 = vsel %vm1840_vm7, %v6167_v3, %v501_v7 }
 0x2e7   : > { %1254 = vrot.lane.b32.xlu1 %v8058_v48, %s6184_s7  ;;  %v1962_v48 = vsel %vm1924_vm9, %v1920_v20, %v835_v8  ;;  %v3731_v8 = vld [vmem:[%s10282_s3 + $0xe8] sm:$0xff]  ;;  %v1921_v20 = vsel %vm1882_vm8, %v1879_v55, %v708_v32 }
 0x2e8   : > { %1383 = vrot.lane.b32.xlu0 %v1302_v18, %s6185_s8  ;;  %v2004_v62 = vsel %vm1966_vm10, %v1962_v48, %v1042_v53  ;;  %v1716_v53 = vsel %vm10301_vm5, %v1713_v0, %v1715_v28  ;;  %v5696_v59 = vpack.c.bf16 %v3731_v8, %v3730_v37  ;;  %v2719_v18 = vld [vmem:[%s10284_s5 + $0x58] sm:$0xff]  ;;  %v3732_v0 = vld [vmem:[%s10282_s3 + $0xf0] sm:$0xff] }
 0x2e9   : > { %v1585_v47 = vpop.permute.xlu1 %1584  ;;  %5694 = vmatpush1.bf16.msra.mxu0 %v5693_v61  ;;  %v2046_v2 = vsel %vm2008_vm11, %v2004_v62, %v1249_v15  ;;  %v2747_v48 = vld [vmem:[%s10284_s5 + $0x138] sm:$0xff] }
 0x2ea   : > { %v837_v40 = vpop.permute.xlu0 %836  ;;  %5695 = vmatprep.subr.bf16.mxu0 %v10384_v41  ;;  %v2088_v60 = vsel %vm2050_vm12, %v2046_v2, %v1378_v16  ;;  %v3733_v16 = vld [vmem:[%s10282_s3 + $0xf8] sm:$0xff] }
 0x2eb   : > { %1590 = vrot.lane.b32.xlu1 %v1509_v19, %s6186_s9  ;;  %v2130_v15 = vsel %vm2092_vm13, %v2088_v60, %v1585_v47  ;;  %v2720_v19 = vld [vmem:[%s10284_s5 + $0x60] sm:$0xff]  ;;  %v5699_v7 = vpack.c.bf16 %v3733_v16, %v3732_v0  ;;  %v1963_v28 = vsel %vm1924_vm9, %v1921_v20, %v837_v40 }
 0x2ec   : > { %2801 = vperm.xlu0 %6147, %v2718_v44   ;;  %v2748_v40 = vld [vmem:[%s10284_s5 + $0x140] sm:$0xff] }
 0x2ed   : > { %v1792_v34 = vpop.permute.xlu1 %1791  ;;  %5697 = vmatpush1.bf16.msra.mxu0 %v5696_v59 }
 0x2ee   : > { %v2172_v46 = vsel %vm2134_vm14, %v2130_v15, %v1792_v34  ;;  %v1044_v49 = vpop.permute.xlu0 %1043  ;;  %5698 = vmatprep.subr.bf16.mxu0 %v10384_v41  ;;  %v8563_v15 = vld [vmem:[%s10281_s2] ss:$0 sm:$0xff] }
 0x2ef   : > { %1797 = vrot.lane.b32.xlu1 %v1716_v53, %s6187_s10  ;;  %5550 = vmatmul.mubr.msk.f32.gmra.mrb[74].mxu0 %vm2188_vm15, %v2172_v46  ;;  %v2005_v32 = vsel %vm1966_vm10, %v1963_v28, %v1044_v49  ;;  %v2462_v34 = vadd.f32 %v8563_v15, %v7969_v54  ;;  %v2447_v46 = vadd.f32 %v8563_v15, %v7681_v24 }
 0x2f0   : > { %2806 = vperm.xlu0 %6147, %v2719_v18   ;;  %5552 = vmatprep.mubr.msk.f32.mxu0 %vm6189_vm6, %v10383_v29  ;;  %v2457_v18 = vadd.f32 %v8563_v15, %v7854_v39  ;;  %v2452_v55 = vadd.f32 %v8563_v15, %v7744_v58  ;;  %v2467_v54 = vadd.f32 %v8563_v15, %v8085_v14 }
 0x2f1   : > { %v1380_v61 = vpop.permute.xlu1 %1379  ;;  %5700 = vmatpush1.bf16.msra.mxu0 %v5699_v7  ;;  %v2642_v49 = vmul.f32 0.1, %v2462_v34  ;;  %vm2601_vm4 = vcmp.gt.f32.partialorder %v2462_v34, 0.0  ;;  %v2639_v20 = vmul.f32 0.1, %v2447_v46  ;;  %vm2598_vm2 = vcmp.gt.f32.partialorder %v2447_v46, 0.0 }
 0x2f2   : > { %v1251_v47 = vpop.permute.xlu0 %1250  ;;  %v8547_v44 = vpop.f32.mrb[48].mxu0  ;;  %5701 = vmatprep.subr.bf16.mxu0 %v10384_v41  ;;  %v2641_v0 = vmul.f32 0.1, %v2457_v18  ;;  %vm2600_vm5 = vcmp.gt.f32.partialorder %v2457_v18, 0.0  ;;  %v2640_v39 = vmul.f32 0.1, %v2452_v55  ;;  %v2472_v24 = vadd.f32 %v8563_v15, %v8159_v23 }
 0x2f3   : > { %v2047_v62 = vsel %vm2008_vm11, %v2005_v32, %v1251_v47  ;;  %2811 = vperm.xlu1 %6148, %v2720_v19   ;;  %v5512_v2 = vpop.f32.mrb[49].mxu0  ;;  %v2683_v7 = vsel %vm2601_vm4, %v2462_v34, %v2642_v49  ;;  %vm2599_vm3 = vcmp.gt.f32.partialorder %v2452_v55, 0.0  ;;  %v2643_v47 = vmul.f32 0.1, %v2467_v54 }
 0x2f4   : > { %2946 = vperm.xlu0 %6147, %v2747_v48   ;;  %v2089_v8 = vsel %vm2050_vm12, %v2047_v62, %v1380_v61  ;;  %v2682_v61 = vsel %vm2600_vm5, %v2457_v18, %v2641_v0  ;;  %v2477_v14 = vadd.f32 %v8563_v15, %v8198_v43  ;;  %v2680_v2 = vsel %vm2598_vm2, %v2447_v46, %v2639_v20 }
 0x2f5   : > { %v1794_v37 = vpop.permute.xlu1 %1793  ;;  %v2681_v23 = vsel %vm2599_vm3, %v2452_v55, %v2640_v39  ;;  %vm2602_vm4 = vcmp.gt.f32.partialorder %v2467_v54, 0.0  ;;  %v2482_v43 = vadd.f32 %v8563_v15, %v8238_v22  ;;  %vm2603_vm2 = vcmp.gt.f32.partialorder %v2472_v24, 0.0  ;;  %v3768_v22 = vld [vmem:[%s10282_s3 + $0x210] sm:$0xff] }
 0x2f6   : > { %v1587_v60 = vpop.permute.xlu0 %1586  ;;  %v2645_v49 = vmul.f32 0.1, %v2477_v14  ;;  %v2684_v0 = vsel %vm2602_vm4, %v2467_v54, %v2643_v47  ;;  %vm2604_vm3 = vcmp.gt.f32.partialorder %v2477_v14, 0.0  ;;  %v2487_v54 = vadd.f32 %v8563_v15, %v8308_v52 }
 0x2f7   : > { %v2131_v53 = vsel %vm2092_vm13, %v2089_v8, %v1587_v60  ;;  %2951 = vperm.xlu1 %6148, %v2748_v40   ;;  %vm2605_vm5 = vcmp.gt.f32.partialorder %v2482_v43, 0.0 }
 0x2f8   : > { %v2173_v59 = vsel %vm2134_vm14, %v2131_v53, %v1794_v37  ;;  %v2644_v37 = vmul.f32 0.1, %v2472_v24  ;;  %v3766_v53 = vld [vmem:[%s10282_s3 + $0x200] sm:$0xff]  ;;  %vm2606_vm4 = vcmp.gt.f32.partialorder %v2487_v54, 0.0 }
 0x2f9   : > { %5553 = vmatmul.mubr.msk.f32.gmra.mrb[76].mxu0 %vm2188_vm15, %v2173_v59  ;;  %v3767_v59 = vld [vmem:[%s10282_s3 + $0x208] sm:$0xff] }
 0x2fa   : > { %5555 = vmatprep.mubr.msk.f32.mxu0 %vm6189_vm6, %v10383_v29  ;;  %v5750_v20 = vpack.c.bf16 %v3767_v59, %v3766_v53 }
 0x302   : > { %v8571_v3 = vpop.f32.mrb[50].mxu0 }
 0x303   : > { %v5515_v16 = vpop.f32.mrb[51].mxu0 }
 0x306   : > { %v2832_v19 = vpop.permute.xlu1 %2831 }
 0x307   : > { %v8579_v28 = vmul.f32 %v2832_v19, %v2683_v7  ;;  %v2827_v48 = vpop.permute.xlu0 %2826  ;;  %v2685_v7 = vsel %vm2603_vm2, %v2472_v24, %v2644_v37  ;;  %v2686_v37 = vsel %vm2604_vm3, %v2477_v14, %v2645_v49  ;;  %v3771_v14 = vld [vmem:[%s10282_s3 + $0x228] sm:$0xff]  ;;  %v2647_v49 = vmul.f32 0.1, %v2487_v54 }
 0x308   : > { %v8581_v58 = vmul.f32 %v2827_v48, %v2682_v61  ;;  %v3769_v61 = vld [vmem:[%s10282_s3 + $0x218] sm:$0xff]  ;;  %v2646_v48 = vmul.f32 0.1, %v2482_v43 }
 0x309   : > { %10391 = vst [vmem:[#allocation6_spill] sm:$0xff] %v8579_v28  ;;  %v3172_v32 = vrot.slane %v8579_v28, 2  ;;  %v5753_v52 = vpack.c.bf16 %v3769_v61, %v3768_v22 }
 0x30a   : > { %10392 = vst [vmem:[#allocation7_spill] sm:$0xff] %v8581_v58  ;;  %v2817_v62 = vpop.permute.xlu1 %2816  ;;  %v3170_v40 = vrot.slane %v8581_v58, 2 }
 0x30b   : > { %v8587_v8 = vmul.f32 %v2817_v62, %v2680_v2  ;;  %v2822_v60 = vpop.permute.xlu0 %2821 }
 0x30c   : > { %v8597_v34 = vmul.f32 %v2822_v60, %v2681_v23  ;;  %v3173_v18 = vsel %vm547_vm0, %v3170_v40, %v3172_v32 }
 0x30d   : > { %4227 = vmatprep.mubr.f32.mxu1 %v3173_v18  ;;  %v10304_v46 = vrot.slane %v8587_v8, 2 }
 0x30e   : > { %v2837_v55 = vpop.permute.xlu1 %2836  ;;  %v3168_v16 = vrot.slane %v8597_v34, 2 }
 0x30f   : > { %v8602_v19 = vmul.f32 %v2837_v55, %v2684_v0  ;;  %v2842_v39 = vpop.permute.xlu0 %2841 }
 0x310   : > { %v8612_v47 = vmul.f32 %v2842_v39, %v2685_v7  ;;  %v8617_v24 = vsel %vm547_vm0, %v10304_v46, %v3168_v16  ;;  %v3770_v7 = vld [vmem:[%s10282_s3 + $0x220] sm:$0xff]  ;;  %v2687_v39 = vsel %vm2605_vm5, %v2482_v43, %v2646_v48  ;;  %v8638_v22 = vsel %vm547_vm0, %v3168_v16, %v3170_v40  ;;  %v3772_v40 = vld [vmem:[%s10282_s3 + $0x230] sm:$0xff]  ;;  %v3773_v43 = vld [vmem:[%s10282_s3 + $0x238] sm:$0xff] }
 0x311   : > { %10393 = vst [vmem:[#allocation8_spill] sm:$0xff] %v8602_v19  ;;  %10395 = vst [vmem:[#allocation10_spill] sm:$0xff] %v8617_v24  ;;  %4228 = vmatmul.mubr.f32.vlgmr.msra.gmra.mrb[0].mxu1 %v8617_v24  ;;  %v3174_v62 = vrot.slane %v8602_v19, 2  ;;  %v2497_v48 = vadd.f32 %v8563_v15, %v8474_v5  ;;  %v3774_v5 = vld [vmem:[%s10282_s3 + $0x240] sm:$0xff] }
 0x312   : > { %10394 = vst [vmem:[#allocation9_spill] sm:$0xff] %v8612_v47  ;;  %v2847_v2 = vpop.permute.xlu1 %2846  ;;  %v8621_v23 = vpop.f32.mrb[52].mxu0  ;;  %v3176_v60 = vrot.slane %v8612_v47, 2  ;;  %5751 = vmatpush1.bf16.msra.mxu1 %v5750_v20  ;;  %v2492_v20 = vadd.f32 %v8563_v15, %v8394_v56  ;;  %10397 = vst [vmem:[#allocation12_spill] sm:$0xff] %v8638_v22 }
 0x313   : > { %v8624_v53 = vmul.f32 %v2847_v2, %v2686_v37  ;;  %v2852_v59 = vpop.permute.xlu0 %2851  ;;  %v5518_v55 = vpop.f32.mrb[53].mxu0  ;;  %v3175_v0 = vsel %vm547_vm0, %v3172_v32, %v3174_v62  ;;  %5752 = vmatprep.subr.bf16.mxu1 %v10384_v41  ;;  %vm2608_vm3 = vcmp.gt.f32.partialorder %v2497_v48, 0.0 }
 0x314   : > { %4232 = vmatprep.mubr.f32.mxu1 %v3175_v0  ;;  %v8640_v32 = vmul.f32 %v2852_v59, %v2687_v39  ;;  %v3177_v61 = vsel %vm547_vm0, %v3174_v62, %v3176_v60  ;;  %v5756_v55 = vpack.c.bf16 %v3771_v14, %v3770_v7  ;;  %v2648_v16 = vmul.f32 0.1, %v2492_v20 }
 0x315   : > { %10396 = vst [vmem:[#allocation11_spill] sm:$0xff] %v8624_v53  ;;  %4233 = vmatmul.mubr.f32.gmra.mrb[2].mxu1 %v8638_v22  ;;  %v3178_v2 = vrot.slane %v8624_v53, 2  ;;  %v2688_v62 = vsel %vm2606_vm4, %v2487_v54, %v2647_v49  ;;  %vm2607_vm2 = vcmp.gt.f32.partialorder %v2492_v20, 0.0  ;;  %v5759_v39 = vpack.c.bf16 %v3773_v43, %v3772_v40  ;;  %v3775_v54 = vld [vmem:[%s10282_s3 + $0x248] sm:$0xff] }
 0x316   : > { %10398 = vst [vmem:[#allocation13_spill] sm:$0xff] %v8640_v32  ;;  %v2857_v37 = vpop.permute.xlu1 %2856  ;;  %4237 = vmatprep.mubr.f32.mxu1 %v3177_v61  ;;  %5754 = vmatpush1.bf16.msra.mxu1 %v5753_v52  ;;  %v3180_v7 = vrot.slane %v8640_v32, 2  ;;  %v2689_v49 = vsel %vm2607_vm2, %v2492_v20, %v2648_v16  ;;  %v3777_v20 = vld [vmem:[%s10282_s3 + $0x258] sm:$0xff] }
 0x317   : > { %v2862_v56 = vpop.permute.xlu0 %2861  ;;  %5755 = vmatprep.subr.bf16.mxu1 %v10384_v41  ;;  %v8654_v59 = vmul.f32 %v2857_v37, %v2688_v62  ;;  %v3179_v52 = vsel %vm547_vm0, %v3176_v60, %v3178_v2  ;;  %v2502_v60 = vadd.f32 %v8563_v15, %v8547_v44  ;;  %v5762_v62 = vpack.c.bf16 %v3775_v54, %v3774_v5  ;;  %v3776_v44 = vld [vmem:[%s10282_s3 + $0x250] sm:$0xff] }
 0x318   : > { %v8667_v37 = vmul.f32 %v2862_v56, %v2689_v49  ;;  %v5765_v24 = vpack.c.bf16 %v3777_v20, %v3776_v44 }
 0x319   : > { %10399 = vst [vmem:[#allocation14_spill] sm:$0xff] %v8654_v59  ;;  %4238 = vmatmul.mubr.f32.gmra.mrb[4].mxu1 %v3173_v18  ;;  %v2649_v18 = vmul.f32 0.1, %v2497_v48  ;;  %v3182_v40 = vrot.slane %v8654_v59, 2  ;;  %vm2609_vm5 = vcmp.gt.f32.partialorder %v2502_v60, 0.0 }
 0x31a   : > { %v2867_v14 = vpop.permute.xlu1 %2866  ;;  %4242 = vmatprep.mubr.f32.mxu1 %v3179_v52  ;;  %5757 = vmatpush1.bf16.msra.mxu1 %v5756_v55  ;;  %10400 = vst [vmem:[#allocation15_spill] sm:$0xff] %v8667_v37  ;;  %v3181_v55 = vsel %vm547_vm0, %v3178_v2, %v3180_v7  ;;  %v2507_v2 = vadd.f32 %v8563_v15, %v8571_v3  ;;  %v3184_v5 = vrot.slane %v8667_v37, 2 }
 0x31b   : > { %v2872_v46 = vpop.permute.xlu0 %2871  ;;  %5758 = vmatprep.subr.bf16.mxu1 %v10384_v41  ;;  %v2690_v56 = vsel %vm2608_vm3, %v2497_v48, %v2649_v18  ;;  %v2512_v48 = vadd.f32 %v8563_v15, %v8621_v23 }
 0x31c   : > { %v8680_v16 = vmul.f32 %v2867_v14, %v2690_v56  ;;  %v2651_v3 = vmul.f32 0.1, %v2507_v2  ;;  %vm2610_vm4 = vcmp.gt.f32.partialorder %v2507_v2, 0.0  ;;  %v3781_v56 = vld [vmem:[%s10282_s3 + $0x278] sm:$0xff] }
 0x31d   : > { %4243 = vmatmul.mubr.f32.gmra.mrb[6].mxu1 %v3175_v0  ;;  %v2650_v0 = vmul.f32 0.1, %v2502_v60  ;;  %v2652_v23 = vmul.f32 0.1, %v2512_v48  ;;  %vm2611_vm2 = vcmp.gt.f32.partialorder %v2512_v48, 0.0 }
 0x31e   : > { %v2877_v43 = vpop.permute.xlu1 %2876  ;;  %4247 = vmatprep.mubr.f32.mxu1 %v3181_v55  ;;  %5760 = vmatpush1.bf16.msra.mxu1 %v5759_v39  ;;  %10401 = vst [vmem:[#allocation16_spill] sm:$0xff] %v8680_v16  ;;  %v3183_v39 = vsel %vm547_vm0, %v3180_v7, %v3182_v40  ;;  %v3185_v7 = vsel %vm547_vm0, %v3182_v40, %v3184_v5  ;;  %v3186_v18 = vrot.slane %v8680_v16, 2  ;;  %v3780_v40 = vld [vmem:[%s10282_s3 + $0x270] sm:$0xff] }
 0x31f   : > { %v2882_v22 = vpop.permute.xlu0 %2881  ;;  %5761 = vmatprep.subr.bf16.mxu1 %v10384_v41  ;;  %v2691_v14 = vsel %vm2609_vm5, %v2502_v60, %v2650_v0  ;;  %v2692_v60 = vsel %vm2610_vm4, %v2507_v2, %v2651_v3 }
 0x320   : > { %v3187_v20 = vsel %vm547_vm0, %v3184_v5, %v3186_v18 }
 0x321   : > { %4248 = vmatmul.mubr.f32.gmra.mrb[8].mxu1 %v3177_v61  ;;  %v8689_v61 = vmul.f32 %v2872_v46, %v2691_v14  ;;  %v3778_v46 = vld [vmem:[%s10282_s3 + $0x260] sm:$0xff] }
 0x322   : > { %v2887_v54 = vpop.permute.xlu1 %2886  ;;  %v2516_v49 = vpop.f32.mrb[54].mxu0  ;;  %4252 = vmatprep.mubr.f32.mxu1 %v3183_v39  ;;  %5763 = vmatpush1.bf16.msra.mxu1 %v5762_v62 }
 0x323   : > { %v8684_v59 = vpop.permute.xlu0 %2891  ;;  %v5521_v32 = vpop.f32.mrb[55].mxu0  ;;  %5764 = vmatprep.subr.bf16.mxu1 %v10384_v41  ;;  %10402 = vst [vmem:[#allocation17_spill] sm:$0xff] %v8689_v61  ;;  %v2517_v62 = vadd.f32 %v8563_v15, %v2516_v49  ;;  %v3188_v0 = vrot.slane %v8689_v61, 2 }
 0x325   : > { %4253 = vmatmul.mubr.f32.gmra.mrb[10].mxu1 %v3179_v52  ;;  %v3779_v52 = vld [vmem:[%s10282_s3 + $0x268] sm:$0xff]  ;;  %v2653_v49 = vmul.f32 0.1, %v2517_v62  ;;  %vm2612_vm3 = vcmp.gt.f32.partialorder %v2517_v62, 0.0 }
 0x326   : > { %v8694_v44 = vpop.permute.xlu1 %2896  ;;  %4257 = vmatprep.mubr.f32.mxu1 %v3185_v7  ;;  %5766 = vmatpush1.bf16.msra.mxu1 %v5765_v24  ;;  %v8708_v24 = vmul.f32 %v2877_v43, %v2692_v60  ;;  %v5768_v2 = vpack.c.bf16 %v3779_v52, %v3778_v46  ;;  %v5771_v43 = vpack.c.bf16 %v3781_v56, %v3780_v40  ;;  %v3782_v52 = vld [vmem:[%s10282_s3 + $0x280] sm:$0xff] }
 0x327   : > { %v8696_v32 = vpop.permute.xlu0 %2901  ;;  %5767 = vmatprep.subr.bf16.mxu1 %v10384_v41  ;;  %v3189_v60 = vsel %vm547_vm0, %v3186_v18, %v3188_v0  ;;  %v2694_v40 = vsel %vm2612_vm3, %v2517_v62, %v2653_v49 }
 0x328   : > { %10403 = vst [vmem:[#allocation18_spill] sm:$0xff] %v8708_v24  ;;  %v3190_v46 = vrot.slane %v8708_v24, 2 }
 0x329   : > { %4258 = vmatmul.mubr.f32.gmra.mrb[12].mxu1 %v3181_v55  ;;  %v2693_v55 = vsel %vm2611_vm2, %v2512_v48, %v2652_v23 }
 0x32a   : > { %v8715_v3 = vpop.permute.xlu1 %2906  ;;  %4262 = vmatprep.mubr.f32.mxu1 %v3187_v20  ;;  %5769 = vmatpush1.bf16.msra.mxu1 %v5768_v2  ;;  %v8721_v5 = vmul.f32 %v2882_v22, %v2693_v55  ;;  %v3783_v2 = vld [vmem:[%s10282_s3 + $0x288] sm:$0xff]  ;;  %v3191_v18 = vsel %vm547_vm0, %v3188_v0, %v3190_v46 }
 0x32b   : > { %v8717_v14 = vpop.permute.xlu0 %2911  ;;  %5770 = vmatprep.subr.bf16.mxu1 %v10384_v41  ;;  %v5774_v22 = vpack.c.bf16 %v3783_v2, %v3782_v52 }
 0x32c   : > { %10404 = vst [vmem:[#allocation19_spill] sm:$0xff] %v8721_v5  ;;  %v3192_v23 = vrot.slane %v8721_v5, 2 }
 0x32d   : > { %4263 = vmatmul.mubr.f32.gmra.mrb[14].mxu1 %v3183_v39  ;;  %v8736_v39 = vmul.f32 %v2887_v54, %v2694_v40 }
 0x32e   : > { %v8731_v56 = vpop.permute.xlu1 %2916  ;;  %4267 = vmatprep.mubr.f32.mxu1 %v3189_v60  ;;  %5772 = vmatpush1.bf16.msra.mxu1 %v5771_v43 }
 0x32f   : > { %v8733_v48 = vpop.permute.xlu0 %2921  ;;  %5773 = vmatprep.subr.bf16.mxu1 %v10384_v41  ;;  %10405 = vst [vmem:[#allocation20_spill] sm:$0xff] %v8736_v39  ;;  %v3194_v0 = vrot.slane %v8736_v39, 2 }
 0x331   : > { %4268 = vmatmul.mubr.f32.gmra.mrb[16].mxu1 %v3185_v7  ;;  %v3193_v7 = vsel %vm547_vm0, %v3190_v46, %v3192_v23  ;;  %v8762_v46 = vsel %vm547_vm0, %v3192_v23, %v3194_v0 }
 0x332   : > { %v8740_v55 = vpop.permute.xlu1 %2926  ;;  %v2521_v24 = vpop.f32.mrb[56].mxu0  ;;  %4272 = vmatprep.mubr.f32.mxu1 %v3191_v18  ;;  %5775 = vmatpush1.bf16.msra.mxu1 %v5774_v22  ;;  %v3786_v22 = vld [vmem:[%s10282_s3 + $0x2a0] sm:$0xff] }
 0x333   : > { %10406 = vst [vmem:[#allocation21_spill] sm:$0xff] %v8740_v55  ;;  %v2522_v62 = vadd.f32 %v8563_v15, %v2521_v24  ;;  %v8743_v49 = vpop.permute.xlu0 %2931  ;;  %v5524_v61 = vpop.f32.mrb[57].mxu0  ;;  %5776 = vmatprep.subr.bf16.mxu1 %v10384_v41 }
 0x334   : > { %10407 = vst [vmem:[#allocation22_spill] sm:$0xff] %v8743_v49  ;;  %v3784_v61 = vld [vmem:[%s10282_s3 + $0x290] sm:$0xff] }
 0x335   : > { %vm2613_vm5 = vcmp.gt.f32.partialorder %v2522_v62, 0.0  ;;  %v2654_v54 = vmul.f32 0.1, %v2522_v62  ;;  %4273 = vmatmul.mubr.f32.gmra.mrb[18].mxu1 %v3187_v20  ;;  %v3785_v20 = vld [vmem:[%s10282_s3 + $0x298] sm:$0xff] }
 0x336   : > { %v8748_v43 = vpop.permute.xlu1 %2936  ;;  %4277 = vmatprep.mubr.f32.mxu1 %v3193_v7  ;;  %v5777_v40 = vpack.c.bf16 %v3785_v20, %v3784_v61 }
 0x337   : > { %10408 = vst [vmem:[#allocation23_spill] sm:$0xff] %v8748_v43  ;;  %v2695_v52 = vsel %vm2613_vm5, %v2522_v62, %v2654_v54  ;;  %v8750_v2 = vpop.permute.xlu0 %2941 }
 0x338   : > { %10409 = vst [vmem:[#allocation24_spill] sm:$0xff] %v8750_v2  ;;  %v8753_v24 = vmul.f32 %v8684_v59, %v2695_v52  ;;  %v3787_v59 = vld [vmem:[%s10282_s3 + $0x2a8] sm:$0xff]  ;;  %5778 = vmatpush1.bf16.msra.mxu1 %v5777_v40 }
 0x339   : > { %4278 = vmatmul.mubr.f32.gmra.mrb[20].mxu1 %v3189_v60  ;;  %v2417_v60 = vadd.f32 %v8563_v15, %v7409_v6  ;;  %v5780_v52 = vpack.c.bf16 %v3787_v59, %v3786_v22  ;;  %5779 = vmatprep.subr.bf16.mxu1 %v10384_v41  ;;  %v3789_v6 = vld [vmem:[%s10282_s3 + $0x2b8] sm:$0xff] }
 0x33a   : > { %10410 = vst [vmem:[#allocation25_spill] sm:$0xff] %v8753_v24  ;;  %v8770_v62 = vpop.permute.xlu1 %2761  ;;  %4282 = vmatprep.mubr.f32.mxu1 %v8762_v46  ;;  %v3196_v54 = vrot.slane %v8753_v24, 2  ;;  %v3788_v24 = vld [vmem:[%s10282_s3 + $0x2b0] sm:$0xff] }
 0x33b   : > { %v8776_v23 = vpop.permute.xlu0 %2766  ;;  %v2633_v40 = vmul.f32 0.1, %v2417_v60  ;;  %vm2592_vm4 = vcmp.gt.f32.partialorder %v2417_v60, 0.0 }
 0x33c   : > { %v8779_v61 = vsel %vm547_vm0, %v3194_v0, %v3196_v54  ;;  %5781 = vmatpush1.bf16.msra.mxu1 %v5780_v52  ;;  %v5783_v0 = vpack.c.bf16 %v3789_v6, %v3788_v24  ;;  %v2382_v6 = vadd.f32 %v8563_v15, %v7094_v30  ;;  %v3792_v30 = vld [vmem:[%s10282_s3 + $0x2d0] sm:$0xff] }
 0x33d   : > { %4283 = vmatmul.mubr.f32.gmra.mrb[22].mxu1 %v3191_v18  ;;  %5782 = vmatprep.subr.bf16.mxu1 %v10384_v41  ;;  %v2674_v2 = vsel %vm2592_vm4, %v2417_v60, %v2633_v40 }
 0x33e   : > { %v8782_v20 = vpop.permute.xlu1 %2771  ;;  %4287 = vmatprep.mubr.f32.mxu1 %v8779_v61  ;;  %v2626_v40 = vmul.f32 0.1, %v2382_v6  ;;  %vm2585_vm5 = vcmp.gt.f32.partialorder %v2382_v6, 0.0 }
 0x33f   : > { %v8791_v22 = vpop.permute.xlu0 %2776 }
 0x340   : > { %5784 = vmatpush1.bf16.msra.mxu1 %v5783_v0 }
 0x341   : > { %4288 = vmatmul.mubr.f32.gmra.mrb[24].mxu1 %v3193_v7  ;;  %5785 = vmatprep.subr.bf16.mxu1 %v10384_v41  ;;  %v2392_v7 = vadd.f32 %v8563_v15, %v7184_v36  ;;  %v3793_v36 = vld [vmem:[%s10282_s3 + $0x2d8] sm:$0xff] }
 0x342   : > { %v8794_v18 = vpop.permute.xlu1 %2781  ;;  %v2526_v59 = vpop.f32.mrb[58].mxu0 }
 0x343   : > { %v2527_v39 = vadd.f32 %v8563_v15, %v2526_v59  ;;  %v2787_v5 = vpop.permute.xlu0 %2786  ;;  %v5527_v43 = vpop.f32.mrb[59].mxu0  ;;  %v2628_v0 = vmul.f32 0.1, %v2392_v7  ;;  %vm2587_vm3 = vcmp.gt.f32.partialorder %v2392_v7, 0.0 }
 0x344   : > { %v8797_v16 = vmul.f32 %v2787_v5, %v2674_v2  ;;  %v3790_v5 = vld [vmem:[%s10282_s3 + $0x2c0] sm:$0xff]  ;;  %v3791_v43 = vld [vmem:[%s10282_s3 + $0x2c8] sm:$0xff] }
 0x345   : > { %vm2614_vm2 = vcmp.gt.f32.partialorder %v2527_v39, 0.0  ;;  %v2655_v52 = vmul.f32 0.1, %v2527_v39  ;;  %v5786_v2 = vpack.c.bf16 %v3791_v43, %v3790_v5  ;;  %v6168_v43 = vld [vmem:[%s6241_s26 + $0x138] sm:$0xff] }
 0x346   : > { %v503_v24 = vpop.permute.xlu1 %502 }
 0x347   : > { %v2696_v37 = vsel %vm2614_vm2, %v2527_v39, %v2655_v52  ;;  %v710_v49 = vpop.permute.xlu0 %709  ;;  %5787 = vmatpush1.bf16.msra.mxu1 %v5786_v2  ;;  %v5789_v52 = vpack.c.bf16 %v3793_v36, %v3792_v30  ;;  %v1880_v53 = vsel %vm1840_vm7, %v6168_v43, %v503_v24  ;;  %v2669_v2 = vsel %vm2587_vm3, %v2392_v7, %v2628_v0 }
 0x348   : > { %v8805_v60 = vmul.f32 %v8694_v44, %v2696_v37  ;;  %v2387_v37 = vadd.f32 %v8563_v15, %v7139_v63  ;;  %5788 = vmatprep.subr.bf16.mxu1 %v10384_v41  ;;  %v2667_v30 = vsel %vm2585_vm5, %v2382_v6, %v2626_v40  ;;  %v1922_v19 = vsel %vm1882_vm8, %v1880_v53, %v710_v49  ;;  %v3795_v6 = vld [vmem:[%s10282_s3 + $0x2e8] sm:$0xff] }
 0x34a   : > { %v839_v44 = vpop.permute.xlu1 %838  ;;  %v10329_v39 = vrot.slane %v8805_v60, 2  ;;  %v2627_v63 = vmul.f32 0.1, %v2387_v37  ;;  %vm2586_vm4 = vcmp.gt.f32.partialorder %v2387_v37, 0.0 }
 0x34b   : > { %v8822_v59 = vpop.permute.xlu0 %2791  ;;  %5790 = vmatpush1.bf16.msra.mxu1 %v5789_v52  ;;  %v1964_v53 = vsel %vm1924_vm9, %v1922_v19, %v839_v44 }
 0x34c   : > { %v8827_v5 = vsel %vm547_vm0, %v3196_v54, %v10329_v39  ;;  %v8835_v54 = vmul.f32 %v8770_v62, %v2669_v2  ;;  %5791 = vmatprep.subr.bf16.mxu1 %v10384_v41  ;;  %v2668_v55 = vsel %vm2586_vm4, %v2387_v37, %v2627_v63 }
 0x34d   : > { %4292 = vmatprep.mubr.f32.mxu1 %v8827_v5 }
 0x34e   : > { %v1046_v47 = vpop.permute.xlu1 %1045  ;;  %4293 = vmatmul.mubr.f32.gmra.mrb[26].mxu1 %v8762_v46  ;;  %v3794_v46 = vld [vmem:[%s10282_s3 + $0x2e0] sm:$0xff]  ;;  %v10334_v37 = vrot.slane %v8835_v54, 1 }
 0x34f   : > { %v2752_v36 = vpop.permute.xlu0 %2751  ;;  %v5792_v52 = vpack.c.bf16 %v3795_v6, %v3794_v46  ;;  %v3797_v46 = vld [vmem:[%s10282_s3 + $0x2f8] sm:$0xff]  ;;  %v10337_v6 = vrot.slane %v8835_v54, 2 }
 0x350   : > { %v8837_v39 = vmul.f32 %v2752_v36, %v2667_v30 }
 0x351   : > { %5793 = vmatpush1.bf16.msra.mxu1 %v5792_v52 }
 0x352   : > { %v2757_v28 = vpop.permute.xlu1 %2756  ;;  %v2531_v24 = vpop.f32.mrb[60].mxu0  ;;  %v3032_v49 = vrot.slane %v8837_v39, 1  ;;  %5794 = vmatprep.subr.bf16.mxu1 %v10384_v41 }
 0x353   : > { %v8847_v7 = vmul.f32 %v2757_v28, %v2668_v55  ;;  %v2532_v62 = vadd.f32 %v8563_v15, %v2531_v24  ;;  %v505_v40 = vpop.permute.xlu0 %504  ;;  %v5530_v0 = vpop.f32.mrb[61].mxu0  ;;  %v3141_v28 = vrot.slane %v8837_v39, 2  ;;  %v3796_v24 = vld [vmem:[%s10282_s3 + $0x2f0] sm:$0xff] }
 0x354   : > { %v5795_v52 = vpack.c.bf16 %v3797_v46, %v3796_v24  ;;  %v2427_v24 = vadd.f32 %v8563_v15, %v7499_v26 }
 0x355   : > { %v3033_v63 = vrot.slane %v8847_v7, 1  ;;  %v3142_v43 = vrot.slane %v8847_v7, 2  ;;  %vm2615_vm2 = vcmp.gt.f32.partialorder %v2532_v62, 0.0  ;;  %v2656_v2 = vmul.f32 0.1, %v2532_v62 }
 0x356   : > { %v1253_v55 = vpop.permute.xlu1 %1252  ;;  %5796 = vmatpush1.bf16.msra.mxu1 %v5795_v52  ;;  %v2635_v26 = vmul.f32 0.1, %v2427_v24 }
 0x357   : > { %v2697_v30 = vsel %vm2615_vm2, %v2532_v62, %v2656_v2  ;;  %v712_v36 = vpop.permute.xlu0 %711  ;;  %v8858_v19 = vsel %vm340_vm1, %v3032_v49, %v3033_v63  ;;  %v8863_v44 = vsel %vm340_vm1, %v3033_v63, %v10334_v37  ;;  %v2006_v62 = vsel %vm1966_vm10, %v1964_v53, %v1046_v47  ;;  %v6169_v47 = vld [vmem:[%s6241_s26 + $0x140] sm:$0xff]  ;;  %5797 = vmatprep.subr.bf16.mxu1 %v10384_v41 }
 0x358   : > { %v8874_v0 = vmul.f32 %v8696_v32, %v2697_v30  ;;  %v8877_v49 = vsel %vm547_vm0, %v3141_v28, %v3142_v43  ;;  %v8882_v63 = vsel %vm547_vm0, %v3142_v43, %v10337_v6  ;;  %v2397_v2 = vadd.f32 %v8563_v15, %v7229_v42 }
 0x359   : > { %10411 = vst [vmem:[#allocation26_spill] sm:$0xff] %v8877_v49  ;;  %10412 = vst [vmem:[#allocation27_spill] sm:$0xff] %v8882_v63  ;;  %v1881_v32 = vsel %vm1840_vm7, %v6169_v47, %v505_v40  ;;  %v2048_v53 = vsel %vm2008_vm11, %v2006_v62, %v1253_v55  ;;  %v10413_v43 = vrot.slane %v8805_v60, 2  ;;  %v2402_v62 = vadd.f32 %v8563_v15, %v7274_v17 }
 0x35a   : > { %v1382_v37 = vpop.permute.xlu1 %1381  ;;  %v10338_v58 = vrot.slane %v8874_v0, 2  ;;  %v2629_v42 = vmul.f32 0.1, %v2397_v2  ;;  %v1923_v40 = vsel %vm1882_vm8, %v1881_v32, %v712_v36  ;;  %vm2588_vm7 = vcmp.gt.f32.partialorder %v2397_v2, 0.0 }
 0x35b   : > { %v841_v30 = vpop.permute.xlu0 %840  ;;  %v2090_v55 = vsel %vm2050_vm12, %v2048_v53, %v1382_v37  ;;  %v2407_v47 = vadd.f32 %v8563_v15, %v7319_v51  ;;  %v2432_v36 = vadd.f32 %v8563_v15, %v7544_v50  ;;  %v2437_v37 = vadd.f32 %v8563_v15, %v7589_v38 }
 0x35c   : > { %v8896_v28 = vsel %vm547_vm0, %v10413_v43, %v10338_v58  ;;  %v1965_v43 = vsel %vm1924_vm9, %v1923_v40, %v841_v30  ;;  %v2630_v17 = vmul.f32 0.1, %v2402_v62  ;;  %v2442_v58 = vadd.f32 %v8563_v15, %v7634_v25 }
 0x35d   : > { %4297 = vmatprep.mubr.f32.mxu1 %v8896_v28  ;;  %vm2594_vm8 = vcmp.gt.f32.partialorder %v2427_v24, 0.0  ;;  %vm2589_vm9 = vcmp.gt.f32.partialorder %v2402_v62, 0.0  ;;  %v8921_v38 = vadd.f32 %v8563_v15, %v7364_v27  ;;  %vm2590_vm3 = vcmp.gt.f32.partialorder %v2407_v47, 0.0 }
 0x35e   : > { %v1589_v46 = vpop.permute.xlu1 %1588  ;;  %4298 = vmatmul.mubr.f32.gmra.mrb[28].mxu1 %v8779_v61  ;;  %v2670_v61 = vsel %vm2588_vm7, %v2397_v2, %v2629_v42  ;;  %v2636_v25 = vmul.f32 0.1, %v2432_v36  ;;  %v2637_v42 = vmul.f32 0.1, %v2437_v37  ;;  %vm2595_vm4 = vcmp.gt.f32.partialorder %v2432_v36, 0.0 }
 0x35f   : > { %v2797_v52 = vpop.permute.xlu0 %2796  ;;  %v2132_v6 = vsel %vm2092_vm13, %v2090_v55, %v1589_v46  ;;  %v2631_v55 = vmul.f32 0.1, %v2407_v47  ;;  %vm2597_vm2 = vcmp.gt.f32.partialorder %v2442_v58, 0.0 }
 0x362   : > { %v1048_v32 = vpop.permute.xlu1 %1047  ;;  %v2536_v53 = vpop.f32.mrb[62].mxu0 }
 0x363   : > { %v2537_v51 = vadd.f32 %v8563_v15, %v2536_v53  ;;  %v1796_v30 = vpop.permute.xlu0 %1795  ;;  %v5533_v40 = vpop.f32.mrb[63].mxu0  ;;  %v2007_v46 = vsel %vm1966_vm10, %v1965_v43, %v1048_v32  ;;  %v2676_v53 = vsel %vm2594_vm8, %v2427_v24, %v2635_v26  ;;  %v2638_v43 = vmul.f32 0.1, %v2442_v58 }
 0x364   : > { %v2174_v50 = vsel %vm2134_vm14, %v2132_v6, %v1796_v30  ;;  %v8927_v6 = vmul.f32 %v8776_v23, %v2670_v61  ;;  %v8930_v40 = vmul.f32 %v2797_v52, %v2676_v53  ;;  %vm2596_vm10 = vcmp.gt.f32.partialorder %v2437_v37, 0.0 }
 0x365   : > { %vm2616_vm5 = vcmp.gt.f32.partialorder %v2537_v51, 0.0  ;;  %v2657_v2 = vmul.f32 0.1, %v2537_v51  ;;  %5556 = vmatmul.mubr.msk.f32.gmra.mrb[78].mxu0 %vm2188_vm15, %v2174_v50  ;;  %v8937_v26 = vmul.f32 0.1, %v8921_v38  ;;  %v2672_v23 = vsel %vm2590_vm3, %v2407_v47, %v2631_v55 }
 0x366   : > { %v1255_v63 = vpop.permute.xlu1 %1254  ;;  %5558 = vmatprep.mubr.msk.f32.mxu0 %vm6189_vm6, %v10383_v29  ;;  %v2671_v29 = vsel %vm2589_vm9, %v2402_v62, %v2630_v17  ;;  %v2677_v52 = vsel %vm2595_vm4, %v2432_v36, %v2636_v25  ;;  %v10414_v62 = vrot.slane %v8874_v0, 2  ;;  %v10342_v17 = vrot.slane %v8930_v40, 1 }
 0x367   : > { %v2698_v32 = vsel %vm2616_vm5, %v2537_v51, %v2657_v2  ;;  %v2049_v27 = vsel %vm2008_vm11, %v2007_v46, %v1255_v63  ;;  %v1384_v30 = vpop.permute.xlu0 %1383  ;;  %v2678_v46 = vsel %vm2596_vm10, %v2437_v37, %v2637_v42  ;;  %v10341_v36 = vrot.slane %v8930_v40, 4 }
 0x368   : > { %v8933_v50 = vmul.f32 %v8715_v3, %v2698_v32  ;;  %v2091_v24 = vsel %vm2050_vm12, %v2049_v27, %v1384_v30  ;;  %v2679_v3 = vsel %vm2597_vm2, %v2442_v58, %v2638_v43  ;;  %v10340_v58 = vrot.slane %v8930_v40, 3 }
 0x369   : > { %v10343_v37 = vrot.slane %v8930_v40, 2  ;;  %v10344_v55 = vrot.slane %v8930_v40, 6  ;;  %v10346_v30 = vrot.slane %v8930_v40, 5  ;;  %vm2591_vm6 = vcmp.gt.f32.partialorder %v8921_v38, 0.0 }
 0x36a   : > { %v1591_v61 = vpop.permute.xlu1 %1590  ;;  %v10339_v63 = vrot.slane %v8933_v50, 2  ;;  %vm10415_vm11 = vcmask 1043456   ;;  %vm10417_vm12 = vcmask 1044480   ;;  %v9012_v2 = vmul.f32 %v8791_v22, %v2672_v23 }
 0x36b   : > { %v2802_v51 = vpop.permute.xlu0 %2801  ;;  %v2133_v53 = vsel %vm2092_vm13, %v2091_v24, %v1591_v61  ;;  %vm10420_vm13 = vcmask 1041408   ;;  %vm10426_vm7 = vmmov %vm10417_vm12 }
 0x36c   : > { %v8945_v32 = vmul.f32 %v2802_v51, %v2677_v52  ;;  %v8952_v47 = vsel %vm547_vm0, %v10414_v62, %v10339_v63  ;;  %vm10427_vm9 = vmmov %vm10420_vm13 }
 0x36d   : > { %4302 = vmatprep.mubr.f32.mxu1 %v8952_v47  ;;  %vm10430_vm3 = vmmov %vm10415_vm11 }
 0x36e   : > { %v1798_v25 = vpop.permute.xlu1 %1797  ;;  %4303 = vmatmul.mubr.f32.gmra.mrb[30].mxu1 %v8827_v5  ;;  %v3051_v42 = vrot.slane %v8945_v32, 1  ;;  %v3382_v43 = vrot.slane %v8945_v32, 4  ;;  %v3273_v27 = vrot.slane %v8945_v32, 3  ;;  %v3160_v52 = vrot.slane %v8945_v32, 2  ;;  %vm10432_vm5 = vmmov %vm10426_vm7 }
 0x36f   : > { %v2175_v24 = vsel %vm2134_vm14, %v2133_v53, %v1798_v25  ;;  %v2807_v61 = vpop.permute.xlu0 %2806  ;;  %v3604_v51 = vrot.slane %v8945_v32, 6  ;;  %v3495_v62 = vrot.slane %v8945_v32, 5  ;;  %vm10422_vm14 = vcmask 1042432   ;;  %vm10433_vm4 = vmmov %vm10427_vm9 }
 0x370   : > { %v8970_v5 = vmul.f32 %v2807_v61, %v2678_v46  ;;  %5559 = vmatmul.mubr.msk.f32.gmra.mrb[80].mxu0 %vm2188_vm15, %v2175_v24  ;;  %v8976_v63 = vsel %vm340_vm1, %v10342_v17, %v3051_v42  ;;  %v8981_v53 = vsel %vm10415_vm11, %v10341_v36, %v3382_v43  ;;  %v8986_v25 = vsel %vm10417_vm12, %v10340_v58, %v3273_v27  ;;  %vm10424_vm15 = vmmov %vm10415_vm11 }
 0x371   : > { %10416 = vst [vmem:[#allocation28_spill] sm:$0xff] %v8981_v53  ;;  %10418 = vst [vmem:[#allocation29_spill] sm:$0xff] %v8986_v25  ;;  %v8989_v46 = vmul.f32 %v8782_v20, %v2671_v29  ;;  %3917 = vmatprep.mubr.f32.mxu0 %v8858_v19  ;;  %v8995_v24 = vsel %vm547_vm0, %v10343_v37, %v3160_v52  ;;  %v9000_v61 = vsel %vm10420_vm13, %v10344_v55, %v3604_v51 }
 0x372   : > { %10419 = vst [vmem:[#allocation30_spill] sm:$0xff] %v8995_v24  ;;  %10421 = vst [vmem:[#allocation31_spill] sm:$0xff] %v9000_v61  ;;  %v9005_v58 = vsel %vm10422_vm14, %v10346_v30, %v3495_v62  ;;  %v2812_v36 = vpop.permute.xlu1 %2811  ;;  %v2541_v20 = vpop.f32.mrb[64].mxu0  ;;  %v3053_v29 = vrot.slane %v8970_v5, 1  ;;  %v3384_v19 = vrot.slane %v8970_v5, 4  ;;  %v3275_v17 = vrot.slane %v8970_v5, 3 }
 0x373   : > { %10423 = vst [vmem:[#allocation32_spill] sm:$0xff] %v9005_v58  ;;  %v3162_v37 = vrot.slane %v8970_v5, 2  ;;  %v9014_v55 = vmul.f32 %v2812_v36, %v2679_v3  ;;  %v2542_v61 = vadd.f32 %v8563_v15, %v2541_v20  ;;  %v5536_v24 = vpop.f32.mrb[65].mxu0  ;;  %v3606_v30 = vrot.slane %v8970_v5, 6  ;;  %vm10434_vm10 = vmmov %vm10422_vm14 }
 0x374   : > { %3918 = vmatmul.mubr.f32.vlgmr.msra.gmra.mrb[82].mxu0 %v8837_v39  ;;  %v9020_v58 = vsel %vm340_vm1, %v3051_v42, %v3053_v29  ;;  %v9023_v49 = vsel %vm10424_vm15, %v3382_v43, %v3384_v19  ;;  %v9026_v25 = vsel %vm10426_vm7, %v3273_v27, %v3275_v17  ;;  %v10428_v36 = vrot.slane %v8927_v6, 1  ;;  %vm10438_vm2 = vmmov %vm10434_vm10 }
 0x375   : > { %10425 = vst [vmem:[#allocation33_spill] sm:$0xff] %v9023_v49  ;;  %v9029_v22 = vsel %vm547_vm0, %v3160_v52, %v3162_v37  ;;  %vm2617_vm8 = vcmp.gt.f32.partialorder %v2542_v61, 0.0  ;;  %v2658_v23 = vmul.f32 0.1, %v2542_v61  ;;  %3922 = vmatprep.mubr.f32.mxu0 %v8863_v44  ;;  %v3055_v3 = vrot.slane %v9014_v55, 1  ;;  %5703 = vmatpush1.bf16.msra.mxu0 %v7739_v9  ;;  %vm10460_vm7 = vmmov %vm10430_vm3 }
 0x376   : > { %v9035_v39 = vsel %vm10427_vm9, %v3604_v51, %v3606_v30  ;;  %v10429_v42 = vrot.slane %v8835_v54, 1  ;;  %5704 = vmatprep.subr.bf16.mxu0 %v10384_v41  ;;  %v10351_v27 = vrot.slane %v9014_v55, 4  ;;  %v10350_v52 = vrot.slane %v9014_v55, 3  ;;  %vm10465_vm9 = vmmov %vm10433_vm4 }
 0x377   : > { %v10348_v44 = vrot.slane %v9014_v55, 2  ;;  %v2699_v24 = vsel %vm2617_vm8, %v2542_v61, %v2658_v23  ;;  %v9049_v9 = vsel %vm340_vm1, %v3053_v29, %v3055_v3  ;;  %v10347_v51 = vrot.slane %v9014_v55, 6  ;;  %vm10462_vm8 = vmmov %vm10432_vm5 }
 0x378   : > { %v3038_v43 = vsel %vm340_vm1, %v10429_v42, %v10428_v36  ;;  %v3497_v20 = vrot.slane %v8970_v5, 5  ;;  %v9054_v36 = vmul.f32 %v8717_v14, %v2699_v24  ;;  %3923 = vmatmul.mubr.f32.gmra.mrb[84].mxu0 %v8847_v7  ;;  %v3039_v42 = vrot.slane %v8989_v46, 1 }
 0x379   : > { %v9061_v61 = vsel %vm10430_vm3, %v3384_v19, %v10351_v27  ;;  %v9066_v29 = vsel %vm10432_vm5, %v3275_v17, %v10350_v52  ;;  %3927 = vmatprep.mubr.f32.mxu0 %v3038_v43  ;;  %5706 = vmatpush1.bf16.msra.mxu0 %v7762_v21  ;;  %v9072_v14 = vsel %vm547_vm0, %v3162_v37, %v10348_v44  ;;  %v10349_v7 = vrot.slane %v9014_v55, 5  ;;  %vm10468_vm3 = vmmov %vm10438_vm2 }
 0x37a   : > { %10431 = vst [vmem:[#allocation34_spill] sm:$0xff] %v9061_v61  ;;  %v3204_v23 = vrot.slane %v9054_v36, 2  ;;  %5707 = vmatprep.subr.bf16.mxu0 %v10384_v41  ;;  %v9080_v19 = vsel %vm10433_vm4, %v3606_v30, %v10347_v51  ;;  %v2422_v17 = vadd.f32 %v8563_v15, %v7454_v35  ;;  %v2673_v21 = vsel %vm2591_vm6, %v8921_v38, %v8937_v26  ;;  %vm10473_vm4 = vmmov %vm10462_vm8 }
 0x37b   : > { %v3041_v37 = vrot.slane %v9012_v2, 1  ;;  %v9090_v43 = vsel %vm10434_vm10, %v3495_v62, %v3497_v20  ;;  %v9093_v24 = vmul.f32 %v8794_v18, %v2673_v21  ;;  %v10436_v30 = vrot.slane %v8927_v6, 1  ;;  %vm10475_vm10 = vmmov %vm10465_vm9 }
 0x37c   : > { %10435 = vst [vmem:[#allocation35_spill] sm:$0xff] %v9090_v43  ;;  %3928 = vmatmul.mubr.f32.gmra.mrb[86].mxu0 %v8835_v54  ;;  %v10437_v35 = vrot.slane %v8933_v50, 2  ;;  %v9107_v38 = vsel %vm10438_vm2, %v3497_v20, %v10349_v7  ;;  %v2634_v18 = vmul.f32 0.1, %v2422_v17  ;;  %vm2593_vm6 = vcmp.gt.f32.partialorder %v2422_v17, 0.0 }
 0x37d   : > { %v3040_v51 = vsel %vm340_vm1, %v10436_v30, %v3039_v42  ;;  %10439 = vst [vmem:[#allocation36_spill] sm:$0xff] %v9107_v38  ;;  %5709 = vmatpush1.bf16.msra.mxu0 %v7792_v33  ;;  %v3042_v26 = vsel %vm340_vm1, %v3039_v42, %v3041_v37  ;;  %v3043_v62 = vrot.slane %v9093_v24, 1  ;;  %v3045_v42 = vrot.slane %v8797_v16, 1 }
 0x37e   : > { %v9102_v44 = vsel %vm547_vm0, %v10437_v35, %v3204_v23  ;;  %3932 = vmatprep.mubr.f32.mxu0 %v3040_v51  ;;  %5710 = vmatprep.subr.bf16.mxu0 %v10384_v41  ;;  %v2675_v51 = vsel %vm2593_vm6, %v2422_v17, %v2634_v18  ;;  %vm10478_vm6 = vmmov %vm10460_vm7 }
 0x37f   : > { %4307 = vmatprep.mubr.f32.mxu1 %v9102_v44  ;;  %v9120_v33 = vmul.f32 %v8822_v59, %v2675_v51  ;;  %v3044_v30 = vsel %vm340_vm1, %v3041_v37, %v3043_v62  ;;  %v3046_v59 = vsel %vm340_vm1, %v3043_v62, %v3045_v42 }
 0x380   : > { %4308 = vmatmul.mubr.f32.gmra.mrb[32].mxu1 %v8896_v28  ;;  %3933 = vmatmul.mubr.f32.gmra.mrb[88].mxu0 %v8927_v6 }
 0x381   : > { %3937 = vmatprep.mubr.f32.mxu0 %v3042_v26  ;;  %5712 = vmatpush1.bf16.msra.mxu0 %v7818_v57  ;;  %v3047_v17 = vrot.slane %v9120_v33, 1 }
 0x382   : > { %v2546_v20 = vpop.f32.mrb[66].mxu0  ;;  %5713 = vmatprep.subr.bf16.mxu0 %v10384_v41 }
 0x383   : > { %v2547_v21 = vadd.f32 %v8563_v15, %v2546_v20  ;;  %v5539_v28 = vpop.f32.mrb[67].mxu0 }
 0x384   : > { %3938 = vmatmul.mubr.f32.gmra.mrb[90].mxu0 %v8989_v46 }
 0x385   : > { %vm2618_vm11 = vcmp.gt.f32.partialorder %v2547_v21, 0.0  ;;  %v2659_v35 = vmul.f32 0.1, %v2547_v21  ;;  %3942 = vmatprep.mubr.f32.mxu0 %v3044_v30  ;;  %5715 = vmatpush1.bf16.msra.mxu0 %v7848_v12  ;;  %v3048_v12 = vsel %vm340_vm1, %v3045_v42, %v3047_v17 }
 0x386   : > { %5716 = vmatprep.subr.bf16.mxu0 %v10384_v41 }
 0x387   : > { %v2700_v57 = vsel %vm2618_vm11, %v2547_v21, %v2659_v35  ;;  %v10442_v21 = vld [vmem:[#allocation2_spill] sm:$0xff]  ;;  %vm10480_vm11 = vmmov %vm10473_vm4 }
 0x388   : > { %v9128_v15 = vmul.f32 %v8731_v56, %v2700_v57  ;;  %3943 = vmatmul.mubr.f32.gmra.mrb[92].mxu0 %v9012_v2  ;;  %v10444_v35 = vld [vmem:[#allocation6_spill] sm:$0xff] }
 0x389   : > { %3947 = vmatprep.mubr.f32.mxu0 %v3046_v59  ;;  %5718 = vmatpush1.bf16.msra.mxu0 %v7874_v1  ;;  %v10440_v1 = vrot.slane %v8930_v40, 1  ;;  %v3063_v57 = vrot.slane %v10444_v35, 1 }
 0x38a   : > { %v3206_v37 = vrot.slane %v9128_v15, 2  ;;  %5719 = vmatprep.subr.bf16.mxu0 %v10384_v41 }
 0x38b   : > { %v3050_v18 = vsel %vm340_vm1, %v3047_v17, %v10440_v1  ;;  %v10445_v17 = vld [vmem:[#allocation3_spill] sm:$0xff]  ;;  %v10446_v1 = vld [vmem:[#allocation8_spill] sm:$0xff] }
 0x38c   : > { %3948 = vmatmul.mubr.f32.gmra.mrb[94].mxu0 %v9093_v24  ;;  %v9139_v56 = vsel %vm547_vm0, %v3204_v23, %v3206_v37  ;;  %v9153_v23 = vld [vmem:[%s10281_s2] ss:$0 sm:$0xff] }
 0x38d   : > { %3952 = vmatprep.mubr.f32.mxu0 %v3048_v12  ;;  %4312 = vmatprep.mubr.f32.mxu1 %v9139_v56 }
 0x38e   : > { %4313 = vmatmul.mubr.f32.gmra.mrb[34].mxu1 %v8952_v47  ;;  %5721 = vmatpush1.bf16.msra.mxu0 %v7907_v13 }
 0x38f   : > { %5722 = vmatprep.subr.bf16.mxu0 %v10384_v41 }
 0x390   : > { %3953 = vmatmul.mubr.f32.gmra.mrb[96].mxu0 %v8797_v16 }
 0x391   : > { %3957 = vmatprep.mubr.f32.mxu0 %v3050_v18  ;;  %v3065_v18 = vrot.slane %v10446_v1, 1 }
 0x392   : > { %v2551_v26 = vpop.f32.mrb[68].mxu0  ;;  %5724 = vmatpush1.bf16.msra.mxu0 %v7933_v10 }
 0x393   : > { %v2552_v47 = vadd.f32 %v9153_v23, %v2551_v26  ;;  %v5542_v13 = vpop.f32.mrb[69].mxu0  ;;  %5725 = vmatprep.subr.bf16.mxu0 %v10384_v41  ;;  %v3830_v26 = vld [vmem:[%s10282_s3 + $0x400] sm:$0xff] }
 0x394   : > { %3958 = vmatmul.mubr.f32.gmra.mrb[98].mxu0 %v9120_v33  ;;  %v10447_v13 = vld [vmem:[#allocation4_spill] sm:$0xff] }
 0x395   : > { %vm2619_vm12 = vcmp.gt.f32.partialorder %v2552_v47, 0.0  ;;  %v2660_v62 = vmul.f32 0.1, %v2552_v47  ;;  %3962 = vmatprep.mubr.f32.mxu0 %v8976_v63  ;;  %v3059_v63 = vrot.slane %v8597_v34, 1 }
 0x396   : > { %5727 = vmatpush1.bf16.msra.mxu0 %v7963_v45 }
 0x397   : > { %v2701_v20 = vsel %vm2619_vm12, %v2552_v47, %v2660_v62  ;;  %5728 = vmatprep.subr.bf16.mxu0 %v10384_v41  ;;  %v3831_v47 = vld [vmem:[%s10282_s3 + $0x408] sm:$0xff]  ;;  %vm10481_vm12 = vmmov %vm10478_vm6 }
 0x398   : > { %v9162_v10 = vmul.f32 %v8733_v48, %v2701_v20  ;;  %3963 = vmatmul.mubr.f32.gmra.mrb[100].mxu0 %v8930_v40  ;;  %v3057_v48 = vrot.slane %v8587_v8, 1  ;;  %v9217_v62 = vpack.c.bf16 %v3831_v47, %v3830_v26  ;;  %v3066_v20 = vsel %vm340_vm1, %v3063_v57, %v3065_v18  ;;  %v10453_v26 = vld [vmem:[#allocation14_spill] sm:$0xff] }
 0x399   : > { %3967 = vmatprep.mubr.f32.mxu0 %v9020_v58  ;;  %v3073_v47 = vrot.slane %v10453_v26, 1 }
 0x39a   : > { %v3208_v51 = vrot.slane %v9162_v10, 2  ;;  %5730 = vmatpush1.bf16.msra.mxu0 %v7989_v31  ;;  %v3058_v31 = vsel %vm340_vm1, %v3055_v3, %v3057_v48 }
 0x39b   : > { %5731 = vmatprep.subr.bf16.mxu0 %v10384_v41 }
 0x39c   : > { %3968 = vmatmul.mubr.f32.gmra.mrb[102].mxu0 %v8945_v32  ;;  %v9171_v45 = vsel %vm547_vm0, %v3206_v37, %v3208_v51 }
 0x39d   : > { %3972 = vmatprep.mubr.f32.mxu0 %v9049_v9  ;;  %4317 = vmatprep.mubr.f32.mxu1 %v9171_v45  ;;  %v10441_v9 = vld [vmem:[#allocation7_spill] sm:$0xff] }
 0x39e   : > { %4318 = vmatmul.mubr.f32.gmra.mrb[36].mxu1 %v9102_v44  ;;  %5733 = vmatpush1.bf16.msra.mxu0 %v8024_v11  ;;  %v3060_v11 = vsel %vm340_vm1, %v3057_v48, %v3059_v63  ;;  %v3061_v3 = vrot.slane %v10441_v9, 1 }
 0x39f   : > { %5734 = vmatprep.subr.bf16.mxu0 %v10384_v41 }
 0x3a0   : > { %3973 = vmatmul.mubr.f32.gmra.mrb[104].mxu0 %v8970_v5  ;;  %v3062_v42 = vsel %vm340_vm1, %v3059_v63, %v3061_v3  ;;  %v3064_v37 = vsel %vm340_vm1, %v3061_v3, %v3063_v57  ;;  %v10449_v63 = vld [vmem:[#allocation5_spill] sm:$0xff] }
 0x3a1   : > { %3977 = vmatprep.mubr.f32.mxu0 %v3058_v31 }
 0x3a2   : > { %v2556_v32 = vpop.f32.mrb[70].mxu0  ;;  %5736 = vmatpush1.bf16.msra.mxu0 %v8040_v4  ;;  %v10443_v4 = vld [vmem:[#allocation21_spill] sm:$0xff] }
 0x3a3   : > { %v2557_v58 = vadd.f32 %v9153_v23, %v2556_v32  ;;  %v5545_v44 = vpop.f32.mrb[71].mxu0  ;;  %5737 = vmatprep.subr.bf16.mxu0 %v10384_v41 }
 0x3a4   : > { %3978 = vmatmul.mubr.f32.gmra.mrb[106].mxu0 %v9014_v55  ;;  %v10450_v44 = vld [vmem:[#allocation11_spill] sm:$0xff] }
 0x3a5   : > { %vm2620_vm13 = vcmp.gt.f32.partialorder %v2557_v58, 0.0  ;;  %v2661_v5 = vmul.f32 0.1, %v2557_v58  ;;  %3982 = vmatprep.mubr.f32.mxu0 %v3060_v11  ;;  %v3069_v11 = vrot.slane %v10450_v44, 1 }
 0x3a6   : > { %5739 = vmatpush1.bf16.msra.mxu0 %v10442_v21  ;;  %v10451_v21 = vld [vmem:[#allocation22_spill] sm:$0xff] }
 0x3a7   : > { %v2702_v28 = vsel %vm2620_vm13, %v2557_v58, %v2661_v5  ;;  %5740 = vmatprep.subr.bf16.mxu0 %v10384_v41  ;;  %vm10482_vm13 = vmmov %vm10473_vm4 }
 0x3a8   : > { %v9193_v30 = vmul.f32 %v10443_v4, %v2702_v28  ;;  %3983 = vmatmul.mubr.f32.gmra.mrb[108].mxu0 %v8587_v8 }
 0x3a9   : > { %3987 = vmatprep.mubr.f32.mxu0 %v3062_v42  ;;  %v10452_v42 = vld [vmem:[#allocation13_spill] sm:$0xff] }
 0x3aa   : > { %v3210_v59 = vrot.slane %v9193_v30, 2  ;;  %5742 = vmatpush1.bf16.msra.mxu0 %v10445_v17  ;;  %v3071_v57 = vrot.slane %v10452_v42, 1 }
 0x3ab   : > { %5743 = vmatprep.subr.bf16.mxu0 %v10384_v41 }
 0x3ac   : > { %3988 = vmatmul.mubr.f32.gmra.mrb[110].mxu0 %v8597_v34  ;;  %v9204_v12 = vsel %vm547_vm0, %v3208_v51, %v3210_v59  ;;  %v10448_v51 = vld [vmem:[#allocation9_spill] sm:$0xff] }
 0x3ad   : > { %3992 = vmatprep.mubr.f32.mxu0 %v3064_v37  ;;  %4322 = vmatprep.mubr.f32.mxu1 %v9204_v12  ;;  %v3067_v48 = vrot.slane %v10448_v51, 1  ;;  %v3072_v37 = vsel %vm340_vm1, %v3069_v11, %v3071_v57 }
 0x3ae   : > { %4323 = vmatmul.mubr.f32.gmra.mrb[38].mxu1 %v9139_v56  ;;  %5745 = vmatpush1.bf16.msra.mxu0 %v10447_v13  ;;  %v3074_v13 = vsel %vm340_vm1, %v3071_v57, %v3073_v47 }
 0x3af   : > { %5746 = vmatprep.subr.bf16.mxu0 %v10384_v41  ;;  %v3068_v56 = vsel %vm340_vm1, %v3065_v18, %v3067_v48  ;;  %v3070_v4 = vsel %vm340_vm1, %v3067_v48, %v3069_v11 }
 0x3b0   : > { %3993 = vmatmul.mubr.f32.gmra.mrb[112].mxu0 %v10441_v9 }
 0x3b1   : > { %3997 = vmatprep.mubr.f32.mxu0 %v3066_v20  ;;  %v10454_v20 = vld [vmem:[#allocation15_spill] sm:$0xff] }
 0x3b2   : > { %v2561_v31 = vpop.f32.mrb[72].mxu0  ;;  %5748 = vmatpush1.bf16.msra.mxu0 %v10449_v63  ;;  %v3075_v48 = vrot.slane %v10454_v20, 1 }
 0x3b3   : > { %v2562_v32 = vadd.f32 %v9153_v23, %v2561_v31  ;;  %v5548_v58 = vpop.f32.mrb[73].mxu0  ;;  %5846 = vmatprep.subr.bf16.mxu0 %v9217_v62 }
 0x3b4   : > { %3998 = vmatmul.mubr.f32.gmra.mrb[114].mxu0 %v10444_v35  ;;  %v10455_v58 = vld [vmem:[#allocation16_spill] sm:$0xff] }
 0x3b5   : > { %vm2621_vm14 = vcmp.gt.f32.partialorder %v2562_v32, 0.0  ;;  %v2662_v5 = vmul.f32 0.1, %v2562_v32  ;;  %4002 = vmatprep.mubr.f32.mxu0 %v3068_v56  ;;  %v3077_v56 = vrot.slane %v10455_v58, 1 }
 0x3b7   : > { %v2703_v3 = vsel %vm2621_vm14, %v2562_v32, %v2662_v5  ;;  %v3078_v57 = vsel %vm340_vm1, %v3075_v48, %v3077_v56  ;;  %vm10483_vm14 = vmmov %vm10478_vm6 }
 0x3b8   : > { %v9229_v28 = vmul.f32 %v10451_v21, %v2703_v3  ;;  %4003 = vmatmul.mubr.f32.gmra.mrb[116].mxu0 %v10446_v1  ;;  %v10457_v21 = vld [vmem:[#allocation23_spill] sm:$0xff] }
 0x3b9   : > { %4007 = vmatprep.mubr.f32.mxu0 %v3070_v4 }
 0x3ba   : > { %v3212_v17 = vrot.slane %v9229_v28, 2  ;;  %v10467_v43 = vrot.slane %v9229_v28, 5 }
 0x3bc   : > { %4008 = vmatmul.mubr.f32.gmra.mrb[118].mxu0 %v10448_v51  ;;  %v9238_v18 = vsel %vm547_vm0, %v3210_v59, %v3212_v17  ;;  %v3076_v59 = vsel %vm340_vm1, %v3073_v47, %v3075_v48  ;;  %v10354_v47 = vrot.slane %v9229_v28, 4 }
 0x3bd   : > { %4012 = vmatprep.mubr.f32.mxu0 %v3072_v37  ;;  %4327 = vmatprep.mubr.f32.mxu1 %v9238_v18 }
 0x3be   : > { %4328 = vmatmul.mubr.f32.gmra.mrb[40].mxu1 %v9171_v45  ;;  %v10456_v45 = vld [vmem:[#allocation17_spill] sm:$0xff] }
 0x3bf   : > { %v3079_v5 = vrot.slane %v10456_v45, 1 }
 0x3c0   : > { %4013 = vmatmul.mubr.f32.gmra.mrb[120].mxu0 %v10450_v44 }
 0x3c1   : > { %4017 = vmatprep.mubr.f32.mxu0 %v3074_v13  ;;  %v3080_v37 = vsel %vm340_vm1, %v3077_v56, %v3079_v5 }
 0x3c2   : > { %v2566_v31 = vpop.f32.mrb[74].mxu0 }
 0x3c3   : > { %v2567_v63 = vadd.f32 %v9153_v23, %v2566_v31  ;;  %v5551_v32 = vpop.f32.mrb[75].mxu0  ;;  %v10353_v31 = vrot.slane %v9229_v28, 3 }
 0x3c4   : > { %4018 = vmatmul.mubr.f32.gmra.mrb[122].mxu0 %v10452_v42 }
 0x3c5   : > { %vm2622_vm15 = vcmp.gt.f32.partialorder %v2567_v63, 0.0  ;;  %v2663_v11 = vmul.f32 0.1, %v2567_v63  ;;  %4022 = vmatprep.mubr.f32.mxu0 %v3076_v59 }
 0x3c7   : > { %v2704_v3 = vsel %vm2622_vm15, %v2567_v63, %v2663_v11  ;;  %vm10484_vm15 = vmmov %vm10473_vm4 }
 0x3c8   : > { %v9252_v4 = vmul.f32 %v10457_v21, %v2704_v3  ;;  %4023 = vmatmul.mubr.f32.gmra.mrb[124].mxu0 %v10453_v26 }
 0x3c9   : > { %4027 = vmatprep.mubr.f32.mxu0 %v3078_v57  ;;  %v10459_v57 = vld [vmem:[#allocation18_spill] sm:$0xff] }
 0x3ca   : > { %10458 = vst [vmem:[#allocation7_spill] sm:$0xff] %v9252_v4  ;;  %v3252_v13 = vrot.slane %v9252_v4, 2  ;;  %v10352_v32 = vrot.slane %v9252_v4, 4  ;;  %v3327_v63 = vrot.slane %v9252_v4, 3  ;;  %v3658_v11 = vrot.slane %v9252_v4, 6 }
 0x3cb   : > { %v3549_v48 = vrot.slane %v9252_v4, 5  ;;  %v3081_v7 = vrot.slane %v10459_v57, 1 }
 0x3cc   : > { %v2571_v21 = vpop.f32.mrb[76].mxu0  ;;  %4028 = vmatmul.mubr.f32.gmra.mrb[126].mxu0 %v10454_v20  ;;  %v3253_v56 = vsel %vm547_vm0, %v3212_v17, %v3252_v13  ;;  %v9274_v52 = vsel %vm10460_vm7, %v10354_v47, %v10352_v32  ;;  %v9279_v27 = vsel %vm10462_vm8, %v10353_v31, %v3327_v63  ;;  %v10464_v17 = vrot.slane %v9229_v28, 6  ;;  %v10470_v47 = vld [vmem:[#allocation19_spill] sm:$0xff]  ;;  %vm10485_vm7 = vmmov %vm10478_vm6 }
 0x3cd   : > { %10461 = vst [vmem:[#allocation2_spill] sm:$0xff] %v9274_v52  ;;  %10463 = vst [vmem:[#allocation21_spill] sm:$0xff] %v9279_v27  ;;  %v2572_v3 = vadd.f32 %v9153_v23, %v2571_v21  ;;  %v5554_v59 = vpop.f32.mrb[77].mxu0  ;;  %4032 = vmatprep.mubr.f32.mxu0 %v3080_v37  ;;  %4332 = vmatprep.mubr.f32.mxu1 %v3253_v56  ;;  %v9290_v32 = vsel %vm10468_vm3, %v10467_v43, %v3549_v48  ;;  %v3083_v4 = vrot.slane %v10470_v47, 1  ;;  %v10471_v21 = vld [vmem:[#allocation24_spill] sm:$0xff] }
 0x3ce   : > { %v9285_v38 = vsel %vm10465_vm9, %v10464_v17, %v3658_v11  ;;  %10469 = vst [vmem:[#allocation3_spill] sm:$0xff] %v9290_v32  ;;  %4333 = vmatmul.mubr.f32.gmra.mrb[42].mxu1 %v9204_v12  ;;  %v3082_v37 = vsel %vm340_vm1, %v3079_v5, %v3081_v7  ;;  %v3367_v43 = vrot.slane %v8835_v54, 4  ;;  %v10472_v32 = vld [vmem:[#allocation20_spill] sm:$0xff]  ;;  %v3368_v27 = vrot.slane %v8927_v6, 4  ;;  %vm10486_vm8 = vmmov %vm10473_vm4 }
 0x3cf   : > { %10466 = vst [vmem:[#allocation6_spill] sm:$0xff] %v9285_v38  ;;  %vm2623_vm5 = vcmp.gt.f32.partialorder %v2572_v3, 0.0  ;;  %v2664_v31 = vmul.f32 0.1, %v2572_v3  ;;  %v3084_v17 = vsel %vm340_vm1, %v3081_v7, %v3083_v4  ;;  %v3085_v38 = vrot.slane %v10472_v32, 1  ;;  %v3798_v7 = vld [vmem:[%s10282_s3 + $0x300] sm:$0xff]  ;;  %vm10487_vm9 = vmmov %vm10478_vm6 }
 0x3d0   : > { %4033 = vmatmul.mubr.f32.gmra.mrb[128].mxu0 %v10455_v58  ;;  %vm10488_vm3 = vmmov %vm10473_vm4 }
 0x3d1   : > { %v2705_v59 = vsel %vm2623_vm5, %v2572_v3, %v2664_v31  ;;  %4037 = vmatprep.mubr.f32.mxu0 %v3082_v37  ;;  %v3799_v37 = vld [vmem:[%s10282_s3 + $0x308] sm:$0xff]  ;;  %vm10489_vm5 = vmmov %vm10478_vm6 }
 0x3d2   : > { %v9297_v56 = vmul.f32 %v10471_v21, %v2705_v59 }
 0x3d4   : > { %4038 = vmatmul.mubr.f32.gmra.mrb[130].mxu0 %v10456_v45  ;;  %v3254_v12 = vrot.slane %v9297_v56, 2  ;;  %v3329_v52 = vrot.slane %v9297_v56, 3  ;;  %v10357_v5 = vrot.slane %v9297_v56, 6  ;;  %v10358_v31 = vrot.slane %v9297_v56, 5 }
 0x3d5   : > { %4042 = vmatprep.mubr.f32.mxu0 %v3084_v17  ;;  %v3258_v17 = vrot.slane %v8835_v54, 3 }
 0x3d6   : > { %v3255_v3 = vsel %vm547_vm0, %v3252_v13, %v3254_v12  ;;  %v9316_v59 = vsel %vm10473_vm4, %v3327_v63, %v3329_v52  ;;  %v9321_v21 = vsel %vm10475_vm10, %v3658_v11, %v10357_v5  ;;  %v3259_v13 = vrot.slane %v8927_v6, 3  ;;  %v10479_v5 = vld [vmem:[#allocation25_spill] sm:$0xff]  ;;  %vm10490_vm4 = vmmov %vm10488_vm3 }
 0x3d7   : > { %10474 = vst [vmem:[#allocation8_spill] sm:$0xff] %v9316_v59  ;;  %10476 = vst [vmem:[#allocation4_spill] sm:$0xff] %v9321_v21  ;;  %4337 = vmatprep.mubr.f32.mxu1 %v3255_v3  ;;  %v9328_v12 = vsel %vm10438_vm2, %v3549_v48, %v10358_v31  ;;  %v3369_v52 = vsel %vm10478_vm6, %v3367_v43, %v3368_v27  ;;  %v3086_v63 = vsel %vm340_vm1, %v3083_v4, %v3085_v38  ;;  %v3801_v43 = vld [vmem:[%s10282_s3 + $0x318] sm:$0xff]  ;;  %v3803_v31 = vld [vmem:[%s10282_s3 + $0x328] sm:$0xff] }
 0x3d8   : > { %10477 = vst [vmem:[#allocation9_spill] sm:$0xff] %v9328_v12  ;;  %4338 = vmatmul.mubr.f32.gmra.mrb[44].mxu1 %v9238_v18  ;;  %4043 = vmatmul.mubr.f32.gmra.mrb[132].mxu0 %v10459_v57  ;;  %v3370_v11 = vrot.slane %v8989_v46, 4  ;;  %v5798_v3 = vpack.c.bf16 %v3799_v37, %v3798_v7  ;;  %v3087_v21 = vrot.slane %v10479_v5, 1  ;;  %v3260_v59 = vsel %vm10480_vm11, %v3258_v17, %v3259_v13  ;;  %v3800_v18 = vld [vmem:[%s10282_s3 + $0x310] sm:$0xff]  ;;  %vm10492_vm10 = vmmov %vm10489_vm5 }
 0x3d9   : > { %4407 = vmatprep.mubr.f32.mxu1 %v3369_v52  ;;  %4047 = vmatprep.mubr.f32.mxu0 %v3086_v63  ;;  %v3261_v48 = vrot.slane %v8989_v46, 3  ;;  %v3372_v7 = vrot.slane %v9012_v2, 4  ;;  %v3089_v37 = vrot.slane %v8805_v60, 1  ;;  %v5801_v52 = vpack.c.bf16 %v3801_v43, %v3800_v18  ;;  %vm10495_vm2 = vmmov %vm10488_vm3 }
 0x3da   : > { %v3371_v4 = vsel %vm10481_vm12, %v3368_v27, %v3370_v11  ;;  %v3088_v17 = vsel %vm340_vm1, %v3085_v38, %v3087_v21  ;;  %v3802_v27 = vld [vmem:[%s10282_s3 + $0x320] sm:$0xff]  ;;  %v3091_v18 = vrot.slane %v8874_v0, 1  ;;  %vm10502_vm6 = vmmov %vm10495_vm2 }
 0x3db   : > { %v3262_v63 = vsel %vm10482_vm13, %v3259_v13, %v3261_v48  ;;  %v9360_v38 = vsel %vm10483_vm14, %v3370_v11, %v3372_v7  ;;  %v3374_v13 = vrot.slane %v9093_v24, 4  ;;  %v5804_v43 = vpack.c.bf16 %v3803_v31, %v3802_v27  ;;  %v3804_v11 = vld [vmem:[%s10282_s3 + $0x330] sm:$0xff]  ;;  %vm10506_vm12 = vmmov %vm10495_vm2 }
 0x3dc   : > { %4408 = vmatmul.mubr.f32.vlgmr.msra.gmra.mrb[46].mxu1 %v3260_v59  ;;  %4048 = vmatmul.mubr.f32.gmra.mrb[134].mxu0 %v10470_v47  ;;  %v3263_v59 = vrot.slane %v9012_v2, 3  ;;  %v3092_v31 = vsel %vm340_vm1, %v3089_v37, %v3091_v18  ;;  %vm10510_vm14 = vmmov %vm10495_vm2 }
 0x3dd   : > { %5799 = vmatpush1.bf16.msra.mxu1 %v5798_v3  ;;  %4412 = vmatprep.mubr.f32.mxu1 %v3371_v4  ;;  %v3090_v3 = vsel %vm340_vm1, %v3087_v21, %v3089_v37  ;;  %v3805_v21 = vld [vmem:[%s10282_s3 + $0x338] sm:$0xff]  ;;  %v3807_v37 = vld [vmem:[%s10282_s3 + $0x348] sm:$0xff] }
 0x3de   : > { %4052 = vmatprep.mubr.f32.mxu0 %v3088_v17  ;;  %5800 = vmatprep.subr.bf16.mxu1 %v10384_v41  ;;  %v3264_v4 = vsel %vm10484_vm15, %v3261_v48, %v3263_v59  ;;  %v3265_v17 = vrot.slane %v9093_v24, 3  ;;  %v3376_v48 = vrot.slane %v8797_v16, 4  ;;  %v5807_v27 = vpack.c.bf16 %v3805_v21, %v3804_v11 }
 0x3df   : > { %v3378_v11 = vrot.slane %v9120_v33, 4  ;;  %v3095_v21 = vrot.slane %v9054_v36, 1 }
 0x3e0   : > { %4413 = vmatmul.mubr.f32.gmra.mrb[48].mxu1 %v3262_v63  ;;  %4053 = vmatmul.mubr.f32.gmra.mrb[136].mxu0 %v10472_v32  ;;  %v3093_v63 = vrot.slane %v8933_v50, 1 }
 0x3e1   : > { %4417 = vmatprep.mubr.f32.mxu1 %v9360_v38  ;;  %4057 = vmatprep.mubr.f32.mxu0 %v3090_v3  ;;  %v3266_v3 = vsel %vm10486_vm8, %v3263_v59, %v3265_v17 }
 0x3e2   : > { %5802 = vmatpush1.bf16.msra.mxu1 %v5801_v52  ;;  %v9377_v52 = vsel %vm10485_vm7, %v3372_v7, %v3374_v13  ;;  %v3806_v7 = vld [vmem:[%s10282_s3 + $0x340] sm:$0xff]  ;;  %v3094_v59 = vsel %vm340_vm1, %v3091_v18, %v3093_v63  ;;  %v3809_v18 = vld [vmem:[%s10282_s3 + $0x358] sm:$0xff]  ;;  %vm10513_vm7 = vmmov %vm10495_vm2 }
 0x3e3   : > { %5803 = vmatprep.subr.bf16.mxu1 %v10384_v41 }
 0x3e4   : > { %4418 = vmatmul.mubr.f32.gmra.mrb[50].mxu1 %v3264_v4  ;;  %4058 = vmatmul.mubr.f32.gmra.mrb[138].mxu0 %v10479_v5  ;;  %v3267_v4 = vrot.slane %v8797_v16, 3 }
 0x3e5   : > { %4422 = vmatprep.mubr.f32.mxu1 %v9377_v52  ;;  %4062 = vmatprep.mubr.f32.mxu0 %v3092_v31  ;;  %v5810_v31 = vpack.c.bf16 %v3807_v37, %v3806_v7  ;;  %v3097_v7 = vrot.slane %v9128_v15, 1 }
 0x3e6   : > { %5805 = vmatpush1.bf16.msra.mxu1 %v5804_v43  ;;  %v9394_v43 = vsel %vm10487_vm9, %v3374_v13, %v3376_v48  ;;  %v3268_v12 = vsel %vm10488_vm3, %v3265_v17, %v3267_v4  ;;  %v3808_v13 = vld [vmem:[%s10282_s3 + $0x350] sm:$0xff]  ;;  %v3096_v17 = vsel %vm340_vm1, %v3093_v63, %v3095_v21  ;;  %v10491_v63 = vrot.slane %v8930_v40, 4  ;;  %vm10516_vm9 = vmmov %vm10495_vm2 }
 0x3e7   : > { %5806 = vmatprep.subr.bf16.mxu1 %v10384_v41  ;;  %v5813_v37 = vpack.c.bf16 %v3809_v18, %v3808_v13  ;;  %v3099_v13 = vrot.slane %v9162_v10, 1 }
 0x3e8   : > { %4423 = vmatmul.mubr.f32.gmra.mrb[52].mxu1 %v3266_v3  ;;  %4063 = vmatmul.mubr.f32.gmra.mrb[140].mxu0 %v8805_v60  ;;  %v3269_v3 = vrot.slane %v9120_v33, 3 }
 0x3e9   : > { %4427 = vmatprep.mubr.f32.mxu1 %v9394_v43  ;;  %4067 = vmatprep.mubr.f32.mxu0 %v3094_v59 }
 0x3ea   : > { %5808 = vmatpush1.bf16.msra.mxu1 %v5807_v27  ;;  %v9411_v27 = vsel %vm10489_vm5, %v3376_v48, %v3378_v11  ;;  %v3270_v59 = vsel %vm10490_vm4, %v3267_v4, %v3269_v3  ;;  %v3811_v48 = vld [vmem:[%s10282_s3 + $0x368] sm:$0xff]  ;;  %v3098_v4 = vsel %vm340_vm1, %v3095_v21, %v3097_v7  ;;  %v3813_v21 = vld [vmem:[%s10282_s3 + $0x378] sm:$0xff] }
 0x3eb   : > { %5809 = vmatprep.subr.bf16.mxu1 %v10384_v41 }
 0x3ec   : > { %4428 = vmatmul.mubr.f32.gmra.mrb[54].mxu1 %v3268_v12  ;;  %4068 = vmatmul.mubr.f32.gmra.mrb[142].mxu0 %v8874_v0  ;;  %v3810_v12 = vld [vmem:[%s10282_s3 + $0x360] sm:$0xff] }
 0x3ed   : > { %4432 = vmatprep.mubr.f32.mxu1 %v9411_v27  ;;  %4072 = vmatprep.mubr.f32.mxu0 %v3096_v17  ;;  %v5816_v18 = vpack.c.bf16 %v3811_v48, %v3810_v12  ;;  %v10494_v17 = vrot.slane %v8930_v40, 3  ;;  %v3101_v12 = vrot.slane %v9193_v30, 1  ;;  %v3814_v48 = vld [vmem:[%s10282_s3 + $0x380] sm:$0xff] }
 0x3ee   : > { %5811 = vmatpush1.bf16.msra.mxu1 %v5810_v31  ;;  %v9428_v31 = vsel %vm10492_vm10, %v3378_v11, %v10491_v63  ;;  %v3812_v11 = vld [vmem:[%s10282_s3 + $0x370] sm:$0xff]  ;;  %v3815_v63 = vld [vmem:[%s10282_s3 + $0x388] sm:$0xff]  ;;  %vm10522_vm10 = vmmov %vm10495_vm2 }
 0x3ef   : > { %5812 = vmatprep.subr.bf16.mxu1 %v10384_v41  ;;  %10493 = vst [vmem:[#allocation5_spill] sm:$0xff] %v9428_v31 }
 0x3f0   : > { %4433 = vmatmul.mubr.f32.gmra.mrb[56].mxu1 %v3270_v59  ;;  %4073 = vmatmul.mubr.f32.gmra.mrb[144].mxu0 %v8933_v50  ;;  %v3272_v59 = vsel %vm10495_vm2, %v3269_v3, %v10494_v17  ;;  %v5819_v3 = vpack.c.bf16 %v3813_v21, %v3812_v11  ;;  %v3103_v17 = vrot.slane %v9229_v28, 1  ;;  %v3817_v11 = vld [vmem:[%s10282_s3 + $0x398] sm:$0xff]  ;;  %v3146_v21 = vrot.slane %v8927_v6, 2 }
 0x3f1   : > { %4437 = vmatprep.mubr.f32.mxu1 %v9428_v31  ;;  %4077 = vmatprep.mubr.f32.mxu0 %v3098_v4  ;;  %v10496_v4 = vld [vmem:[#allocation29_spill] sm:$0xff]  ;;  %v10497_v6 = vrot.slane %v9014_v55, 4  ;;  %v3824_v31 = vld [vmem:[%s10282_s3 + $0x3d0] sm:$0xff] }
 0x3f2   : > { %5814 = vmatpush1.bf16.msra.mxu1 %v5813_v37  ;;  %v3100_v37 = vsel %vm340_vm1, %v3097_v7, %v3099_v13  ;;  %v3102_v7 = vsel %vm340_vm1, %v3099_v13, %v3101_v12  ;;  %v3104_v13 = vsel %vm340_vm1, %v3101_v12, %v3103_v17  ;;  %vm10498_vm1 = vmmov %vm10489_vm5  ;;  %v3148_v17 = vrot.slane %v8989_v46, 2 }
 0x3f3   : > { %5815 = vmatprep.subr.bf16.mxu1 %v10384_v41  ;;  %vm10504_vm11 = vmmov %vm10498_vm1 }
 0x3f4   : > { %4438 = vmatmul.mubr.f32.gmra.mrb[58].mxu1 %v3272_v59  ;;  %4078 = vmatmul.mubr.f32.gmra.mrb[146].mxu0 %v9054_v36  ;;  %v3816_v59 = vld [vmem:[%s10282_s3 + $0x390] sm:$0xff]  ;;  %vm10508_vm13 = vmmov %vm10498_vm1 }
 0x3f5   : > { %4442 = vmatprep.mubr.f32.mxu1 %v8981_v53  ;;  %4082 = vmatprep.mubr.f32.mxu0 %v3100_v37  ;;  %v3388_v37 = vrot.slane %v8587_v8, 4  ;;  %v10507_v53 = vld [vmem:[#allocation27_spill] sm:$0xff]  ;;  %vm10511_vm15 = vmmov %vm10498_vm1 }
 0x3f6   : > { %5817 = vmatpush1.bf16.msra.mxu1 %v5816_v18  ;;  %v5822_v18 = vpack.c.bf16 %v3815_v63, %v3814_v48  ;;  %v3818_v48 = vld [vmem:[%s10282_s3 + $0x3a0] sm:$0xff]  ;;  %v10500_v63 = vrot.slane %v8835_v54, 2  ;;  %vm10514_vm8 = vmmov %vm10498_vm1 }
 0x3f7   : > { %5818 = vmatprep.subr.bf16.mxu1 %v10384_v41  ;;  %v9484_v12 = vsel %vm10498_vm1, %v10497_v6, %v3388_v37  ;;  %v3281_v6 = vrot.slane %v8597_v34, 3  ;;  %vm10517_vm3 = vmmov %vm10498_vm1 }
 0x3f8   : > { %4443 = vmatmul.mubr.f32.gmra.mrb[60].mxu1 %v10496_v4  ;;  %4083 = vmatmul.mubr.f32.gmra.mrb[148].mxu0 %v9128_v15  ;;  %10499 = vst [vmem:[#allocation11_spill] sm:$0xff] %v9484_v12  ;;  %v3147_v4 = vsel %vm547_vm0, %v10500_v63, %v3146_v21  ;;  %vm10519_vm5 = vmmov %vm10495_vm2 }
 0x3f9   : > { %4447 = vmatprep.mubr.f32.mxu1 %v9023_v49  ;;  %4087 = vmatprep.mubr.f32.mxu0 %v3102_v7  ;;  %v3390_v7 = vrot.slane %v8597_v34, 4  ;;  %v3822_v49 = vld [vmem:[%s10282_s3 + $0x3c0] sm:$0xff]  ;;  %vm10520_vm4 = vmmov %vm10498_vm1 }
 0x3fa   : > { %5820 = vmatpush1.bf16.msra.mxu1 %v5819_v3  ;;  %v5825_v3 = vpack.c.bf16 %v3817_v11, %v3816_v59  ;;  %v3279_v59 = vrot.slane %v8587_v8, 3  ;;  %v10501_v11 = vrot.slane %v9014_v55, 3  ;;  %vm10523_vm2 = vmmov %vm10498_vm1 }
 0x3fb   : > { %5821 = vmatprep.subr.bf16.mxu1 %v10384_v41  ;;  %vm10525_vm1 = vmmov %vm10519_vm5 }
 0x3fc   : > { %4448 = vmatmul.mubr.f32.gmra.mrb[62].mxu1 %v9026_v25  ;;  %4088 = vmatmul.mubr.f32.gmra.mrb[150].mxu0 %v9162_v10  ;;  %v3819_v25 = vld [vmem:[%s10282_s3 + $0x3a8] sm:$0xff] }
 0x3fd   : > { %4452 = vmatprep.mubr.f32.mxu1 %v9061_v61  ;;  %4092 = vmatprep.mubr.f32.mxu0 %v3104_v13  ;;  %v5828_v54 = vpack.c.bf16 %v3819_v25, %v3818_v48  ;;  %v3280_v13 = vsel %vm10502_vm6, %v10501_v11, %v3279_v59  ;;  %v3820_v61 = vld [vmem:[%s10282_s3 + $0x3b0] sm:$0xff]  ;;  %v9512_v48 = vsel %vm10504_vm11, %v3388_v37, %v3390_v7  ;;  %v3835_v11 = vld [vmem:[%s10282_s3 + $0x428] sm:$0xff]  ;;  %vm10526_vm6 = vmmov %vm10523_vm2 }
 0x3fe   : > { %5823 = vmatpush1.bf16.msra.mxu1 %v5822_v18  ;;  %v3832_v18 = vld [vmem:[%s10282_s3 + $0x410] sm:$0xff]  ;;  %10505 = vst [vmem:[#allocation22_spill] sm:$0xff] %v9512_v48  ;;  %v3149_v25 = vsel %vm547_vm0, %v3146_v21, %v3148_v17  ;;  %v3282_v21 = vsel %vm10506_vm12, %v3279_v59, %v3281_v6  ;;  %v3152_v59 = vrot.slane %v9093_v24, 2  ;;  %vm10527_vm11 = vmmov %vm10525_vm1 }
 0x3ff   : > { %5824 = vmatprep.subr.bf16.mxu1 %v10384_v41  ;;  %vm10528_vm12 = vmmov %vm10523_vm2 }
 0x400   : > { %4453 = vmatmul.mubr.f32.gmra.mrb[64].mxu1 %v9066_v29  ;;  %4093 = vmatmul.mubr.f32.gmra.mrb[152].mxu0 %v9193_v30  ;;  %v3833_v29 = vld [vmem:[%s10282_s3 + $0x418] sm:$0xff] }
 0x401   : > { %4457 = vmatprep.mubr.f32.mxu1 %v9484_v12  ;;  %4162 = vmatprep.mubr.f32.mxu0 %v3147_v4  ;;  %v5849_v63 = vpack.c.bf16 %v3833_v29, %v3832_v18  ;;  %v3821_v12 = vld [vmem:[%s10282_s3 + $0x3b8] sm:$0xff]  ;;  %v3150_v18 = vrot.slane %v9012_v2, 2  ;;  %v3834_v29 = vld [vmem:[%s10282_s3 + $0x420] sm:$0xff] }
 0x402   : > { %5826 = vmatpush1.bf16.msra.mxu1 %v5825_v3  ;;  %v10503_v3 = vld [vmem:[#allocation26_spill] sm:$0xff]  ;;  %v5831_v37 = vpack.c.bf16 %v3821_v12, %v3820_v61  ;;  %v3394_v12 = vrot.slane %v10444_v35, 4 }
 0x403   : > { %5827 = vmatprep.subr.bf16.mxu1 %v10384_v41  ;;  %v3151_v61 = vsel %vm547_vm0, %v3148_v17, %v3150_v18 }
 0x404   : > { %4458 = vmatmul.mubr.f32.gmra.mrb[66].mxu1 %v3280_v13  ;;  %4163 = vmatmul.mubr.f32.vlgmr.msra.gmra.mrb[82].mxu0 %v10503_v3  ;;  %v3392_v13 = vrot.slane %v10441_v9, 4  ;;  %v5853_v3 = vpack.c.bf16 %v3835_v11, %v3834_v29  ;;  %v3837_v29 = vld [vmem:[%s10282_s3 + $0x438] sm:$0xff]  ;;  %v3285_v11 = vrot.slane %v10444_v35, 3 }
 0x405   : > { %4462 = vmatprep.mubr.f32.mxu1 %v9512_v48  ;;  %4167 = vmatprep.mubr.f32.mxu0 %v3149_v25  ;;  %v3823_v48 = vld [vmem:[%s10282_s3 + $0x3c8] sm:$0xff] }
 0x406   : > { %5848 = vmatpush3.bf16.msra.mxu0 %v9217_v62  ;;  %5829 = vmatpush1.bf16.msra.mxu1 %v5828_v54  ;;  %v9535_v62 = vsel %vm10508_vm13, %v3390_v7, %v3392_v13  ;;  %v3836_v54 = vld [vmem:[%s10282_s3 + $0x430] sm:$0xff]  ;;  %v5834_v7 = vpack.c.bf16 %v3823_v48, %v3822_v49  ;;  %v9558_v49 = vsel %vm10511_vm15, %v3392_v13, %v3394_v12  ;;  %v3154_v48 = vrot.slane %v8797_v16, 2  ;;  %vm10530_vm13 = vmmov %vm10525_vm1 }
 0x407   : > { %5850 = vmatprep.subr.bf16.mxu0 %v5849_v63  ;;  %5830 = vmatprep.subr.bf16.mxu1 %v10384_v41  ;;  %10509 = vst [vmem:[#allocation13_spill] sm:$0xff] %v9535_v62  ;;  %10512 = vst [vmem:[#allocation14_spill] sm:$0xff] %v9558_v49  ;;  %v3287_v13 = vrot.slane %v10446_v1, 3 }
 0x408   : > { %4463 = vmatmul.mubr.f32.gmra.mrb[68].mxu1 %v3282_v21  ;;  %4168 = vmatmul.mubr.f32.gmra.mrb[84].mxu0 %v10507_v53  ;;  %v3283_v53 = vrot.slane %v10441_v9, 3  ;;  %v5857_v21 = vpack.c.bf16 %v3837_v29, %v3836_v54  ;;  %v3839_v54 = vld [vmem:[%s10282_s3 + $0x448] sm:$0xff]  ;;  %vm10535_vm15 = vmmov %vm10525_vm1 }
 0x409   : > { %4467 = vmatprep.mubr.f32.mxu1 %v9535_v62  ;;  %4172 = vmatprep.mubr.f32.mxu0 %v3151_v61  ;;  %v3825_v62 = vld [vmem:[%s10282_s3 + $0x3d8] sm:$0xff] }
 0x40a   : > { %5852 = vmatpush3.bf16.msra.mxu0 %v5849_v63  ;;  %5832 = vmatpush1.bf16.msra.mxu1 %v5831_v37  ;;  %v3284_v17 = vsel %vm10510_vm14, %v3281_v6, %v3283_v53  ;;  %v3153_v6 = vsel %vm547_vm0, %v3150_v18, %v3152_v59  ;;  %v3396_v63 = vrot.slane %v10446_v1, 4  ;;  %v3838_v37 = vld [vmem:[%s10282_s3 + $0x440] sm:$0xff]  ;;  %v3286_v18 = vsel %vm10513_vm7, %v3283_v53, %v3285_v11  ;;  %vm10531_vm14 = vmmov %vm10523_vm2 }
 0x40b   : > { %5854 = vmatprep.subr.bf16.mxu0 %v5853_v3  ;;  %5833 = vmatprep.subr.bf16.mxu1 %v10384_v41  ;;  %v5861_v29 = vpack.c.bf16 %v3839_v54, %v3838_v37  ;;  %v3156_v53 = vrot.slane %v9120_v33, 2  ;;  %v3841_v37 = vld [vmem:[%s10282_s3 + $0x458] sm:$0xff]  ;;  %vm10536_vm7 = vmmov %vm10523_vm2 }
 0x40c   : > { %4468 = vmatmul.mubr.f32.gmra.mrb[70].mxu1 %v3284_v17  ;;  %4173 = vmatmul.mubr.f32.gmra.mrb[86].mxu0 %v3147_v4  ;;  %v5837_v4 = vpack.c.bf16 %v3825_v62, %v3824_v31  ;;  %v3826_v17 = vld [vmem:[%s10282_s3 + $0x3e0] sm:$0xff]  ;;  %v9580_v31 = vsel %vm10514_vm8, %v3394_v12, %v3396_v63  ;;  %v3398_v62 = vrot.slane %v10448_v51, 4  ;;  %v3288_v12 = vsel %vm10516_vm9, %v3285_v11, %v3287_v13  ;;  %vm10540_vm8 = vmmov %vm10523_vm2 }
 0x40d   : > { %4472 = vmatprep.mubr.f32.mxu1 %v9558_v49  ;;  %4177 = vmatprep.mubr.f32.mxu0 %v3153_v6  ;;  %v3827_v49 = vld [vmem:[%s10282_s3 + $0x3e8] sm:$0xff]  ;;  %10515 = vst [vmem:[#allocation15_spill] sm:$0xff] %v9580_v31  ;;  %v3157_v11 = vsel %vm547_vm0, %v3154_v48, %v3156_v53 }
 0x40e   : > { %5856 = vmatpush3.bf16.msra.mxu0 %v5853_v3  ;;  %5835 = vmatpush1.bf16.msra.mxu1 %v5834_v7  ;;  %v3155_v3 = vsel %vm547_vm0, %v3152_v59, %v3154_v48  ;;  %v3840_v7 = vld [vmem:[%s10282_s3 + $0x450] sm:$0xff]  ;;  %v3289_v59 = vrot.slane %v10448_v51, 3  ;;  %v3291_v48 = vrot.slane %v10450_v44, 3 }
 0x40f   : > { %5858 = vmatprep.subr.bf16.mxu0 %v5857_v21  ;;  %5836 = vmatprep.subr.bf16.mxu1 %v10384_v41  ;;  %v5865_v54 = vpack.c.bf16 %v3841_v37, %v3840_v7 }
 0x410   : > { %4473 = vmatmul.mubr.f32.gmra.mrb[0].mxu1 %v3286_v18  ;;  %4178 = vmatmul.mubr.f32.gmra.mrb[88].mxu0 %v3149_v25  ;;  %v5840_v25 = vpack.c.bf16 %v3827_v49, %v3826_v17  ;;  %v3828_v18 = vld [vmem:[%s10282_s3 + $0x3f0] sm:$0xff]  ;;  %v3400_v49 = vrot.slane %v10450_v44, 4  ;;  %v3843_v17 = vld [vmem:[%s10282_s3 + $0x468] sm:$0xff] }
 0x411   : > { %4477 = vmatprep.mubr.f32.mxu1 %v9580_v31  ;;  %4182 = vmatprep.mubr.f32.mxu0 %v3155_v3  ;;  %v3829_v31 = vld [vmem:[%s10282_s3 + $0x3f8] sm:$0xff] }
 0x412   : > { %5860 = vmatpush3.bf16.msra.mxu0 %v5857_v21  ;;  %5838 = vmatpush1.bf16.msra.mxu1 %v5837_v4  ;;  %v9602_v21 = vsel %vm10517_vm3, %v3396_v63, %v3398_v62  ;;  %v3842_v4 = vld [vmem:[%s10282_s3 + $0x460] sm:$0xff]  ;;  %v3290_v63 = vsel %vm10519_vm5, %v3287_v13, %v3289_v59  ;;  %v9617_v37 = vsel %vm10520_vm4, %v3398_v62, %v3400_v49  ;;  %v3844_v13 = vld [vmem:[%s10282_s3 + $0x470] sm:$0xff]  ;;  %vm10544_vm3 = vmmov %vm10523_vm2  ;;  %vm10546_vm5 = vcmask 1041408  }
 0x413   : > { %5862 = vmatprep.subr.bf16.mxu0 %v5861_v29  ;;  %5839 = vmatprep.subr.bf16.mxu1 %v10384_v41  ;;  %10518 = vst [vmem:[#allocation16_spill] sm:$0xff] %v9602_v21  ;;  %v5869_v7 = vpack.c.bf16 %v3843_v17, %v3842_v4  ;;  %v3297_v17 = vrot.slane %v10454_v20, 3 }
 0x414   : > { %4478 = vmatmul.mubr.f32.gmra.mrb[2].mxu1 %v3288_v12  ;;  %4183 = vmatmul.mubr.f32.gmra.mrb[90].mxu0 %v3151_v61  ;;  %v5843_v61 = vpack.c.bf16 %v3829_v31, %v3828_v18  ;;  %v10521_v12 = vrot.slane %v8930_v40, 2  ;;  %v3845_v31 = vld [vmem:[%s10282_s3 + $0x478] sm:$0xff]  ;;  %v10524_v18 = vld [vmem:[#allocation30_spill] sm:$0xff] }
 0x415   : > { %4482 = vmatprep.mubr.f32.mxu1 %v9602_v21  ;;  %4187 = vmatprep.mubr.f32.mxu0 %v3157_v11  ;;  %v5873_v62 = vpack.c.bf16 %v3845_v31, %v3844_v13  ;;  %v3410_v13 = vrot.slane %v10456_v45, 4 }
 0x416   : > { %5864 = vmatpush3.bf16.msra.mxu0 %v5861_v29  ;;  %5841 = vmatpush1.bf16.msra.mxu1 %v5840_v25  ;;  %v3159_v21 = vsel %vm547_vm0, %v3156_v53, %v10521_v12  ;;  %v3402_v29 = vrot.slane %v10452_v42, 4  ;;  %v3404_v25 = vrot.slane %v10453_v26, 4  ;;  %v10534_v12 = vrot.slane %v9014_v55, 2 }
 0x417   : > { %5866 = vmatprep.subr.bf16.mxu0 %v5865_v54  ;;  %5842 = vmatprep.subr.bf16.mxu1 %v10384_v41  ;;  %v3292_v41 = vsel %vm10522_vm10, %v3289_v59, %v3291_v48  ;;  %v3295_v59 = vrot.slane %v10453_v26, 3  ;;  %vm10548_vm10 = vmmov %vm10546_vm5 }
 0x418   : > { %4483 = vmatmul.mubr.f32.gmra.mrb[4].mxu1 %v3290_v63  ;;  %4188 = vmatmul.mubr.f32.gmra.mrb[92].mxu0 %v3153_v6  ;;  %v3293_v6 = vrot.slane %v10452_v42, 3  ;;  %v9633_v53 = vsel %vm10523_vm2, %v3400_v49, %v3402_v29  ;;  %v9641_v4 = vsel %vm10526_vm6, %v3402_v29, %v3404_v25 }
 0x419   : > { %4487 = vmatprep.mubr.f32.mxu1 %v9617_v37  ;;  %4192 = vmatprep.mubr.f32.mxu0 %v3159_v21  ;;  %v3298_v63 = vsel %vm10530_vm13, %v3295_v59, %v3297_v17  ;;  %vm10553_vm13 = vmmov %vm10523_vm2 }
 0x41a   : > { %5868 = vmatpush3.bf16.msra.mxu0 %v5865_v54  ;;  %5844 = vmatpush1.bf16.msra.mxu1 %v5843_v61  ;;  %v3294_v54 = vsel %vm10525_vm1, %v3291_v48, %v3293_v6  ;;  %v3296_v49 = vsel %vm10527_vm11, %v3293_v6, %v3295_v59  ;;  %v3299_v48 = vrot.slane %v10455_v58, 3 }
 0x41b   : > { %5870 = vmatprep.subr.bf16.mxu0 %v5869_v7 }
 0x41c   : > { %4488 = vmatmul.mubr.f32.gmra.mrb[6].mxu1 %v3292_v41  ;;  %4193 = vmatmul.mubr.f32.gmra.mrb[94].mxu0 %v3155_v3  ;;  %v3406_v3 = vrot.slane %v10454_v20, 4  ;;  %v3300_v31 = vsel %vm10535_vm15, %v3297_v17, %v3299_v48  ;;  %v3301_v41 = vrot.slane %v10456_v45, 3  ;;  %v10542_v17 = vld [vmem:[#allocation12_spill] sm:$0xff] }
 0x41d   : > { %4492 = vmatprep.mubr.f32.mxu1 %v9633_v53  ;;  %4197 = vmatprep.mubr.f32.mxu0 %v10524_v18 }
 0x41e   : > { %5872 = vmatpush3.bf16.msra.mxu0 %v5869_v7  ;;  %v9649_v61 = vsel %vm10528_vm12, %v3404_v25, %v3406_v3  ;;  %v10538_v25 = vld [vmem:[#allocation10_spill] sm:$0xff] }
 0x41f   : > { %5874 = vmatprep.subr.bf16.mxu0 %v5873_v62  ;;  %10529 = vst [vmem:[#allocation17_spill] sm:$0xff] %v9649_v61 }
 0x420   : > { %4493 = vmatmul.mubr.f32.gmra.mrb[8].mxu1 %v3294_v54  ;;  %4198 = vmatmul.mubr.f32.gmra.mrb[96].mxu0 %v3157_v11  ;;  %v3408_v11 = vrot.slane %v10455_v58, 4  ;;  %v3303_v54 = vrot.slane %v10459_v57, 3 }
 0x421   : > { %4497 = vmatprep.mubr.f32.mxu1 %v9641_v4  ;;  %4202 = vmatprep.mubr.f32.mxu0 %v9029_v22 }
 0x422   : > { %5876 = vmatpush3.bf16.msra.mxu0 %v5873_v62  ;;  %v9658_v7 = vsel %vm10531_vm14, %v3406_v3, %v3408_v11  ;;  %v9671_v6 = vsel %vm10536_vm7, %v3408_v11, %v3410_v13  ;;  %v3412_v62 = vrot.slane %v10459_v57, 4  ;;  %v3593_v3 = vrot.slane %v8989_v46, 6  ;;  %vm10558_vm7 = vmmov %vm10523_vm2 }
 0x423   : > { %10532 = vst [vmem:[#allocation23_spill] sm:$0xff] %v9658_v7  ;;  %10537 = vst [vmem:[#allocation18_spill] sm:$0xff] %v9671_v6 }
 0x424   : > { %4498 = vmatmul.mubr.f32.gmra.mrb[10].mxu1 %v3296_v49  ;;  %4203 = vmatmul.mubr.f32.gmra.mrb[98].mxu0 %v3159_v21  ;;  %v10533_v21 = vrot.slane %v8587_v8, 2  ;;  %v9680_v59 = vsel %vm10540_vm8, %v3410_v13, %v3412_v62  ;;  %v3594_v49 = vrot.slane %v9012_v2, 6  ;;  %v3598_v13 = vrot.slane %v8797_v16, 6 }
 0x425   : > { %4502 = vmatprep.mubr.f32.mxu1 %v9649_v61  ;;  %4207 = vmatprep.mubr.f32.mxu0 %v9072_v14  ;;  %10541 = vst [vmem:[#allocation19_spill] sm:$0xff] %v9680_v59  ;;  %vm10564_vm8 = vcmask 1042432  }
 0x426   : > { %v3167_v29 = vsel %vm547_vm0, %v10534_v12, %v10533_v21  ;;  %vm10539_vm0 = vmmov %vm10525_vm1  ;;  %v3595_v21 = vsel %vm10546_vm5, %v3593_v3, %v3594_v49  ;;  %v3416_v12 = vrot.slane %v10472_v32, 4 }
 0x427   : > { %vm10543_vm9 = vmmov %vm10539_vm0 }
 0x428   : > { %4503 = vmatmul.mubr.f32.gmra.mrb[12].mxu1 %v3298_v63  ;;  %4208 = vmatmul.mubr.f32.gmra.mrb[100].mxu0 %v10524_v18  ;;  %v3302_v18 = vsel %vm10539_vm0, %v3299_v48, %v3301_v41  ;;  %v3304_v11 = vsel %vm10543_vm9, %v3301_v41, %v3303_v54  ;;  %v3305_v63 = vrot.slane %v10470_v47, 3  ;;  %v3596_v48 = vrot.slane %v9093_v24, 6  ;;  %vm10547_vm4 = vmmov %vm10539_vm0 }
 0x429   : > { %4507 = vmatprep.mubr.f32.mxu1 %v9658_v7  ;;  %4212 = vmatprep.mubr.f32.mxu0 %v3167_v29  ;;  %vm10550_vm1 = vmmov %vm10546_vm5 }
 0x42a   : > { %v3306_v41 = vsel %vm10547_vm4, %v3303_v54, %v3305_v63  ;;  %v3599_v3 = vsel %vm10550_vm1, %v3596_v48, %v3598_v13  ;;  %vm10551_vm6 = vmmov %vm10539_vm0 }
 0x42b   : > { %vm10552_vm12 = vmmov %vm10550_vm1 }
 0x42c   : > { %4508 = vmatmul.mubr.f32.gmra.mrb[14].mxu1 %v3300_v31  ;;  %4213 = vmatmul.mubr.f32.gmra.mrb[102].mxu0 %v9029_v22  ;;  %v3414_v22 = vrot.slane %v10470_v47, 4  ;;  %v3307_v31 = vrot.slane %v10472_v32, 3  ;;  %vm10556_vm14 = vmmov %vm10550_vm1 }
 0x42d   : > { %4512 = vmatprep.mubr.f32.mxu1 %v9671_v6  ;;  %4217 = vmatprep.mubr.f32.mxu0 %v10538_v25  ;;  %v3597_v25 = vsel %vm10548_vm10, %v3594_v49, %v3596_v48  ;;  %v10555_v48 = vrot.slane %v8930_v40, 6  ;;  %vm10557_vm15 = vmmov %vm10539_vm0 }
 0x42e   : > { %v3308_v49 = vsel %vm10551_vm6, %v3305_v63, %v3307_v31  ;;  %vm10562_vm0 = vmmov %vm10550_vm1 }
 0x42f   : > { %vm10566_vm9 = vmmov %vm10547_vm4 }
 0x430   : > { %4513 = vmatmul.mubr.f32.gmra.mrb[16].mxu1 %v3302_v18  ;;  %4218 = vmatmul.mubr.f32.gmra.mrb[104].mxu0 %v9072_v14  ;;  %v9691_v14 = vsel %vm10544_vm3, %v3412_v62, %v3414_v22  ;;  %v9702_v62 = vsel %vm10523_vm2, %v3414_v22, %v3416_v12  ;;  %v3309_v22 = vrot.slane %v10479_v5, 3  ;;  %vm10567_vm3 = vmmov %vm10523_vm2 }
 0x431   : > { %4517 = vmatprep.mubr.f32.mxu1 %v9680_v59  ;;  %4222 = vmatprep.mubr.f32.mxu0 %v10542_v17  ;;  %10545 = vst [vmem:[#allocation24_spill] sm:$0xff] %v9691_v14  ;;  %10549 = vst [vmem:[#allocation20_spill] sm:$0xff] %v9702_v62  ;;  %v3418_v17 = vrot.slane %v10479_v5, 4  ;;  %v2952_v59 = vpop.permute.xlu1 %2951 }
 0x432   : > { %vm10570_vm5 = vmmov %vm10562_vm0 }
 0x433   : > { %vm10571_vm10 = vmmov %vm10551_vm6 }
 0x434   : > { %4518 = vmatmul.mubr.f32.gmra.mrb[18].mxu1 %v3304_v11  ;;  %4223 = vmatmul.mubr.f32.gmra.mrb[106].mxu0 %v3167_v29  ;;  %v3600_v29 = vrot.slane %v9120_v33, 6  ;;  %vm10572_vm2 = vmmov %vm10562_vm0 }
 0x435   : > { %4522 = vmatprep.mubr.f32.mxu1 %v9691_v14  ;;  %5593 = vmatprep.mubr.f32.mxu0 %v3595_v21  ;;  %v3614_v14 = vrot.slane %v10441_v9, 6  ;;  %vm10573_vm1 = vmmov %vm10562_vm0 }
 0x436   : > { %vm10574_vm6 = vmmov %vm10567_vm3 }
 0x438   : > { %v2576_v18 = vpop.f32.mrb[78].mxu0  ;;  %4523 = vmatmul.mubr.f32.gmra.mrb[20].mxu1 %v3306_v41  ;;  %5594 = vmatmul.mubr.f32.vlgmr.msra.gmra.mrb[154].mxu0 %v3597_v25  ;;  %v3601_v41 = vsel %vm10552_vm12, %v3598_v13, %v3600_v29  ;;  %v9712_v25 = vsel %vm10553_vm13, %v3416_v12, %v3418_v17  ;;  %v3310_v13 = vsel %vm10557_vm15, %v3307_v31, %v3309_v22  ;;  %v3610_v31 = vrot.slane %v8587_v8, 6  ;;  %vm10576_vm12 = vmmov %vm10562_vm0 }
 0x439   : > { %v2577_v11 = vadd.f32 %v9153_v23, %v2576_v18  ;;  %4527 = vmatprep.mubr.f32.mxu1 %v9702_v62  ;;  %5596 = vmatprep.mubr.f32.mxu0 %v3599_v3  ;;  %v5557_v54 = vpop.f32.mrb[79].mxu0  ;;  %10554 = vst [vmem:[#allocation25_spill] sm:$0xff] %v9712_v25  ;;  %v3603_v23 = vsel %vm10556_vm14, %v3600_v29, %v10555_v48  ;;  %v3420_v18 = vrot.slane %v8805_v60, 4  ;;  %v2947_v3 = vpop.permute.xlu0 %2946  ;;  %v3422_v29 = vrot.slane %v8874_v0, 4  ;;  %vm10577_vm13 = vmmov %vm10567_vm3 }
 0x43a   : > { %vm10578_vm14 = vmmov %vm10562_vm0 }
 0x43b   : > { %vm2624_vm11 = vcmp.gt.f32.partialorder %v2577_v11, 0.0  ;;  %v2665_v21 = vmul.f32 0.1, %v2577_v11  ;;  %v9724_v12 = vsel %vm10558_vm7, %v3418_v17, %v3420_v18  ;;  %v10563_v17 = vrot.slane %v9297_v56, 5  ;;  %vm10579_vm15 = vmmov %vm10562_vm0 }
 0x43c   : > { %4528 = vmatmul.mubr.f32.gmra.mrb[22].mxu1 %v3308_v49  ;;  %5597 = vmatmul.mubr.f32.gmra.mrb[156].mxu0 %v3601_v41  ;;  %v3311_v49 = vrot.slane %v8805_v60, 3  ;;  %10559 = vst [vmem:[#allocation29_spill] sm:$0xff] %v9724_v12  ;;  %v10560_v41 = vld [vmem:[#allocation31_spill] sm:$0xff]  ;;  %vm10580_vm7 = vmmov %vm10564_vm8 }
 0x43d   : > { %v2706_v54 = vsel %vm2624_vm11, %v2577_v11, %v2665_v21  ;;  %4532 = vmatprep.mubr.f32.mxu1 %v9712_v25  ;;  %5599 = vmatprep.mubr.f32.mxu0 %v3603_v23  ;;  %v10561_v21 = vrot.slane %v9297_v56, 6  ;;  %vm10575_vm11 = vmmov %vm10566_vm9 }
 0x43e   : > { %v9719_v63 = vmul.f32 %v2947_v3, %v2706_v54 }
 0x440   : > { %4533 = vmatmul.mubr.f32.gmra.mrb[24].mxu1 %v3310_v13  ;;  %5600 = vmatmul.mubr.f32.gmra.mrb[158].mxu0 %v10560_v41  ;;  %v3662_v48 = vrot.slane %v9719_v63, 6  ;;  %v3553_v11 = vrot.slane %v9719_v63, 5  ;;  %v3312_v13 = vsel %vm10566_vm9, %v3309_v22, %v3311_v49  ;;  %v3313_v41 = vrot.slane %v8874_v0, 3 }
 0x441   : > { %4537 = vmatprep.mubr.f32.mxu1 %v9724_v12  ;;  %5602 = vmatprep.mubr.f32.mxu0 %v9035_v39  ;;  %v3612_v12 = vrot.slane %v8597_v34, 6  ;;  %v6171_v39 = vld [vmem:[%s10281_s2] ss:$0 sm:$0xff]  ;;  %v3424_v22 = vrot.slane %v8933_v50, 4 }
 0x442   : > { %v9736_v23 = vsel %vm10562_vm0, %v10561_v21, %v3662_v48  ;;  %v9741_v3 = vsel %vm10564_vm8, %v10563_v17, %v3553_v11  ;;  %v9750_v21 = vsel %vm10567_vm3, %v3420_v18, %v3422_v29  ;;  %v10569_v17 = vrot.slane %v9014_v55, 6  ;;  %vm10581_vm0 = vmmov %vm10567_vm3 }
 0x443   : > { %10565 = vst [vmem:[#allocation26_spill] sm:$0xff] %v9741_v3  ;;  %v2581_v54 = vpop.f32.mrb[80].mxu0  ;;  %10568 = vst [vmem:[#allocation27_spill] sm:$0xff] %v9750_v21  ;;  %v3616_v18 = vrot.slane %v10444_v35, 6 }
 0x444   : > { %v2582_v25 = vadd.f32 %v6171_v39, %v2581_v54  ;;  %4538 = vmatmul.mubr.f32.gmra.mrb[26].mxu1 %v3312_v13  ;;  %5603 = vmatmul.mubr.f32.gmra.mrb[160].mxu0 %v9080_v19  ;;  %v3611_v3 = vsel %vm10570_vm5, %v10569_v17, %v3610_v31  ;;  %v5560_v62 = vpop.f32.mrb[81].mxu0  ;;  %v3315_v13 = vrot.slane %v8933_v50, 3  ;;  %v3314_v19 = vsel %vm10571_vm10, %v3311_v49, %v3313_v41  ;;  %vm10583_vm8 = vmmov %vm10566_vm9 }
 0x445   : > { %4542 = vmatprep.mubr.f32.mxu1 %v9750_v21  ;;  %5605 = vmatprep.mubr.f32.mxu0 %v3611_v3  ;;  %v3613_v39 = vsel %vm10572_vm2, %v3610_v31, %v3612_v12  ;;  %v3615_v17 = vsel %vm10573_vm1, %v3612_v12, %v3614_v14  ;;  %v9765_v62 = vsel %vm10574_vm6, %v3422_v29, %v3424_v22  ;;  %v3426_v3 = vrot.slane %v9054_v36, 4  ;;  %vm10584_vm9 = vmmov %vm10573_vm1 }
 0x446   : > { %vm2625_vm4 = vcmp.gt.f32.partialorder %v2582_v25, 0.0  ;;  %v2666_v54 = vmul.f32 0.1, %v2582_v25  ;;  %v3618_v21 = vrot.slane %v10446_v1, 6  ;;  %v3316_v49 = vsel %vm10575_vm11, %v3313_v41, %v3315_v13  ;;  %vm10585_vm3 = vmmov %vm10581_vm0 }
 0x447   : > { %v3617_v31 = vsel %vm10576_vm12, %v3614_v14, %v3616_v18  ;;  %v3317_v12 = vrot.slane %v9054_v36, 3  ;;  %v10378_v29 = vrot.slane %v9719_v63, 4  ;;  %v9776_v61 = vsel %vm10577_vm13, %v3424_v22, %v3426_v3  ;;  %vm10586_vm5 = vmmov %vm10573_vm1 }
 0x448   : > { %v2707_v6 = vsel %vm2625_vm4, %v2582_v25, %v2666_v54  ;;  %4543 = vmatmul.mubr.f32.gmra.mrb[28].mxu1 %v3314_v19  ;;  %5606 = vmatmul.mubr.f32.gmra.mrb[162].mxu0 %v3613_v39  ;;  %v3620_v25 = vrot.slane %v10448_v51, 6  ;;  %v3622_v14 = vrot.slane %v10450_v44, 6  ;;  %vm10587_vm4 = vmmov %vm10583_vm8 }
 0x449   : > { %v2994_v7 = vmul.f32 %v2952_v59, %v2707_v6  ;;  %4547 = vmatprep.mubr.f32.mxu1 %v9765_v62  ;;  %5608 = vmatprep.mubr.f32.mxu0 %v3615_v17  ;;  %v3619_v6 = vsel %vm10578_vm14, %v3616_v18, %v3618_v21  ;;  %v3428_v59 = vrot.slane %v9128_v15, 4  ;;  %v3318_v22 = vsel %vm10583_vm8, %v3315_v13, %v3317_v12  ;;  %vm10588_vm10 = vmmov %vm10573_vm1 }
 0x44a   : > { %v3621_v18 = vsel %vm10584_vm9, %v3618_v21, %v3620_v25  ;;  %vm10589_vm2 = vmmov %vm10581_vm0 }
 0x44b   : > { %v3664_v54 = vrot.slane %v2994_v7, 6  ;;  %v3555_v19 = vrot.slane %v2994_v7, 5  ;;  %v3480_v39 = vrot.slane %v2994_v7, 4  ;;  %vm10590_vm6 = vmmov %vm10587_vm4 }
 0x44c   : > { %4548 = vmatmul.mubr.f32.gmra.mrb[30].mxu1 %v3316_v49  ;;  %5609 = vmatmul.mubr.f32.gmra.mrb[164].mxu0 %v3617_v31  ;;  %v3319_v49 = vrot.slane %v9128_v15, 3  ;;  %v3624_v31 = vrot.slane %v10452_v42, 6  ;;  %vm10591_vm11 = vmmov %vm10573_vm1 }
 0x44d   : > { %4552 = vmatprep.mubr.f32.mxu1 %v9776_v61  ;;  %5611 = vmatprep.mubr.f32.mxu0 %v3619_v6  ;;  %v9783_v41 = vsel %vm10579_vm15, %v3662_v48, %v3664_v54  ;;  %v9786_v17 = vsel %vm10580_vm7, %v3553_v11, %v3555_v19  ;;  %v9791_v7 = vsel %vm10581_vm0, %v10378_v29, %v3480_v39  ;;  %v3430_v54 = vrot.slane %v9162_v10, 4  ;;  %vm10592_vm12 = vmmov %vm10581_vm0 }
 0x44e   : > { %10582 = vst [vmem:[#allocation30_spill] sm:$0xff] %v9791_v7  ;;  %v9798_v48 = vsel %vm10585_vm3, %v3426_v3, %v3428_v59  ;;  %v3623_v11 = vsel %vm10586_vm5, %v3620_v25, %v3622_v14  ;;  %v3626_v19 = vrot.slane %v10453_v26, 6  ;;  %v3320_v21 = vsel %vm10587_vm4, %v3317_v12, %v3319_v49  ;;  %vm10593_vm13 = vmmov %vm10573_vm1  ;;  %v10611_v7 = vld [vmem:[#allocation8_spill] sm:$0xff] }
 0x44f   : > { %v3625_v13 = vsel %vm10588_vm10, %v3622_v14, %v3624_v31  ;;  %v3321_v39 = vrot.slane %v9162_v10, 3  ;;  %v3628_v6 = vrot.slane %v10454_v20, 6  ;;  %v9809_v3 = vsel %vm10589_vm2, %v3428_v59, %v3430_v54  ;;  %vm10594_vm14 = vmmov %vm10587_vm4 }
 0x450   : > { %4553 = vmatmul.mubr.f32.gmra.mrb[32].mxu1 %v3318_v22  ;;  %5612 = vmatmul.mubr.f32.gmra.mrb[166].mxu0 %v3621_v18  ;;  %v3627_v25 = vsel %vm10573_vm1, %v3624_v31, %v3626_v19  ;;  %v3432_v22 = vrot.slane %v9193_v30, 4  ;;  %v3630_v18 = vrot.slane %v10455_v58, 6  ;;  %vm10595_vm15 = vmmov %vm10573_vm1  ;;  %v3642_v29 = vrot.slane %v8805_v60, 6 }
 0x451   : > { %4557 = vmatprep.mubr.f32.mxu1 %v9798_v48  ;;  %5614 = vmatprep.mubr.f32.mxu0 %v3623_v11  ;;  %v3322_v12 = vsel %vm10590_vm6, %v3319_v49, %v3321_v39  ;;  %v3629_v14 = vsel %vm10591_vm11, %v3626_v19, %v3628_v6  ;;  %v3323_v11 = vrot.slane %v9193_v30, 3  ;;  %vm10597_vm7 = vmmov %vm10581_vm0 }
 0x452   : > { %v9820_v59 = vsel %vm10592_vm12, %v3430_v54, %v3432_v22  ;;  %v3631_v31 = vsel %vm10593_vm13, %v3628_v6, %v3630_v18  ;;  %vm10598_vm0 = vmmov %vm10573_vm1  ;;  %vm10612_vm1 = vcmask 1042432  }
 0x453   : > { %v3324_v49 = vsel %vm10594_vm14, %v3321_v39, %v3323_v11  ;;  %v10599_v39 = vrot.slane %v9229_v28, 3  ;;  %vm10600_vm8 = vmmov %vm10587_vm4 }
 0x454   : > { %4558 = vmatmul.mubr.f32.gmra.mrb[34].mxu1 %v3320_v21  ;;  %5615 = vmatmul.mubr.f32.gmra.mrb[168].mxu0 %v3625_v13  ;;  %v3632_v21 = vrot.slane %v10456_v45, 6  ;;  %v3634_v13 = vrot.slane %v10459_v57, 6  ;;  %vm10601_vm9 = vmmov %vm10598_vm0 }
 0x455   : > { %4562 = vmatprep.mubr.f32.mxu1 %v9809_v3  ;;  %5617 = vmatprep.mubr.f32.mxu0 %v3627_v25  ;;  %v3636_v25 = vrot.slane %v10470_v47, 6  ;;  %vm10602_vm3 = vmmov %vm10598_vm0 }
 0x456   : > { %v3633_v19 = vsel %vm10595_vm15, %v3630_v18, %v3632_v21  ;;  %v3635_v6 = vsel %vm10598_vm0, %v3632_v21, %v3634_v13  ;;  %v3326_v18 = vsel %vm10600_vm8, %v3323_v11, %v10599_v39  ;;  %v3438_v21 = vrot.slane %v9297_v56, 4  ;;  %vm10604_vm5 = vmmov %vm10598_vm0  ;;  %v10607_v39 = vld [vmem:[#allocation7_spill] sm:$0xff] }
 0x457   : > { %vm10605_vm4 = vmmov %vm10598_vm0  ;;  %v3644_v11 = vrot.slane %v8874_v0, 6 }
 0x458   : > { %4563 = vmatmul.mubr.f32.gmra.mrb[36].mxu1 %v3322_v12  ;;  %5618 = vmatmul.mubr.f32.gmra.mrb[170].mxu0 %v3629_v14  ;;  %v10596_v12 = vrot.slane %v9229_v28, 4  ;;  %v3638_v14 = vrot.slane %v10472_v32, 6  ;;  %vm10609_vm10 = vmmov %vm10589_vm2 }
 0x459   : > { %4567 = vmatprep.mubr.f32.mxu1 %v9820_v59  ;;  %5620 = vmatprep.mubr.f32.mxu0 %v3631_v31  ;;  %v3637_v31 = vsel %vm10601_vm9, %v3634_v13, %v3636_v25  ;;  %v10606_v13 = vld [vmem:[#allocation21_spill] sm:$0xff]  ;;  %vm10610_vm2 = vmmov %vm10598_vm0 }
 0x45a   : > { %v9831_v54 = vsel %vm10597_vm7, %v3432_v22, %v10596_v12  ;;  %v3639_v22 = vsel %vm10602_vm3, %v3636_v25, %v3638_v14  ;;  %v3484_v25 = vrot.slane %v8989_v46, 5  ;;  %vm10613_vm6 = vmmov %vm10598_vm0  ;;  %v3487_v46 = vrot.slane %v9093_v24, 5 }
 0x45b   : > { %vm10614_vm11 = vmmov %vm10598_vm0 }
 0x45c   : > { %4568 = vmatmul.mubr.f32.gmra.mrb[38].mxu1 %v3324_v49  ;;  %5621 = vmatmul.mubr.f32.gmra.mrb[172].mxu0 %v3633_v19  ;;  %v3640_v49 = vrot.slane %v10479_v5, 6  ;;  %v10603_v19 = vld [vmem:[#allocation2_spill] sm:$0xff]  ;;  %vm10615_vm12 = vmmov %vm10612_vm1 }
 0x45d   : > { %4572 = vmatprep.mubr.f32.mxu1 %v9831_v54  ;;  %5623 = vmatprep.mubr.f32.mxu0 %v3635_v6  ;;  %vm10616_vm13 = vmmov %vm10598_vm0 }
 0x45e   : > { %v3641_v12 = vsel %vm10604_vm5, %v3638_v14, %v3640_v49  ;;  %v3643_v6 = vsel %vm10605_vm4, %v3640_v49, %v3642_v29  ;;  %v3646_v14 = vrot.slane %v8933_v50, 6  ;;  %v3645_v49 = vsel %vm10610_vm2, %v3642_v29, %v3644_v11  ;;  %vm10617_vm14 = vmmov %vm10598_vm0 }
 0x45f   : > { %vm10618_vm15 = vmmov %vm10612_vm1 }
 0x460   : > { %4573 = vmatmul.mubr.f32.gmra.mrb[40].mxu1 %v3326_v18  ;;  %5624 = vmatmul.mubr.f32.gmra.mrb[174].mxu0 %v3637_v31  ;;  %v10608_v18 = vrot.slane %v10607_v39, 4  ;;  %vm10619_vm7 = vmmov %vm10598_vm0 }
 0x461   : > { %4577 = vmatprep.mubr.f32.mxu1 %v10603_v19  ;;  %5626 = vmatprep.mubr.f32.mxu0 %v3639_v22  ;;  %v3485_v22 = vrot.slane %v9012_v2, 5  ;;  %v3650_v2 = vrot.slane %v9128_v15, 6  ;;  %vm10621_vm8 = vmmov %vm10612_vm1 }
 0x462   : > { %v9854_v31 = vsel %vm10609_vm10, %v10608_v18, %v3438_v21  ;;  %vm10624_vm9 = vmmov %vm10612_vm1 }
 0x463   : > { %v3486_v39 = vsel %vm10612_vm1, %v3484_v25, %v3485_v22  ;;  %v3488_v29 = vsel %vm10615_vm12, %v3485_v22, %v3487_v46  ;;  %v3489_v25 = vrot.slane %v8797_v16, 5  ;;  %v3491_v22 = vrot.slane %v9120_v33, 5  ;;  %vm10634_vm3 = vmmov %vm10612_vm1 }
 0x464   : > { %4578 = vmatmul.mubr.f32.gmra.mrb[42].mxu1 %v10606_v13  ;;  %5627 = vmatmul.mubr.f32.gmra.mrb[176].mxu0 %v3641_v12  ;;  %v3648_v13 = vrot.slane %v9054_v36, 6  ;;  %v3647_v12 = vsel %vm10613_vm6, %v3644_v11, %v3646_v14  ;;  %v3654_v11 = vrot.slane %v9193_v30, 6  ;;  %vm10636_vm5 = vmmov %vm10612_vm1 }
 0x465   : > { %4582 = vmatprep.mubr.f32.mxu1 %v9854_v31  ;;  %5629 = vmatprep.mubr.f32.mxu0 %v3643_v6  ;;  %v3652_v6 = vrot.slane %v9162_v10, 6  ;;  %vm10638_vm4 = vmmov %vm10612_vm1 }
 0x466   : > { %v3649_v18 = vsel %vm10614_vm11, %v3646_v14, %v3648_v13  ;;  %v3490_v14 = vsel %vm10618_vm15, %v3487_v46, %v3489_v25  ;;  %vm10640_vm10 = vmmov %vm10612_vm1 }
 0x467   : > { %v3653_v24 = vsel %vm10617_vm14, %v3650_v2, %v3652_v6  ;;  %vm10642_vm2 = vmmov %vm10612_vm1 }
 0x468   : > { %4583 = vmatmul.mubr.f32.gmra.mrb[44].mxu1 %v10611_v7  ;;  %5630 = vmatmul.mubr.f32.gmra.mrb[178].mxu0 %v3645_v49  ;;  %v3651_v7 = vsel %vm10616_vm13, %v3648_v13, %v3650_v2  ;;  %v10620_v49 = vrot.slane %v9229_v28, 6  ;;  %v3492_v13 = vsel %vm10621_vm8, %v3489_v25, %v3491_v22  ;;  %v10630_v25 = vld [vmem:[#allocation33_spill] sm:$0xff]  ;;  %vm10645_vm6 = vmmov %vm10612_vm1 }
 0x469   : > { %4652 = vmatprep.mubr.f32.mxu1 %v3486_v39  ;;  %5632 = vmatprep.mubr.f32.mxu0 %v3647_v12  ;;  %v10623_v39 = vrot.slane %v8930_v40, 5  ;;  %v10625_v12 = vld [vmem:[#allocation4_spill] sm:$0xff]  ;;  %vm10646_vm11 = vmmov %vm10612_vm1 }
 0x46a   : > { %v3657_v16 = vsel %vm10598_vm0, %v3654_v11, %v10620_v49  ;;  %vm10647_vm12 = vmmov %vm10612_vm1 }
 0x46b   : > { %v3494_v33 = vsel %vm10624_vm9, %v3491_v22, %v10623_v39  ;;  %v10633_v22 = vrot.slane %v9014_v55, 5  ;;  %vm10648_vm13 = vmmov %vm10612_vm1 }
 0x46c   : > { %4653 = vmatmul.mubr.f32.vlgmr.msra.gmra.mrb[46].mxu1 %v9360_v38  ;;  %5633 = vmatmul.mubr.f32.gmra.mrb[180].mxu0 %v3649_v18  ;;  %v3655_v38 = vsel %vm10619_vm7, %v3652_v6, %v3654_v11  ;;  %v10627_v18 = vld [vmem:[#allocation32_spill] sm:$0xff]  ;;  %vm10651_vm14 = vmmov %vm10612_vm1 }
 0x46d   : > { %4657 = vmatprep.mubr.f32.mxu1 %v3488_v29  ;;  %5635 = vmatprep.mubr.f32.mxu0 %v3651_v7  ;;  %v10629_v29 = vld [vmem:[#allocation35_spill] sm:$0xff]  ;;  %v10631_v11 = vld [vmem:[#allocation36_spill] sm:$0xff]  ;;  %vm10654_vm15 = vmmov %vm10612_vm1 }
 0x46e   : > { %vm10657_vm7 = vmmov %vm10612_vm1 }
 0x46f   : > { %vm10660_vm0 = vmmov %vm10612_vm1 }
 0x470   : > { %4658 = vmatmul.mubr.f32.gmra.mrb[48].mxu1 %v9377_v52  ;;  %5636 = vmatmul.mubr.f32.gmra.mrb[182].mxu0 %v3653_v24  ;;  %v10622_v52 = vld [vmem:[#allocation6_spill] sm:$0xff]  ;;  %v3501_v24 = vrot.slane %v8587_v8, 5  ;;  %v3505_v8 = vrot.slane %v10441_v9, 5  ;;  %vm10663_vm8 = vmmov %vm10660_vm0 }
 0x471   : > { %4662 = vmatprep.mubr.f32.mxu1 %v3490_v14  ;;  %5638 = vmatprep.mubr.f32.mxu0 %v3655_v38  ;;  %vm10666_vm9 = vmmov %vm10660_vm0 }
 0x472   : > { %v3502_v49 = vsel %vm10634_vm3, %v10633_v22, %v3501_v24  ;;  %vm10669_vm3 = vmmov %vm10660_vm0 }
 0x474   : > { %4663 = vmatmul.mubr.f32.gmra.mrb[50].mxu1 %v9394_v43  ;;  %5639 = vmatmul.mubr.f32.gmra.mrb[184].mxu0 %v3657_v16  ;;  %v10626_v43 = vld [vmem:[#allocation5_spill] sm:$0xff]  ;;  %v3503_v16 = vrot.slane %v8597_v34, 5  ;;  %v3507_v34 = vrot.slane %v10444_v35, 5  ;;  %v3511_v35 = vrot.slane %v10448_v51, 5  ;;  %v3515_v51 = vrot.slane %v10452_v42, 5 }
 0x475   : > { %4667 = vmatprep.mubr.f32.mxu1 %v3492_v13  ;;  %5641 = vmatprep.mubr.f32.mxu0 %v10622_v52  ;;  %v10635_v52 = vld [vmem:[#allocation11_spill] sm:$0xff]  ;;  %v3519_v42 = vrot.slane %v10454_v20, 5  ;;  %v3523_v20 = vrot.slane %v10456_v45, 5  ;;  %v3527_v45 = vrot.slane %v10470_v47, 5  ;;  %v3531_v47 = vrot.slane %v10479_v5, 5 }
 0x476   : > { %v3535_v5 = vrot.slane %v8874_v0, 5  ;;  %v3539_v0 = vrot.slane %v9054_v36, 5  ;;  %v3543_v36 = vrot.slane %v9162_v10, 5 }
 0x478   : > { %4668 = vmatmul.mubr.f32.gmra.mrb[52].mxu1 %v9411_v27  ;;  %5642 = vmatmul.mubr.f32.gmra.mrb[186].mxu0 %v10625_v12  ;;  %v10628_v27 = vld [vmem:[#allocation28_spill] sm:$0xff] }
 0x479   : > { %4672 = vmatprep.mubr.f32.mxu1 %v3494_v33  ;;  %5644 = vmatprep.mubr.f32.mxu0 %v9736_v23  ;;  %v3504_v33 = vsel %vm10636_vm5, %v3501_v24, %v3503_v16  ;;  %vm10672_vm5 = vmmov %vm10660_vm0 }
 0x47b   : > { %v9891_v46 = vpop.f32.mrb[108].mxu0 }
 0x47c   : > { %4673 = vmatmul.mubr.f32.gmra.mrb[54].mxu1 %v10626_v43  ;;  %v3986_v2 = vpop.f32.mrb[109].mxu0  ;;  %5645 = vmatmul.mubr.f32.gmra.mrb[188].mxu0 %v9783_v41  ;;  %v10632_v41 = vld [vmem:[#allocation34_spill] sm:$0xff] }
 0x47d   : > { %4677 = vmatprep.mubr.f32.mxu1 %v10627_v18  ;;  %v10637_v43 = vld [vmem:[#allocation22_spill] sm:$0xff]  ;;  %v3506_v2 = vsel %vm10638_vm4, %v3503_v16, %v3505_v8  ;;  %vm10675_vm4 = vmmov %vm10660_vm0 }
 0x47f   : > { %v9896_v6 = vpop.f32.mrb[110].mxu0 }
 0x480   : > { %4678 = vmatmul.mubr.f32.gmra.mrb[56].mxu1 %v10628_v27  ;;  %v3991_v40 = vpop.f32.mrb[111].mxu0  ;;  %v10639_v27 = vld [vmem:[#allocation13_spill] sm:$0xff] }
 0x481   : > { %4682 = vmatprep.mubr.f32.mxu1 %v10629_v29  ;;  %v3508_v29 = vsel %vm10640_vm10, %v3505_v8, %v3507_v34  ;;  %vm10677_vm10 = vmmov %vm10660_vm0 }
 0x483   : > { %v9900_v7 = vpop.f32.mrb[112].mxu0 }
 0x484   : > { %4683 = vmatmul.mubr.f32.gmra.mrb[58].mxu1 %v10630_v25  ;;  %v3996_v23 = vpop.f32.mrb[113].mxu0  ;;  %v3509_v25 = vrot.slane %v10446_v1, 5  ;;  %v3513_v1 = vrot.slane %v10450_v44, 5  ;;  %v3517_v44 = vrot.slane %v10453_v26, 5  ;;  %v3521_v26 = vrot.slane %v10455_v58, 5 }
 0x485   : > { %4687 = vmatprep.mubr.f32.mxu1 %v10631_v11  ;;  %v10641_v23 = vld [vmem:[#allocation14_spill] sm:$0xff]  ;;  %v3525_v58 = vrot.slane %v10459_v57, 5  ;;  %v3529_v57 = vrot.slane %v10472_v32, 5  ;;  %v3533_v32 = vrot.slane %v8805_v60, 5  ;;  %v3537_v60 = vrot.slane %v8933_v50, 5 }
 0x486   : > { %v3510_v24 = vsel %vm10642_vm2, %v3507_v34, %v3509_v25  ;;  %v3541_v50 = vrot.slane %v9128_v15, 5  ;;  %vm10678_vm2 = vmmov %vm10660_vm0  ;;  %v3545_v15 = vrot.slane %v9193_v30, 5 }
 0x487   : > { %v9905_v14 = vpop.f32.mrb[114].mxu0 }
 0x488   : > { %4688 = vmatmul.mubr.f32.gmra.mrb[60].mxu1 %v10632_v41  ;;  %v4001_v38 = vpop.f32.mrb[115].mxu0 }
 0x489   : > { %4692 = vmatprep.mubr.f32.mxu1 %v3502_v49  ;;  %v10643_v38 = vld [vmem:[#allocation15_spill] sm:$0xff]  ;;  %v3512_v49 = vsel %vm10612_vm1, %v3509_v25, %v3511_v35  ;;  %vm10679_vm1 = vmmov %vm10660_vm0 }
 0x48b   : > { %v9912_v13 = vpop.f32.mrb[116].mxu0 }
 0x48c   : > { %4693 = vmatmul.mubr.f32.gmra.mrb[62].mxu1 %v10635_v52  ;;  %v4006_v39 = vpop.f32.mrb[117].mxu0  ;;  %v10644_v52 = vld [vmem:[#allocation16_spill] sm:$0xff] }
 0x48d   : > { %4697 = vmatprep.mubr.f32.mxu1 %v3504_v33  ;;  %v3514_v33 = vsel %vm10645_vm6, %v3511_v35, %v3513_v1  ;;  %v10653_v35 = vld [vmem:[#allocation23_spill] sm:$0xff]  ;;  %vm10680_vm6 = vmmov %vm10660_vm0 }
 0x48f   : > { %v9917_v12 = vpop.f32.mrb[118].mxu0 }
 0x490   : > { %4698 = vmatmul.mubr.f32.gmra.mrb[64].mxu1 %v10637_v43  ;;  %v4011_v55 = vpop.f32.mrb[119].mxu0 }
 0x491   : > { %4702 = vmatprep.mubr.f32.mxu1 %v3506_v2  ;;  %v3516_v55 = vsel %vm10646_vm11, %v3513_v1, %v3515_v51  ;;  %vm10682_vm11 = vmmov %vm10660_vm0 }
 0x493   : > { %v9922_v18 = vpop.f32.mrb[120].mxu0 }
 0x494   : > { %4703 = vmatmul.mubr.f32.gmra.mrb[66].mxu1 %v10639_v27  ;;  %v4016_v40 = vpop.f32.mrb[121].mxu0  ;;  %v3518_v27 = vsel %vm10647_vm12, %v3515_v51, %v3517_v44  ;;  %vm10687_vm12 = vcmask 1043456  }
 0x495   : > { %4707 = vmatprep.mubr.f32.mxu1 %v3508_v29  ;;  %v3520_v29 = vsel %vm10648_vm13, %v3517_v44, %v3519_v42  ;;  %v10662_v44 = vld [vmem:[#allocation24_spill] sm:$0xff] }
 0x497   : > { %v9927_v9 = vpop.f32.mrb[122].mxu0 }
 0x498   : > { %4708 = vmatmul.mubr.f32.gmra.mrb[68].mxu1 %v10641_v23  ;;  %v4021_v11 = vpop.f32.mrb[123].mxu0  ;;  %v10650_v23 = vld [vmem:[#allocation17_spill] sm:$0xff] }
 0x499   : > { %4712 = vmatprep.mubr.f32.mxu1 %v3510_v24  ;;  %v3522_v11 = vsel %vm10651_vm14, %v3519_v42, %v3521_v26 }
 0x49b   : > { %v9932_v41 = vpop.f32.mrb[124].mxu0 }
 0x49c   : > { %4713 = vmatmul.mubr.f32.gmra.mrb[70].mxu1 %v10643_v38  ;;  %v4026_v22 = vpop.f32.mrb[125].mxu0  ;;  %v3524_v38 = vsel %vm10654_vm15, %v3521_v26, %v3523_v20  ;;  %v3532_v26 = vsel %vm10666_vm9, %v3529_v57, %v3531_v47 }
 0x49d   : > { %4717 = vmatprep.mubr.f32.mxu1 %v3512_v49  ;;  %v10656_v49 = vld [vmem:[#allocation18_spill] sm:$0xff] }
 0x49f   : > { %v9937_v16 = vpop.f32.mrb[126].mxu0 }
 0x4a0   : > { %4718 = vmatmul.mubr.f32.gmra.mrb[0].mxu1 %v10644_v52  ;;  %v4031_v39 = vpop.f32.mrb[127].mxu0  ;;  %v3526_v52 = vsel %vm10657_vm7, %v3523_v20, %v3525_v58  ;;  %v3534_v20 = vsel %vm10669_vm3, %v3531_v47, %v3533_v32  ;;  %v3544_v47 = vsel %vm10679_vm1, %v3541_v50, %v3543_v36 }
 0x4a1   : > { %4722 = vmatprep.mubr.f32.mxu1 %v3514_v33  ;;  %v10659_v33 = vld [vmem:[#allocation19_spill] sm:$0xff] }
 0x4a3   : > { %v9942_v8 = vpop.f32.mrb[128].mxu0 }
 0x4a4   : > { %4723 = vmatmul.mubr.f32.gmra.mrb[2].mxu1 %v9617_v37  ;;  %v4036_v43 = vpop.f32.mrb[129].mxu0 }
 0x4a5   : > { %4727 = vmatprep.mubr.f32.mxu1 %v3516_v55  ;;  %v3528_v43 = vsel %vm10660_vm0, %v3525_v58, %v3527_v45  ;;  %v3536_v58 = vsel %vm10672_vm5, %v3533_v32, %v3535_v5 }
 0x4a7   : > { %v9947_v2 = vpop.f32.mrb[130].mxu0 }
 0x4a8   : > { %4728 = vmatmul.mubr.f32.gmra.mrb[4].mxu1 %v9633_v53  ;;  %v4041_v34 = vpop.f32.mrb[131].mxu0 }
 0x4a9   : > { %4732 = vmatprep.mubr.f32.mxu1 %v3518_v27  ;;  %v3530_v27 = vsel %vm10663_vm8, %v3527_v45, %v3529_v57  ;;  %v3538_v45 = vsel %vm10675_vm4, %v3535_v5, %v3537_v60  ;;  %v10684_v5 = vld [vmem:[#allocation9_spill] sm:$0xff] }
 0x4ab   : > { %v9952_v40 = vpop.f32.mrb[132].mxu0 }
 0x4ac   : > { %4733 = vmatmul.mubr.f32.gmra.mrb[6].mxu1 %v9641_v4  ;;  %v4046_v37 = vpop.f32.mrb[133].mxu0 }
 0x4ad   : > { %4737 = vmatprep.mubr.f32.mxu1 %v3520_v29  ;;  %v10665_v37 = vld [vmem:[#allocation20_spill] sm:$0xff] }
 0x4af   : > { %v9957_v25 = vpop.f32.mrb[134].mxu0 }
 0x4b0   : > { %10649 = vst [vmem:[#allocation10_spill] sm:$0xff] %v9957_v25  ;;  %4738 = vmatmul.mubr.f32.gmra.mrb[8].mxu1 %v10650_v23  ;;  %v4051_v53 = vpop.f32.mrb[135].mxu0 }
 0x4b1   : > { %4742 = vmatprep.mubr.f32.mxu1 %v3522_v11  ;;  %v10668_v53 = vld [vmem:[#allocation25_spill] sm:$0xff] }
 0x4b3   : > { %v9962_v24 = vpop.f32.mrb[136].mxu0 }
 0x4b4   : > { %10652 = vst [vmem:[#allocation12_spill] sm:$0xff] %v9962_v24  ;;  %4743 = vmatmul.mubr.f32.gmra.mrb[10].mxu1 %v10653_v35  ;;  %v4056_v4 = vpop.f32.mrb[137].mxu0 }
 0x4b5   : > { %4747 = vmatprep.mubr.f32.mxu1 %v3524_v38  ;;  %v10671_v4 = vld [vmem:[#allocation29_spill] sm:$0xff] }
 0x4b7   : > { %v9967_v22 = vpop.f32.mrb[138].mxu0 }
 0x4b8   : > { %10655 = vst [vmem:[#allocation31_spill] sm:$0xff] %v9967_v22  ;;  %4748 = vmatmul.mubr.f32.gmra.mrb[12].mxu1 %v10656_v49  ;;  %v4061_v1 = vpop.f32.mrb[139].mxu0 }
 0x4b9   : > { %4752 = vmatprep.mubr.f32.mxu1 %v3526_v52  ;;  %v10674_v1 = vld [vmem:[#allocation27_spill] sm:$0xff] }
 0x4bb   : > { %v9972_v39 = vpop.f32.mrb[140].mxu0 }
 0x4bc   : > { %10658 = vst [vmem:[#allocation2_spill] sm:$0xff] %v9972_v39  ;;  %4753 = vmatmul.mubr.f32.gmra.mrb[14].mxu1 %v10659_v33  ;;  %v4066_v51 = vpop.f32.mrb[141].mxu0 }
 0x4bd   : > { %4757 = vmatprep.mubr.f32.mxu1 %v3528_v43  ;;  %v3540_v43 = vsel %vm10677_vm10, %v3537_v60, %v3539_v0 }
 0x4bf   : > { %v9977_v55 = vpop.f32.mrb[142].mxu0 }
 0x4c0   : > { %10661 = vst [vmem:[#allocation21_spill] sm:$0xff] %v9977_v55  ;;  %4758 = vmatmul.mubr.f32.gmra.mrb[16].mxu1 %v10662_v44  ;;  %v4071_v34 = vpop.f32.mrb[143].mxu0 }
 0x4c1   : > { %4762 = vmatprep.mubr.f32.mxu1 %v3530_v27  ;;  %v3542_v34 = vsel %vm10678_vm2, %v3539_v0, %v3541_v50 }
 0x4c3   : > { %v9982_v42 = vpop.f32.mrb[144].mxu0 }
 0x4c4   : > { %10664 = vst [vmem:[#allocation7_spill] sm:$0xff] %v9982_v42  ;;  %4763 = vmatmul.mubr.f32.gmra.mrb[18].mxu1 %v10665_v37  ;;  %v4076_v29 = vpop.f32.mrb[145].mxu0 }
 0x4c5   : > { %4767 = vmatprep.mubr.f32.mxu1 %v3532_v26  ;;  %v3546_v29 = vsel %vm10680_vm6, %v3543_v36, %v3545_v15 }
 0x4c7   : > { %v9987_v23 = vpop.f32.mrb[146].mxu0 }
 0x4c8   : > { %10667 = vst [vmem:[#allocation8_spill] sm:$0xff] %v9987_v23  ;;  %4768 = vmatmul.mubr.f32.gmra.mrb[20].mxu1 %v10668_v53  ;;  %v4081_v11 = vpop.f32.mrb[147].mxu0 }
 0x4c9   : > { %4772 = vmatprep.mubr.f32.mxu1 %v3534_v20 }
 0x4cb   : > { %v9992_v35 = vpop.f32.mrb[148].mxu0 }
 0x4cc   : > { %10670 = vst [vmem:[#allocation6_spill] sm:$0xff] %v9992_v35  ;;  %4773 = vmatmul.mubr.f32.gmra.mrb[22].mxu1 %v10671_v4  ;;  %v4086_v38 = vpop.f32.mrb[149].mxu0  ;;  %v10685_v4 = vld [vmem:[#allocation26_spill] sm:$0xff] }
 0x4cd   : > { %4777 = vmatprep.mubr.f32.mxu1 %v3536_v58 }
 0x4cf   : > { %v9997_v49 = vpop.f32.mrb[150].mxu0 }
 0x4d0   : > { %10673 = vst [vmem:[#allocation4_spill] sm:$0xff] %v9997_v49  ;;  %4778 = vmatmul.mubr.f32.gmra.mrb[24].mxu1 %v10674_v1  ;;  %v4091_v52 = vpop.f32.mrb[151].mxu0  ;;  %v10688_v1 = vld [vmem:[#allocation30_spill] sm:$0xff] }
 0x4d1   : > { %4782 = vmatprep.mubr.f32.mxu1 %v3538_v45 }
 0x4d3   : > { %v10002_v33 = vpop.f32.mrb[152].mxu0 }
 0x4d4   : > { %10676 = vst [vmem:[#allocation5_spill] sm:$0xff] %v10002_v33  ;;  %4783 = vmatmul.mubr.f32.gmra.mrb[26].mxu1 %v9765_v62  ;;  %v4096_v51 = vpop.f32.mrb[153].mxu0 }
 0x4d5   : > { %4787 = vmatprep.mubr.f32.mxu1 %v3540_v43 }
 0x4d7   : > { %v10007_v57 = vpop.f32.mrb[82].mxu0 }
 0x4d8   : > { %4788 = vmatmul.mubr.f32.gmra.mrb[28].mxu1 %v9776_v61  ;;  %v4166_v44 = vpop.f32.mrb[83].mxu0 }
 0x4d9   : > { %4792 = vmatprep.mubr.f32.mxu1 %v3542_v34 }
 0x4db   : > { %v10012_v27 = vpop.f32.mrb[84].mxu0 }
 0x4dc   : > { %4793 = vmatmul.mubr.f32.gmra.mrb[30].mxu1 %v9798_v48  ;;  %v4171_v62 = vpop.f32.mrb[85].mxu0  ;;  %v10681_v48 = vrot.slane %v9229_v28, 5 }
 0x4dd   : > { %4797 = vmatprep.mubr.f32.mxu1 %v3544_v47 }
 0x4de   : > { %v3548_v32 = vsel %vm10682_vm11, %v3545_v15, %v10681_v48 }
 0x4df   : > { %v10017_v37 = vpop.f32.mrb[86].mxu0 }
 0x4e0   : > { %4798 = vmatmul.mubr.f32.gmra.mrb[32].mxu1 %v9809_v3  ;;  %v4176_v61 = vpop.f32.mrb[87].mxu0  ;;  %v10683_v3 = vld [vmem:[#allocation3_spill] sm:$0xff] }
 0x4e1   : > { %4802 = vmatprep.mubr.f32.mxu1 %v3546_v29 }
 0x4e3   : > { %v10021_v10 = vpop.f32.mrb[88].mxu0 }
 0x4e4   : > { %4803 = vmatmul.mubr.f32.gmra.mrb[34].mxu1 %v9820_v59  ;;  %v4181_v26 = vpop.f32.mrb[89].mxu0 }
 0x4e5   : > { %4807 = vmatprep.mubr.f32.mxu1 %v3548_v32 }
 0x4e7   : > { %v10027_v30 = vpop.f32.mrb[90].mxu0 }
 0x4e8   : > { %4808 = vmatmul.mubr.f32.gmra.mrb[36].mxu1 %v9831_v54  ;;  %v4186_v53 = vpop.f32.mrb[91].mxu0  ;;  %v10686_v54 = vrot.slane %v9719_v63, 4 }
 0x4e9   : > { %4812 = vmatprep.mubr.f32.mxu1 %v10683_v3 }
 0x4ea   : > { %v3479_v58 = vsel %vm10687_vm12, %v3438_v21, %v10686_v54 }
 0x4eb   : > { %v10031_v11 = vpop.f32.mrb[92].mxu0 }
 0x4ec   : > { %4813 = vmatmul.mubr.f32.gmra.mrb[38].mxu1 %v10603_v19  ;;  %v4191_v20 = vpop.f32.mrb[93].mxu0 }
 0x4ed   : > { %4817 = vmatprep.mubr.f32.mxu1 %v10684_v5 }
 0x4ef   : > { %v10035_v59 = vpop.f32.mrb[94].mxu0 }
 0x4f0   : > { %4818 = vmatmul.mubr.f32.gmra.mrb[40].mxu1 %v9854_v31  ;;  %v4196_v28 = vpop.f32.mrb[95].mxu0 }
 0x4f1   : > { %4822 = vmatprep.mubr.f32.mxu1 %v10685_v4 }
 0x4f3   : > { %v10039_v38 = vpop.f32.mrb[96].mxu0 }
 0x4f4   : > { %4823 = vmatmul.mubr.f32.gmra.mrb[42].mxu1 %v3479_v58  ;;  %v4201_v19 = vpop.f32.mrb[97].mxu0 }
 0x4f5   : > { %4827 = vmatprep.mubr.f32.mxu1 %v9786_v17 }
 0x4f7   : > { %v10047_v60 = vpop.f32.mrb[98].mxu0 }
 0x4f8   : > { %4828 = vmatmul.mubr.f32.gmra.mrb[44].mxu1 %v10688_v1  ;;  %v4206_v31 = vpop.f32.mrb[99].mxu0 }
 0x4fb   : > { %v10050_v52 = vpop.f32.mrb[100].mxu0 }
 0x4fc   : > { %v4211_v45 = vpop.f32.mrb[101].mxu0 }
 0x4ff   : > { %v10052_v0 = vpop.f32.mrb[102].mxu0 }
 0x500   : > { %v4216_v51 = vpop.f32.mrb[103].mxu0 }
 0x503   : > { %v10054_v63 = vpop.f32.mrb[104].mxu0 }
 0x504   : > { %v4221_v56 = vpop.f32.mrb[105].mxu0 }
 0x505   : > { %v10107_v56 = vld [vmem:[%s10283_s4] ss:$0 sm:$0xff] }
 0x506   : > { %v5911_v55 = vadd.f32 %v10107_v56, %v10012_v27  ;;  %v5913_v27 = vadd.f32 %v10107_v56, %v10017_v37 }
 0x507   : > { %v10056_v43 = vpop.f32.mrb[106].mxu0 }
 0x508   : > { %v4226_v21 = vpop.f32.mrb[107].mxu0 }
 0x509   : > { %v5909_v21 = vadd.f32 %v10107_v56, %v10007_v57 }
 0x50b   : > { %v5595_v50 = vpop.f32.mrb[154].mxu0 }
 0x50c   : > { %v4899_v44 = vpop.f32.mrb[155].mxu0 }
 0x50f   : > { %v10058_v17 = vpop.f32.mrb[156].mxu0 }
 0x510   : > { %v4909_v34 = vpop.f32.mrb[157].mxu0 }
 0x513   : > { %v10060_v36 = vpop.f32.mrb[158].mxu0 }
 0x514   : > { %v10062_v62 = vpop.f32.mrb[159].mxu0 }
 0x517   : > { %v10064_v47 = vpop.f32.mrb[160].mxu0 }
 0x518   : > { %v10066_v15 = vpop.f32.mrb[161].mxu0 }
 0x51b   : > { %v10068_v61 = vpop.f32.mrb[162].mxu0 }
 0x51c   : > { %v10070_v29 = vpop.f32.mrb[163].mxu0 }
 0x51f   : > { %v10072_v26 = vpop.f32.mrb[164].mxu0 }
 0x520   : > { %v10074_v48 = vpop.f32.mrb[165].mxu0 }
 0x523   : > { %v10076_v32 = vpop.f32.mrb[166].mxu0 }
 0x524   : > { %v10078_v53 = vpop.f32.mrb[167].mxu0 }
 0x527   : > { %v10080_v3 = vpop.f32.mrb[168].mxu0 }
 0x528   : > { %v10082_v20 = vpop.f32.mrb[169].mxu0 }
 0x52b   : > { %v10084_v5 = vpop.f32.mrb[170].mxu0 }
 0x52c   : > { %v10086_v28 = vpop.f32.mrb[171].mxu0 }
 0x52f   : > { %v10088_v4 = vpop.f32.mrb[172].mxu0 }
 0x530   : > { %v10090_v54 = vpop.f32.mrb[173].mxu0 }
 0x533   : > { %v10092_v58 = vpop.f32.mrb[174].mxu0 }
 0x534   : > { %v10094_v19 = vpop.f32.mrb[175].mxu0 }
 0x537   : > { %v10096_v1 = vpop.f32.mrb[176].mxu0 }
 0x538   : > { %v10098_v31 = vpop.f32.mrb[177].mxu0 }
 0x53b   : > { %v10100_v45 = vpop.f32.mrb[178].mxu0 }
 0x53c   : > { %10689 = vst [vmem:[#allocation32_spill] sm:$0xff] %v10100_v45  ;;  %v10102_v51 = vpop.f32.mrb[179].mxu0 }
 0x53d   : > { %10690 = vst [vmem:[#allocation28_spill] sm:$0xff] %v10102_v51 }
 0x53f   : > { %v4654_v33 = vpop.f32.mrb[46].mxu1  ;;  %v10111_v49 = vpop.f32.mrb[180].mxu0 }
 0x540   : > { %10691 = vst [vmem:[#allocation35_spill] sm:$0xff] %v10111_v49  ;;  %v5910_v35 = vadd.f32 %v5909_v21, %v4654_v33  ;;  %v4656_v23 = vpop.f32.mrb[47].mxu1  ;;  %v10114_v42 = vpop.f32.mrb[181].mxu0 }
 0x541   : > { %10692 = vst [vmem:[#allocation33_spill] sm:$0xff] %v10114_v42 }
 0x542   : > { %v4900_v39 = vadd.f32 %v5910_v35, %v4899_v44 }
 0x543   : > { %v4659_v22 = vpop.f32.mrb[48].mxu1  ;;  %v10118_v24 = vpop.f32.mrb[182].mxu0 }
 0x544   : > { %10693 = vst [vmem:[#allocation36_spill] sm:$0xff] %v10118_v24  ;;  %vm5078_vm13 = vcmp.gt.f32.partialorder %v4900_v39, 0.0  ;;  %v5114_v57 = vmul.f32 0.1, %v4900_v39  ;;  %v5912_v49 = vadd.f32 %v5911_v55, %v4659_v22  ;;  %v4661_v33 = vpop.f32.mrb[49].mxu1  ;;  %v10125_v23 = vpop.f32.mrb[183].mxu0  ;;  %v5915_v22 = vadd.f32 %v10107_v56, %v10021_v10 }
 0x546   : > { %v5150_v35 = vsel %vm5078_vm13, %v4900_v39, %v5114_v57  ;;  %v4905_v44 = vadd.f32 %v5912_v49, %v5595_v50 }
 0x547   : > { %5186 = vst [vmem:[%s10123_s28] sm:$0xff] %v5150_v35  ;;  %v4664_v21 = vpop.f32.mrb[50].mxu1  ;;  %v10130_v24 = vpop.f32.mrb[184].mxu0 }
 0x548   : > { %vm5079_vm14 = vcmp.gt.f32.partialorder %v4905_v44, 0.0  ;;  %v5115_v42 = vmul.f32 0.1, %v4905_v44  ;;  %v5914_v45 = vadd.f32 %v5913_v27, %v4664_v21  ;;  %v4666_v25 = vpop.f32.mrb[51].mxu1  ;;  %v10132_v51 = vpop.f32.mrb[185].mxu0 }
 0x549   : > { %v5917_v25 = vadd.f32 %v10107_v56, %v10027_v30 }
 0x54a   : > { %v5151_v55 = vsel %vm5079_vm14, %v4905_v44, %v5115_v42  ;;  %v4910_v33 = vadd.f32 %v5914_v45, %v4909_v34 }
 0x54b   : > { %5187 = vst [vmem:[%s10123_s28 + $0x8] sm:$0xff] %v5151_v55  ;;  %v4669_v37 = vpop.f32.mrb[52].mxu1  ;;  %v10137_v39 = vpop.f32.mrb[186].mxu0  ;;  %v5919_v55 = vadd.f32 %v10107_v56, %v10031_v11 }
 0x54c   : > { %vm5080_vm15 = vcmp.gt.f32.partialorder %v4910_v33, 0.0  ;;  %v5116_v49 = vmul.f32 0.1, %v4910_v33  ;;  %v5916_v50 = vadd.f32 %v5915_v22, %v4669_v37  ;;  %v4671_v57 = vpop.f32.mrb[53].mxu1  ;;  %v10139_v35 = vpop.f32.mrb[187].mxu0 }
 0x54d   : > { %v5921_v57 = vadd.f32 %v10107_v56, %v10035_v59 }
 0x54e   : > { %v5152_v27 = vsel %vm5080_vm15, %v4910_v33, %v5116_v49  ;;  %v4915_v21 = vadd.f32 %v5916_v50, %v10058_v17 }
 0x54f   : > { %5188 = vst [vmem:[%s10123_s28 + $0x10] sm:$0xff] %v5152_v27  ;;  %v4674_v42 = vpop.f32.mrb[54].mxu1  ;;  %v10145_v10 = vpop.f32.mrb[188].mxu0 }
 0x550   : > { %vm5081_vm7 = vcmp.gt.f32.partialorder %v4915_v21, 0.0  ;;  %v5117_v34 = vmul.f32 0.1, %v4915_v21  ;;  %v5918_v45 = vadd.f32 %v5917_v25, %v4674_v42  ;;  %v4676_v44 = vpop.f32.mrb[55].mxu1  ;;  %v10147_v22 = vpop.f32.mrb[189].mxu0 }
 0x552   : > { %v5153_v37 = vsel %vm5081_vm7, %v4915_v21, %v5117_v34  ;;  %v4920_v30 = vadd.f32 %v5918_v45, %v10062_v62  ;;  %v5923_v34 = vadd.f32 %v10107_v56, %v10039_v38 }
 0x553   : > { %5189 = vst [vmem:[%s10123_s28 + $0x18] sm:$0xff] %v5153_v37  ;;  %v4679_v33 = vpop.f32.mrb[56].mxu1 }
 0x554   : > { %vm5082_vm0 = vcmp.gt.f32.partialorder %v4920_v30, 0.0  ;;  %v5118_v17 = vmul.f32 0.1, %v4920_v30  ;;  %v5920_v49 = vadd.f32 %v5919_v55, %v4679_v33  ;;  %v4681_v50 = vpop.f32.mrb[57].mxu1 }
 0x556   : > { %v5154_v25 = vsel %vm5082_vm0, %v4920_v30, %v5118_v17  ;;  %v4925_v27 = vadd.f32 %v5920_v49, %v10060_v36  ;;  %v5925_v30 = vadd.f32 %v10107_v56, %v10047_v60 }
 0x557   : > { %5190 = vst [vmem:[%s10123_s28 + $0x20] sm:$0xff] %v5154_v25  ;;  %v4684_v42 = vpop.f32.mrb[58].mxu1 }
 0x558   : > { %vm5083_vm8 = vcmp.gt.f32.partialorder %v4925_v27, 0.0  ;;  %v5119_v11 = vmul.f32 0.1, %v4925_v27  ;;  %v5922_v21 = vadd.f32 %v5921_v57, %v4684_v42  ;;  %v4686_v62 = vpop.f32.mrb[59].mxu1  ;;  %v5927_v57 = vadd.f32 %v10107_v56, %v10050_v52 }
 0x55a   : > { %v5155_v45 = vsel %vm5083_vm8, %v4925_v27, %v5119_v11  ;;  %v4930_v44 = vadd.f32 %v5922_v21, %v10066_v15  ;;  %v5929_v21 = vadd.f32 %v10107_v56, %v10052_v0 }
 0x55b   : > { %5191 = vst [vmem:[%s10123_s28 + $0x28] sm:$0xff] %v5155_v45  ;;  %v4689_v55 = vpop.f32.mrb[60].mxu1 }
 0x55c   : > { %vm5084_vm9 = vcmp.gt.f32.partialorder %v4930_v44, 0.0  ;;  %v5120_v59 = vmul.f32 0.1, %v4930_v44  ;;  %v5924_v37 = vadd.f32 %v5923_v34, %v4689_v55  ;;  %v4691_v36 = vpop.f32.mrb[61].mxu1  ;;  %v5931_v55 = vadd.f32 %v10107_v56, %v10054_v63 }
 0x55e   : > { %v5156_v33 = vsel %vm5084_vm9, %v4930_v44, %v5120_v59  ;;  %v4935_v17 = vadd.f32 %v5924_v37, %v10064_v47 }
 0x55f   : > { %5192 = vst [vmem:[%s10123_s28 + $0x30] sm:$0xff] %v5156_v33  ;;  %v4694_v49 = vpop.f32.mrb[62].mxu1  ;;  %v5933_v33 = vadd.f32 %v10107_v56, %v10056_v43 }
 0x560   : > { %vm5085_vm3 = vcmp.gt.f32.partialorder %v4935_v17, 0.0  ;;  %v5121_v38 = vmul.f32 0.1, %v4935_v17  ;;  %v5926_v50 = vadd.f32 %v5925_v30, %v4694_v49  ;;  %v4696_v15 = vpop.f32.mrb[63].mxu1 }
 0x561   : > { %v3985_v15 = vadd.f32 %v10107_v56, %v9891_v46 }
 0x562   : > { %v5157_v25 = vsel %vm5085_vm3, %v4935_v17, %v5121_v38  ;;  %v4940_v27 = vadd.f32 %v5926_v50, %v10070_v29 }
 0x563   : > { %5193 = vst [vmem:[%s10123_s28 + $0x38] sm:$0xff] %v5157_v25  ;;  %v4699_v42 = vpop.f32.mrb[64].mxu1 }
 0x564   : > { %vm5086_vm5 = vcmp.gt.f32.partialorder %v4940_v27, 0.0  ;;  %v5122_v60 = vmul.f32 0.1, %v4940_v27  ;;  %v5928_v11 = vadd.f32 %v5927_v57, %v4699_v42  ;;  %v4701_v47 = vpop.f32.mrb[65].mxu1 }
 0x566   : > { %v5158_v62 = vsel %vm5086_vm5, %v4940_v27, %v5122_v60  ;;  %v4945_v34 = vadd.f32 %v5928_v11, %v10068_v61  ;;  %v3990_v60 = vadd.f32 %v10107_v56, %v9896_v6 }
 0x567   : > { %5194 = vst [vmem:[%s10123_s28 + $0x40] sm:$0xff] %v5158_v62  ;;  %v4704_v45 = vpop.f32.mrb[66].mxu1 }
 0x568   : > { %vm5087_vm4 = vcmp.gt.f32.partialorder %v4945_v34, 0.0  ;;  %v5123_v52 = vmul.f32 0.1, %v4945_v34  ;;  %v5930_v44 = vadd.f32 %v5929_v21, %v4704_v45  ;;  %v4706_v29 = vpop.f32.mrb[67].mxu1 }
 0x56a   : > { %v5159_v59 = vsel %vm5087_vm4, %v4945_v34, %v5123_v52  ;;  %v4950_v37 = vadd.f32 %v5930_v44, %v10074_v48  ;;  %v3995_v34 = vadd.f32 %v10107_v56, %v9900_v7 }
 0x56b   : > { %5195 = vst [vmem:[%s10123_s28 + $0x48] sm:$0xff] %v5159_v59  ;;  %v4709_v36 = vpop.f32.mrb[68].mxu1 }
 0x56c   : > { %vm5088_vm10 = vcmp.gt.f32.partialorder %v4950_v37, 0.0  ;;  %v5124_v0 = vmul.f32 0.1, %v4950_v37  ;;  %v5932_v30 = vadd.f32 %v5931_v55, %v4709_v36  ;;  %v4711_v61 = vpop.f32.mrb[69].mxu1  ;;  %v4000_v55 = vadd.f32 %v10107_v56, %v9905_v14 }
 0x56e   : > { %v5160_v17 = vsel %vm5088_vm10, %v4950_v37, %v5124_v0  ;;  %v4955_v49 = vadd.f32 %v5932_v30, %v10072_v26  ;;  %v4005_v30 = vadd.f32 %v10107_v56, %v9912_v13 }
 0x56f   : > { %5196 = vst [vmem:[%s10123_s28 + $0x50] sm:$0xff] %v5160_v17  ;;  %v4714_v38 = vpop.f32.mrb[70].mxu1 }
 0x570   : > { %vm5089_vm2 = vcmp.gt.f32.partialorder %v4955_v49, 0.0  ;;  %v5125_v63 = vmul.f32 0.1, %v4955_v49  ;;  %v5934_v50 = vadd.f32 %v5933_v33, %v4714_v38  ;;  %v4716_v48 = vpop.f32.mrb[71].mxu1  ;;  %v4010_v38 = vadd.f32 %v10107_v56, %v9917_v12 }
 0x572   : > { %v5161_v57 = vsel %vm5089_vm2, %v4955_v49, %v5125_v63  ;;  %v4960_v25 = vadd.f32 %v5934_v50, %v10078_v53 }
 0x573   : > { %5197 = vst [vmem:[%s10123_s28 + $0x58] sm:$0xff] %v5161_v57  ;;  %v4719_v27 = vpop.f32.mrb[0].mxu1  ;;  %v4015_v57 = vadd.f32 %v10107_v56, %v9922_v18 }
 0x574   : > { %vm5090_vm1 = vcmp.gt.f32.partialorder %v4960_v25, 0.0  ;;  %v5126_v43 = vmul.f32 0.1, %v4960_v25  ;;  %v5936_v42 = vadd.f32 %v4719_v27, %v3985_v15  ;;  %v4721_v26 = vpop.f32.mrb[1].mxu1 }
 0x575   : > { %v4020_v26 = vadd.f32 %v10107_v56, %v9927_v9 }
 0x576   : > { %v5162_v11 = vsel %vm5090_vm1, %v4960_v25, %v5126_v43  ;;  %v4965_v47 = vadd.f32 %v5936_v42, %v10076_v32 }
 0x577   : > { %5198 = vst [vmem:[%s10123_s28 + $0x60] sm:$0xff] %v5162_v11  ;;  %v4724_v21 = vpop.f32.mrb[2].mxu1 }
 0x578   : > { %vm5091_vm6 = vcmp.gt.f32.partialorder %v4965_v47, 0.0  ;;  %v5127_v46 = vmul.f32 0.1, %v4965_v47  ;;  %v5938_v62 = vadd.f32 %v4724_v21, %v3990_v60  ;;  %v4726_v53 = vpop.f32.mrb[3].mxu1 }
 0x57a   : > { %v5163_v45 = vsel %vm5091_vm6, %v4965_v47, %v5127_v46  ;;  %v4970_v52 = vadd.f32 %v5938_v62, %v10082_v20  ;;  %v4025_v46 = vadd.f32 %v10107_v56, %v9932_v41 }
 0x57b   : > { %5199 = vst [vmem:[%s10123_s28 + $0x68] sm:$0xff] %v5163_v45  ;;  %v4729_v44 = vpop.f32.mrb[4].mxu1 }
 0x57c   : > { %vm5092_vm11 = vcmp.gt.f32.partialorder %v4970_v52, 0.0  ;;  %v5128_v6 = vmul.f32 0.1, %v4970_v52  ;;  %v5940_v29 = vadd.f32 %v4729_v44, %v3995_v34  ;;  %v4731_v32 = vpop.f32.mrb[5].mxu1 }
 0x57e   : > { %v5164_v59 = vsel %vm5092_vm11, %v4970_v52, %v5128_v6  ;;  %v4975_v37 = vadd.f32 %v5940_v29, %v10080_v3  ;;  %v4030_v52 = vadd.f32 %v10107_v56, %v9937_v16 }
 0x57f   : > { %5200 = vst [vmem:[%s10123_s28 + $0x70] sm:$0xff] %v5164_v59  ;;  %v4734_v36 = vpop.f32.mrb[6].mxu1 }
 0x580   : > { %vm5093_vm12 = vcmp.gt.f32.partialorder %v4975_v37, 0.0  ;;  %v5129_v7 = vmul.f32 0.1, %v4975_v37  ;;  %v5942_v0 = vadd.f32 %v4734_v36, %v4000_v55  ;;  %v4736_v20 = vpop.f32.mrb[7].mxu1  ;;  %v4035_v55 = vadd.f32 %v10107_v56, %v9942_v8 }
 0x582   : > { %v5165_v61 = vsel %vm5093_vm12, %v4975_v37, %v5129_v7  ;;  %v4980_v33 = vadd.f32 %v5942_v0, %v10086_v28  ;;  %v4040_v0 = vadd.f32 %v10107_v56, %v9947_v2 }
 0x583   : > { %5201 = vst [vmem:[%s10123_s28 + $0x78] sm:$0xff] %v5165_v61  ;;  %v4739_v17 = vpop.f32.mrb[8].mxu1 }
 0x584   : > { %vm5094_vm13 = vcmp.gt.f32.partialorder %v4980_v33, 0.0  ;;  %v5130_v14 = vmul.f32 0.1, %v4980_v33  ;;  %v5944_v49 = vadd.f32 %v4739_v17, %v4005_v30  ;;  %v4741_v3 = vpop.f32.mrb[9].mxu1  ;;  %v4045_v17 = vadd.f32 %v10107_v56, %v9952_v40 }
 0x586   : > { %v5166_v63 = vsel %vm5094_vm13, %v4980_v33, %v5130_v14  ;;  %v4985_v50 = vadd.f32 %v5944_v49, %v10084_v5  ;;  %v10694_v49 = vld [vmem:[#allocation28_spill] sm:$0xff] }
 0x587   : > { %5202 = vst [vmem:[%s10123_s28 + $0x80] sm:$0xff] %v5166_v63  ;;  %v4744_v48 = vpop.f32.mrb[10].mxu1 }
 0x588   : > { %vm5095_vm14 = vcmp.gt.f32.partialorder %v4985_v50, 0.0  ;;  %v5131_v13 = vmul.f32 0.1, %v4985_v50  ;;  %v5946_v15 = vadd.f32 %v4744_v48, %v4010_v38  ;;  %v4746_v28 = vpop.f32.mrb[11].mxu1 }
 0x58a   : > { %v5167_v25 = vsel %vm5095_vm14, %v4985_v50, %v5131_v13  ;;  %v4990_v27 = vadd.f32 %v5946_v15, %v10090_v54  ;;  %v10695_v50 = vld [vmem:[#allocation10_spill] sm:$0xff]  ;;  %v10696_v15 = vld [vmem:[#allocation32_spill] sm:$0xff] }
 0x58b   : > { %5203 = vst [vmem:[%s10123_s28 + $0x88] sm:$0xff] %v5167_v25  ;;  %v4749_v43 = vpop.f32.mrb[12].mxu1  ;;  %v4050_v48 = vadd.f32 %v10107_v56, %v10695_v50 }
 0x58c   : > { %vm5096_vm15 = vcmp.gt.f32.partialorder %v4990_v27, 0.0  ;;  %v5132_v12 = vmul.f32 0.1, %v4990_v27  ;;  %v5948_v42 = vadd.f32 %v4749_v43, %v4015_v57  ;;  %v4751_v5 = vpop.f32.mrb[13].mxu1  ;;  %v10697_v43 = vld [vmem:[#allocation12_spill] sm:$0xff] }
 0x58d   : > { %v10698_v5 = vld [vmem:[#allocation33_spill] sm:$0xff] }
 0x58e   : > { %v5168_v60 = vsel %vm5096_vm15, %v4990_v27, %v5132_v12  ;;  %v4995_v11 = vadd.f32 %v5948_v42, %v10088_v4  ;;  %v4055_v12 = vadd.f32 %v10107_v56, %v10697_v43  ;;  %v10707_v43 = vld [vmem:[#allocation4_spill] sm:$0xff] }
 0x58f   : > { %5204 = vst [vmem:[%s10123_s28 + $0x90] sm:$0xff] %v5168_v60  ;;  %v4754_v47 = vpop.f32.mrb[14].mxu1 }
 0x590   : > { %vm5097_vm7 = vcmp.gt.f32.partialorder %v4995_v11, 0.0  ;;  %v5133_v18 = vmul.f32 0.1, %v4995_v11  ;;  %v5950_v21 = vadd.f32 %v4754_v47, %v4020_v26  ;;  %v4756_v54 = vpop.f32.mrb[15].mxu1 }
 0x592   : > { %v5169_v62 = vsel %vm5097_vm7, %v4995_v11, %v5133_v18  ;;  %v5000_v53 = vadd.f32 %v5950_v21, %v10094_v19  ;;  %v10699_v21 = vld [vmem:[#allocation31_spill] sm:$0xff] }
 0x593   : > { %5205 = vst [vmem:[%s10123_s28 + $0x98] sm:$0xff] %v5169_v62  ;;  %v4759_v34 = vpop.f32.mrb[16].mxu1  ;;  %v4060_v54 = vadd.f32 %v10107_v56, %v10699_v21  ;;  %v10700_v62 = vld [vmem:[#allocation35_spill] sm:$0xff] }
 0x594   : > { %vm5098_vm0 = vcmp.gt.f32.partialorder %v5000_v53, 0.0  ;;  %v5134_v9 = vmul.f32 0.1, %v5000_v53  ;;  %v5952_v45 = vadd.f32 %v4759_v34, %v4025_v46  ;;  %v4761_v4 = vpop.f32.mrb[17].mxu1 }
 0x596   : > { %v5170_v44 = vsel %vm5098_vm0, %v5000_v53, %v5134_v9  ;;  %v5005_v6 = vadd.f32 %v5952_v45, %v10092_v58 }
 0x597   : > { %5206 = vst [vmem:[%s10123_s28 + $0xa0] sm:$0xff] %v5170_v44  ;;  %v4764_v29 = vpop.f32.mrb[18].mxu1 }
 0x598   : > { %vm5099_vm8 = vcmp.gt.f32.partialorder %v5005_v6, 0.0  ;;  %v5135_v41 = vmul.f32 0.1, %v5005_v6  ;;  %v5954_v32 = vadd.f32 %v4764_v29, %v4030_v52  ;;  %v4766_v19 = vpop.f32.mrb[19].mxu1  ;;  %v10701_v52 = vld [vmem:[#allocation2_spill] sm:$0xff] }
 0x599   : > { %v4065_v44 = vadd.f32 %v10107_v56, %v10701_v52 }
 0x59a   : > { %v5171_v59 = vsel %vm5099_vm8, %v5005_v6, %v5135_v41  ;;  %v5010_v37 = vadd.f32 %v5954_v32, %v10098_v31 }
 0x59b   : > { %5207 = vst [vmem:[%s10123_s28 + $0xa8] sm:$0xff] %v5171_v59  ;;  %v4769_v36 = vpop.f32.mrb[20].mxu1  ;;  %v10702_v59 = vld [vmem:[#allocation21_spill] sm:$0xff] }
 0x59c   : > { %vm5100_vm9 = vcmp.gt.f32.partialorder %v5010_v37, 0.0  ;;  %v5136_v16 = vmul.f32 0.1, %v5010_v37  ;;  %v5956_v7 = vadd.f32 %v4769_v36, %v4035_v55  ;;  %v4771_v58 = vpop.f32.mrb[21].mxu1 }
 0x59e   : > { %v5172_v20 = vsel %vm5100_vm9, %v5010_v37, %v5136_v16  ;;  %v5015_v30 = vadd.f32 %v5956_v7, %v10096_v1  ;;  %v4070_v37 = vadd.f32 %v10107_v56, %v10702_v59  ;;  %v10703_v16 = vld [vmem:[#allocation36_spill] sm:$0xff] }
 0x59f   : > { %5208 = vst [vmem:[%s10123_s28 + $0xb0] sm:$0xff] %v5172_v20  ;;  %v4774_v61 = vpop.f32.mrb[22].mxu1 }
 0x5a0   : > { %vm5101_vm3 = vcmp.gt.f32.partialorder %v5015_v30, 0.0  ;;  %v5137_v8 = vmul.f32 0.1, %v5015_v30  ;;  %v5958_v33 = vadd.f32 %v4774_v61, %v4040_v0  ;;  %v4776_v31 = vpop.f32.mrb[23].mxu1 }
 0x5a2   : > { %v5173_v14 = vsel %vm5101_vm3, %v5015_v30, %v5137_v8  ;;  %v5020_v3 = vadd.f32 %v5958_v33, %v10694_v49  ;;  %v10704_v30 = vld [vmem:[#allocation7_spill] sm:$0xff] }
 0x5a3   : > { %5209 = vst [vmem:[%s10123_s28 + $0xb8] sm:$0xff] %v5173_v14  ;;  %v4779_v38 = vpop.f32.mrb[24].mxu1  ;;  %v4075_v61 = vadd.f32 %v10107_v56, %v10704_v30 }
 0x5a4   : > { %vm5102_vm5 = vcmp.gt.f32.partialorder %v5020_v3, 0.0  ;;  %v5138_v2 = vmul.f32 0.1, %v5020_v3  ;;  %v5960_v63 = vadd.f32 %v4779_v38, %v4045_v17  ;;  %v4781_v1 = vpop.f32.mrb[25].mxu1 }
 0x5a6   : > { %v5174_v13 = vsel %vm5102_vm5, %v5020_v3, %v5138_v2  ;;  %v5025_v28 = vadd.f32 %v5960_v63, %v10696_v15  ;;  %v10705_v3 = vld [vmem:[#allocation8_spill] sm:$0xff] }
 0x5a7   : > { %5210 = vst [vmem:[%s10123_s28 + $0xc0] sm:$0xff] %v5174_v13  ;;  %v4784_v57 = vpop.f32.mrb[26].mxu1  ;;  %v4080_v38 = vadd.f32 %v10107_v56, %v10705_v3  ;;  %v10706_v13 = vld [vmem:[#allocation6_spill] sm:$0xff] }
 0x5a8   : > { %vm5103_vm4 = vcmp.gt.f32.partialorder %v5025_v28, 0.0  ;;  %v5139_v40 = vmul.f32 0.1, %v5025_v28  ;;  %v5962_v25 = vadd.f32 %v4784_v57, %v4050_v48  ;;  %v4786_v27 = vpop.f32.mrb[27].mxu1  ;;  %v4085_v15 = vadd.f32 %v10107_v56, %v10706_v13 }
 0x5aa   : > { %v5175_v42 = vsel %vm5103_vm4, %v5025_v28, %v5139_v40  ;;  %v5030_v26 = vadd.f32 %v5962_v25, %v10698_v5 }
 0x5ab   : > { %5211 = vst [vmem:[%s10123_s28 + $0xc8] sm:$0xff] %v5175_v42  ;;  %v4789_v60 = vpop.f32.mrb[28].mxu1 }
 0x5ac   : > { %vm5104_vm10 = vcmp.gt.f32.partialorder %v5030_v26, 0.0  ;;  %v5140_v11 = vmul.f32 0.1, %v5030_v26  ;;  %v5964_v47 = vadd.f32 %v4789_v60, %v4055_v12  ;;  %v4791_v18 = vpop.f32.mrb[29].mxu1  ;;  %v4090_v12 = vadd.f32 %v10107_v56, %v10707_v43 }
 0x5ae   : > { %v5176_v46 = vsel %vm5104_vm10, %v5030_v26, %v5140_v11  ;;  %v5035_v53 = vadd.f32 %v5964_v47, %v10700_v62  ;;  %v10708_v47 = vld [vmem:[#allocation5_spill] sm:$0xff] }
 0x5af   : > { %5212 = vst [vmem:[%s10123_s28 + $0xd0] sm:$0xff] %v5176_v46  ;;  %v4794_v34 = vpop.f32.mrb[30].mxu1  ;;  %v4095_v18 = vadd.f32 %v10107_v56, %v10708_v47 }
 0x5b0   : > { %vm5105_vm2 = vcmp.gt.f32.partialorder %v5035_v53, 0.0  ;;  %v5141_v9 = vmul.f32 0.1, %v5035_v53  ;;  %v5966_v45 = vadd.f32 %v4794_v34, %v4060_v54  ;;  %v4796_v4 = vpop.f32.mrb[31].mxu1 }
 0x5b2   : > { %v5177_v6 = vsel %vm5105_vm2, %v5035_v53, %v5141_v9  ;;  %v5040_v29 = vadd.f32 %v5966_v45, %v10125_v23 }
 0x5b3   : > { %5213 = vst [vmem:[%s10123_s28 + $0xd8] sm:$0xff] %v5177_v6  ;;  %v4799_v41 = vpop.f32.mrb[32].mxu1 }
 0x5b4   : > { %vm5106_vm1 = vcmp.gt.f32.partialorder %v5040_v29, 0.0  ;;  %v5142_v32 = vmul.f32 0.1, %v5040_v29  ;;  %v5968_v19 = vadd.f32 %v4799_v41, %v4065_v44  ;;  %v4801_v55 = vpop.f32.mrb[33].mxu1 }
 0x5b6   : > { %v5178_v36 = vsel %vm5106_vm1, %v5040_v29, %v5142_v32  ;;  %v5045_v7 = vadd.f32 %v5968_v19, %v10703_v16 }
 0x5b7   : > { %5214 = vst [vmem:[%s10123_s28 + $0xe0] sm:$0xff] %v5178_v36  ;;  %v4804_v58 = vpop.f32.mrb[34].mxu1 }
 0x5b8   : > { %vm5107_vm6 = vcmp.gt.f32.partialorder %v5045_v7, 0.0  ;;  %v5143_v0 = vmul.f32 0.1, %v5045_v7  ;;  %v5970_v20 = vadd.f32 %v4804_v58, %v4070_v37  ;;  %v4806_v23 = vpop.f32.mrb[35].mxu1 }
 0x5ba   : > { %v5179_v8 = vsel %vm5107_vm6, %v5045_v7, %v5143_v0  ;;  %v5050_v33 = vadd.f32 %v5970_v20, %v10132_v51 }
 0x5bb   : > { %5215 = vst [vmem:[%s10123_s28 + $0xe8] sm:$0xff] %v5179_v8  ;;  %v4809_v31 = vpop.f32.mrb[36].mxu1 }
 0x5bc   : > { %vm5108_vm11 = vcmp.gt.f32.partialorder %v5050_v33, 0.0  ;;  %v5144_v17 = vmul.f32 0.1, %v5050_v33  ;;  %v5972_v14 = vadd.f32 %v4809_v31, %v4075_v61  ;;  %v4811_v49 = vpop.f32.mrb[37].mxu1 }
 0x5be   : > { %v5180_v2 = vsel %vm5108_vm11, %v5050_v33, %v5144_v17  ;;  %v5055_v63 = vadd.f32 %v5972_v14, %v10130_v24 }
 0x5bf   : > { %5216 = vst [vmem:[%s10123_s28 + $0xf0] sm:$0xff] %v5180_v2  ;;  %v4814_v1 = vpop.f32.mrb[38].mxu1 }
 0x5c0   : > { %vm5109_vm12 = vcmp.gt.f32.partialorder %v5055_v63, 0.0  ;;  %v5145_v50 = vmul.f32 0.1, %v5055_v63  ;;  %v5974_v48 = vadd.f32 %v4814_v1, %v4080_v38  ;;  %v4816_v51 = vpop.f32.mrb[39].mxu1 }
 0x5c2   : > { %v5181_v28 = vsel %vm5109_vm12, %v5055_v63, %v5145_v50  ;;  %v5060_v57 = vadd.f32 %v5974_v48, %v10139_v35 }
 0x5c3   : > { %5217 = vst [vmem:[%s10123_s28 + $0xf8] sm:$0xff] %v5181_v28  ;;  %v4819_v40 = vpop.f32.mrb[40].mxu1 }
 0x5c4   : > { %vm5110_vm13 = vcmp.gt.f32.partialorder %v5060_v57, 0.0  ;;  %v5146_v25 = vmul.f32 0.1, %v5060_v57  ;;  %v5976_v27 = vadd.f32 %v4819_v40, %v4085_v15  ;;  %v4821_v24 = vpop.f32.mrb[41].mxu1 }
 0x5c6   : > { %v5182_v42 = vsel %vm5110_vm13, %v5060_v57, %v5146_v25  ;;  %v5065_v5 = vadd.f32 %v5976_v27, %v10137_v39 }
 0x5c7   : > { %5218 = vst [vmem:[%s10123_s28 + $0x100] sm:$0xff] %v5182_v42  ;;  %v4824_v26 = vpop.f32.mrb[42].mxu1 }
 0x5c8   : > { %vm5111_vm14 = vcmp.gt.f32.partialorder %v5065_v5, 0.0  ;;  %v5147_v60 = vmul.f32 0.1, %v5065_v5  ;;  %v5978_v11 = vadd.f32 %v4824_v26, %v4090_v12  ;;  %v4826_v35 = vpop.f32.mrb[43].mxu1 }
 0x5ca   : > { %v5183_v21 = vsel %vm5111_vm14, %v5065_v5, %v5147_v60  ;;  %v5070_v54 = vadd.f32 %v5978_v11, %v10147_v22 }
 0x5cb   : > { %5219 = vst [vmem:[%s10123_s28 + $0x108] sm:$0xff] %v5183_v21  ;;  %v4829_v46 = vpop.f32.mrb[44].mxu1 }
 0x5cc   : > { %vm5112_vm15 = vcmp.gt.f32.partialorder %v5070_v54, 0.0  ;;  %v5148_v62 = vmul.f32 0.1, %v5070_v54  ;;  %v5980_v53 = vadd.f32 %v4829_v46, %v4095_v18  ;;  %v4831_v39 = vpop.f32.mrb[45].mxu1 }
 0x5ce   : > { %v5184_v34 = vsel %vm5112_vm15, %v5070_v54, %v5148_v62  ;;  %v5075_v9 = vadd.f32 %v5980_v53, %v10145_v10 }
 0x5cf   : > { %5220 = vst [vmem:[%s10123_s28 + $0x110] sm:$0xff] %v5184_v34 }
 0x5d0   : > { %vm5113_vm7 = vcmp.gt.f32.partialorder %v5075_v9, 0.0  ;;  %v5149_v45 = vmul.f32 0.1, %v5075_v9 }
 0x5d2   : > { %v5185_v4 = vsel %vm5113_vm7, %v5075_v9, %v5149_v45 }
 0x5d3   : > { %5221 = vst [vmem:[%s10123_s28 + $0x118] sm:$0xff] %v5185_v4 }
 0x5d4 PF: > { %s16_s21 = sadd.s32 1, %s6178_s21  }
 0x5d5   : > { %p13_p4 = scmp.ge.s32.totalorder %s16_s21, 4  }
 0x5d7   :  { %15 = sbr.rel (!%p13_p4) target bundleno = 1 (0x1), region = 74 }

</bundles_post_ra>
